<compile_context>
chip_gen: v6e
topology: v6e:2x2x1
jax: 0.10.0
libtpu: 0.0.40
codegen_flags: <defaults>
</compile_context>

<pallas_src>
import jax
import jax.numpy as jnp
from jax.experimental import pallas as pl
from jax.experimental.pallas import tpu as pltpu


def _final_linear(x_img, pf, wl, bl, wft, bf, out_dtype):
    """final_output(concat([x_img, l0(pf)], 1)) without the concat."""
    x_pat = jnp.dot(pf, wl, preferred_element_type=jnp.float32) + bl      # (TB, 64)
    out = (jnp.sum(x_img * wft[:, :64], axis=-1, keepdims=True)
           + jnp.sum(x_pat * wft[:, 64:], axis=-1, keepdims=True)
           + bf)                                                           # (TB, 1)
    return out.astype(out_dtype)


def cancernet2_head_kernel_fullc(feat_ref, pf_ref, wd_ref, bd_ref,
                                 wl_ref, bl_ref, wft_ref, bf_ref, out_ref):
    # feat_ref: (TB, C, S)      backbone features, NCHW with H*W flattened
    # pf_ref:   (TB, P)   f32   patient (tabular) features
    # wd_ref:   (C, 64)   bf16  dense_output weight, pre-scaled by 1/S
    # bd_ref:   (1, 64)   f32 ; wl_ref: (P, 64) f32 ; bl_ref: (1, 64) f32
    # wft_ref:  (1, 128)  f32   final_output weight as a row ; bf_ref: (1, 1)
    # out_ref:  (TB, 1)   f32
    # GAP over the lane axis S (XLU reduce), f32 accumulation, no f32 copy.
    gap = jnp.sum(feat_ref[...], axis=-1, dtype=jnp.float32)              # (TB, C)
    x_img = jnp.dot(gap.astype(wd_ref.dtype), wd_ref[...],
                    preferred_element_type=jnp.float32) + bd_ref[...]     # (TB, 64)
    out_ref[...] = _final_linear(x_img, pf_ref[...], wl_ref[...], bl_ref[...],
                                 wft_ref[...], bf_ref[...], out_ref.dtype)


def cancernet2_head_kernel_tiled(feat_ref, pf_ref, wd_ref, bd_ref,
                                 wl_ref, bl_ref, wft_ref, bf_ref,
                                 out_ref, acc_ref):
    # Channel-tiled fallback: feat_ref (TB, TC, S); wd_ref (C, 128) bf16 whole
    # weight (lanes 64: are zero pad), constant index_map -> VMEM-resident,
    # sliced per channel tile here; acc_ref (TB, 128) f32 lane-dense scratch.
    c = pl.program_id(1)
    tc = feat_ref.shape[1]

    @pl.when(c == 0)
    def _init():
        acc_ref[...] = jnp.zeros_like(acc_ref)

    gap = jnp.sum(feat_ref[...], axis=-1, dtype=jnp.float32)              # (TB, TC)
    wd_blk = wd_ref[pl.ds(pl.multiple_of(c * tc, 8), tc), :]              # (TC, 128)
    acc_ref[...] += jnp.dot(gap.astype(wd_blk.dtype), wd_blk,
                            preferred_element_type=jnp.float32)           # (TB, 128)

    @pl.when(c == pl.num_programs(1) - 1)
    def _finalize():
        x_img = acc_ref[:, :64] + bd_ref[...]                             # (TB, 64)
        out_ref[...] = _final_linear(x_img, pf_ref[...], wl_ref[...], bl_ref[...],
                                     wft_ref[...], bf_ref[...], out_ref.dtype)


def _vmem_capacity_bytes():
    try:
        return int(pltpu.get_tpu_info().vmem_capacity_bytes)
    except Exception:
        return 64 << 20   # conservative fallback: v7x per-TensorCore VMEM


def _tile_options(dim, align):
    """Divisors of dim that are multiples of `align` (plus dim itself), descending."""
    opts = [d for d in range(dim, 0, -1) if dim % d == 0 and d % align == 0]
    if dim not in opts:
        opts.insert(0, dim)
    return opts


def _pick_tiles(B, C, S, itemsize, needs_f32_copy, feat_budget, block_b, block_c):
    tb_opts = [block_b] if block_b is not None else _tile_options(B, 8)
    tc_opts = [block_c] if block_c is not None else _tile_options(C, 8)

    def cost(tb, tc):
        blk = tb * tc * S * itemsize
        extra = tb * tc * S * 4 if needs_f32_copy else 0   # f32 copy in the reduce
        return 2 * blk + extra                             # double-buffered input

    best = None
    for tc in tc_opts:
        for tb in tb_opts:
            if cost(tb, tc) > feat_budget:
                continue
            # Prefer: (1) full-C blocks (single-pass kernel, no accumulator),
            # (2) B//TB >= 2 so the batch axis splits across v7x's two TCs,
            # (3) the largest feat block (amortize per-grid-step overhead).
            score = (tc == C, (B // tb) >= 2, tb * tc)
            if best is None or score > best[0]:
                best = (score, tb, tc)
    if best is None:                       # nothing fits; use the smallest tiles
        return tb_opts[-1], tc_opts[-1]
    return best[1], best[2]


def cancernet2_head(feat_nchw, patient_feat, params, *, block_b=None, block_c=None):
    """feat_nchw: (B, C, H, W) backbone feature maps; patient_feat: (B, P)."""
    B, C, H, W = feat_nchw.shape
    S = H * W
    P = patient_feat.shape[-1]
    wd, bd, wl, bl, wf, bf = params

    # NCHW consumed directly; merging the trailing (H, W) dims is free (no
    # transpose, no dtype round trip through HBM).
    feat = feat_nchw.reshape(B, C, S)

    # Fold the GAP's 1/S into the dense weight; bf16 weight, f32 accumulation.
    wd_s = (wd.astype(jnp.float32) / jnp.float32(S)).astype(jnp.bfloat16)  # (C, 64)
    bd32, wl32, bl32 = (bd.astype(jnp.float32), wl.astype(jnp.float32),
                        bl.astype(jnp.float32))
    wf_t = jnp.transpose(wf).astype(jnp.float32)                           # (1, 128)
    bf32 = bf.astype(jnp.float32)                                          # (1, 1)
    pf = patient_feat.astype(jnp.float32)

    # Chip-aware VMEM budget and tile selection.
    cap = _vmem_capacity_bytes()
    vmem_limit = max(32 << 20, int(cap * 0.75))
    feat_budget = vmem_limit - (4 << 20)       # headroom: weights, out, scratch
    TB, TC = _pick_tiles(B, C, S, feat.dtype.itemsize,
                         feat.dtype != jnp.float32, feat_budget,
                         block_b, block_c)
    assert B % TB == 0 and (TB % 8 == 0 or TB == B), (B, TB)
    assert C % TC == 0 and (TC % 8 == 0 or TC == C), (C, TC)

    if TC == C:
        # Single-pass path: no channel axis, no accumulator, weights resident.
        return pl.pallas_call(
            cancernet2_head_kernel_fullc,
            out_shape=jax.ShapeDtypeStruct((B, 1), jnp.float32),
            grid_spec=pltpu.PrefetchScalarGridSpec(
                num_scalar_prefetch=0,
                grid=(B // TB,),
                in_specs=[
                    pl.BlockSpec((TB, C, S), lambda b: (b, 0, 0)),   # feat
                    pl.BlockSpec((TB, P), lambda b: (b, 0)),         # patient feat
                    pl.BlockSpec((C, 64), lambda b: (0, 0)),         # wd / S (bf16)
                    pl.BlockSpec((1, 64), lambda b: (0, 0)),         # bd
                    pl.BlockSpec((P, 64), lambda b: (0, 0)),         # wl
                    pl.BlockSpec((1, 64), lambda b: (0, 0)),         # bl
                    pl.BlockSpec((1, 128), lambda b: (0, 0)),        # wf^T
                    pl.BlockSpec((1, 1), lambda b: (0, 0)),          # bf
                ],
                out_specs=pl.BlockSpec((TB, 1), lambda b: (b, 0)),
            ),
            compiler_params=pltpu.CompilerParams(
                dimension_semantics=("parallel",),
                vmem_limit_bytes=vmem_limit,
            ),
        )(feat, pf, wd_s, bd32, wl32, bl32, wf_t, bf32)

    # Channel-tiled fallback (a full-C block does not fit the VMEM budget).
    wd_pad = jnp.concatenate(
        [wd_s, jnp.zeros((C, 64), jnp.bfloat16)], axis=1)                 # (C, 128)
    return pl.pallas_call(
        cancernet2_head_kernel_tiled,
        out_shape=jax.ShapeDtypeStruct((B, 1), jnp.float32),
        grid_spec=pltpu.PrefetchScalarGridSpec(
            num_scalar_prefetch=0,
            grid=(B // TB, C // TC),
            in_specs=[
                pl.BlockSpec((TB, TC, S), lambda b, c: (b, c, 0)),   # feat
                pl.BlockSpec((TB, P), lambda b, c: (b, 0)),          # patient feat
                pl.BlockSpec((C, 128), lambda b, c: (0, 0)),         # wd / S, resident
                pl.BlockSpec((1, 64), lambda b, c: (0, 0)),          # bd
                pl.BlockSpec((P, 64), lambda b, c: (0, 0)),          # wl
                pl.BlockSpec((1, 64), lambda b, c: (0, 0)),          # bl
                pl.BlockSpec((1, 128), lambda b, c: (0, 0)),         # wf^T
                pl.BlockSpec((1, 1), lambda b, c: (0, 0)),           # bf
            ],
            out_specs=pl.BlockSpec((TB, 1), lambda b, c: (b, 0)),
            scratch_shapes=[pltpu.VMEM((TB, 128), jnp.float32)],
        ),
        compiler_params=pltpu.CompilerParams(
            dimension_semantics=("parallel", "arbitrary"),
            vmem_limit_bytes=vmem_limit,
        ),
    )(feat, pf, wd_pad, bd32, wl32, bl32, wf_t, bf32)


def init_params(key, features, num_patient_feat):
    """Deterministic torch-nn.Linear-style init (uniform(-1/sqrt(fan_in), ...))."""
    ks = jax.random.split(key, 6)

    def lin(kw, kb, fan_in, fan_out):
        bound = 1.0 / jnp.sqrt(jnp.float32(fan_in))
        w = jax.random.uniform(kw, (fan_in, fan_out), jnp.float32, -bound, bound)
        b = jax.random.uniform(kb, (1, fan_out), jnp.float32, -bound, bound)
        return w, b

    wd, bd = lin(ks[0], ks[1], features, 64)           # dense_output
    wl, bl = lin(ks[2], ks[3], num_patient_feat, 64)   # l0
    wf, bf = lin(ks[4], ks[5], 128, 1)                 # final_output
    return (wd, bd, wl, bl, wf, bf)


def reference_head(feat_nchw, patient_feat, params):
    """Pure-JAX f32 reference of the PyTorch forward (post-backbone)."""
    (wd, bd, wl, bl, wf, bf) = params
    gap = feat_nchw.mean(axis=-1).mean(axis=-1)         # (B, C)
    x_img = gap @ wd + bd
    x_pat = patient_feat @ wl + bl
    x = jnp.concatenate([x_img, x_pat], axis=1)         # (B, 128)
    return x @ wf + bf                                  # (B, 1)


if __name__ == "__main__":
    key = jax.random.PRNGKey(0)
    k_feat, k_pf, k_params = jax.random.split(key, 3)

    # Small stand-in for the EfficientNet-b3 output: batch=16, 256 channels,
    # 8x8 spatial, 8 tabular patient features.
    B, C, Hs, Ws, P = 16, 256, 8, 8, 8
    feat = jax.random.normal(k_feat, (B, C, Hs, Ws), jnp.float32)
    patient_feat = jax.random.normal(k_pf, (B, P), jnp.float32)
    params = init_params(k_params, features=C, num_patient_feat=P)

    ref = reference_head(feat, patient_feat, params)
    head = jax.jit(cancernet2_head, static_argnames=("block_b", "block_c"))

    # Default path: auto tiles -> TC == C single-pass kernel, grid over batch
    # only (batch axis "parallel" for the v7x dual-TensorCore split).
    out = jax.block_until_ready(head(feat, patient_feat, params))
    assert out.shape == (B, 1)
    # wd/gap use bf16 on the MXU path -> bf16-rounding-level tolerance.
    assert jnp.allclose(out, ref, atol=5e-3, rtol=5e-3), (out, ref)

    # Channel-tiled fallback path (forced), exercising the accumulator kernel.
    out_tiled = jax.block_until_ready(
        head(feat, patient_feat, params, block_b=8, block_c=128))
    assert jnp.allclose(out_tiled, ref, atol=5e-3, rtol=5e-3), (out_tiled, ref)

    print("KERNEL_OK")
</pallas_src>

<mosaic_0001>
module attributes {stable_mosaic.version = 11 : i64} {
  func.func @cancernet2_head_kernel_fullc(%arg0: i32, %arg1: memref<8x256x64xf32, #tpu.memory_space<vmem>>, %arg2: memref<8x8xf32, #tpu.memory_space<vmem>>, %arg3: memref<256x64xbf16, #tpu.memory_space<vmem>>, %arg4: memref<1x64xf32, #tpu.memory_space<vmem>>, %arg5: memref<8x64xf32, #tpu.memory_space<vmem>>, %arg6: memref<1x64xf32, #tpu.memory_space<vmem>>, %arg7: memref<1x128xf32, #tpu.memory_space<vmem>>, %arg8: memref<1x1xf32, #tpu.memory_space<vmem>>, %arg9: memref<8x1xf32, #tpu.memory_space<vmem>>) attributes {dimension_semantics = [#tpu.dimension_semantics<parallel>], iteration_bounds = array<i64: 2>, scalar_prefetch = 0 : i64, scratch_operands = 0 : i64, tpu.core_type = #tpu.core_type<tc>, window_params = [{transform_indices = @transform_0, window_bounds = array<i64: 8, 256, 64>}, {transform_indices = @transform_1, window_bounds = array<i64: 8, 8>}, {pipeline_mode = #tpu.pipeline_mode<synchronous>, transform_indices = @transform_2, window_bounds = array<i64: 256, 64>}, {pipeline_mode = #tpu.pipeline_mode<synchronous>, transform_indices = @transform_3, window_bounds = array<i64: 1, 64>}, {pipeline_mode = #tpu.pipeline_mode<synchronous>, transform_indices = @transform_4, window_bounds = array<i64: 8, 64>}, {pipeline_mode = #tpu.pipeline_mode<synchronous>, transform_indices = @transform_5, window_bounds = array<i64: 1, 64>}, {pipeline_mode = #tpu.pipeline_mode<synchronous>, transform_indices = @transform_6, window_bounds = array<i64: 1, 128>}, {pipeline_mode = #tpu.pipeline_mode<synchronous>, transform_indices = @transform_7, window_bounds = array<i64: 1, 1>}, {transform_indices = @transform_8, window_bounds = array<i64: 8, 1>}]} {
    %c0 = arith.constant 0 : index
    %c0_0 = arith.constant 0 : index
    %c0_1 = arith.constant 0 : index
    %0 = vector.load %arg1[%c0, %c0_0, %c0_1] : memref<8x256x64xf32, #tpu.memory_space<vmem>>, vector<8x256x64xf32>
    %cst = arith.constant dense<0.000000e+00> : vector<8x256xf32>
    %1 = vector.multi_reduction <add>, %0, %cst [2] : vector<8x256x64xf32> to vector<8x256xf32>
    %2 = arith.truncf %1 : vector<8x256xf32> to vector<8x256xbf16>
    %c0_2 = arith.constant 0 : index
    %c0_3 = arith.constant 0 : index
    %3 = vector.load %arg3[%c0_2, %c0_3] : memref<256x64xbf16, #tpu.memory_space<vmem>>, vector<256x64xbf16>
    %cst_4 = arith.constant dense<0.000000e+00> : vector<8x64xf32>
    %4 = tpu.matmul %2, %3, %cst_4 {dimension_numbers = #tpu.dot_dimension_numbers<[1], [0], [0], [1], [0, 0, 1, 1], [], []>} : vector<8x256xbf16>, vector<256x64xbf16>, vector<8x64xf32> -> vector<8x64xf32>
    %c0_5 = arith.constant 0 : index
    %c0_6 = arith.constant 0 : index
    %5 = vector.load %arg4[%c0_5, %c0_6] : memref<1x64xf32, #tpu.memory_space<vmem>>, vector<1x64xf32>
    %6 = vector.broadcast %5 : vector<1x64xf32> to vector<8x64xf32>
    %7 = arith.addf %4, %6 : vector<8x64xf32>
    %c0_7 = arith.constant 0 : index
    %c0_8 = arith.constant 0 : index
    %8 = vector.load %arg2[%c0_7, %c0_8] : memref<8x8xf32, #tpu.memory_space<vmem>>, vector<8x8xf32>
    %c0_9 = arith.constant 0 : index
    %c0_10 = arith.constant 0 : index
    %9 = vector.load %arg5[%c0_9, %c0_10] : memref<8x64xf32, #tpu.memory_space<vmem>>, vector<8x64xf32>
    %c0_11 = arith.constant 0 : index
    %c0_12 = arith.constant 0 : index
    %10 = vector.load %arg6[%c0_11, %c0_12] : memref<1x64xf32, #tpu.memory_space<vmem>>, vector<1x64xf32>
    %c0_13 = arith.constant 0 : index
    %c0_14 = arith.constant 0 : index
    %11 = vector.load %arg7[%c0_13, %c0_14] : memref<1x128xf32, #tpu.memory_space<vmem>>, vector<1x128xf32>
    %c0_15 = arith.constant 0 : index
    %c0_16 = arith.constant 0 : index
    %12 = vector.load %arg8[%c0_15, %c0_16] : memref<1x1xf32, #tpu.memory_space<vmem>>, vector<1x1xf32>
    %cst_17 = arith.constant dense<0.000000e+00> : vector<8x64xf32>
    %13 = tpu.matmul %8, %9, %cst_17 {dimension_numbers = #tpu.dot_dimension_numbers<[1], [0], [0], [1], [0, 0, 1, 1], [], []>} : vector<8x8xf32>, vector<8x64xf32>, vector<8x64xf32> -> vector<8x64xf32>
    %14 = vector.broadcast %10 : vector<1x64xf32> to vector<8x64xf32>
    %15 = arith.addf %13, %14 : vector<8x64xf32>
    %16 = vector.extract_strided_slice %11 {offsets = [0, 0], sizes = [1, 64], strides = [1, 1]} : vector<1x128xf32> to vector<1x64xf32>
    %17 = vector.broadcast %16 : vector<1x64xf32> to vector<8x64xf32>
    %18 = arith.mulf %7, %17 : vector<8x64xf32>
    %cst_18 = arith.constant dense<0.000000e+00> : vector<8xf32>
    %19 = vector.multi_reduction <add>, %18, %cst_18 [1] : vector<8x64xf32> to vector<8xf32>
    %20 = vector.shape_cast %19 : vector<8xf32> to vector<8x1xf32>
    %21 = vector.extract_strided_slice %11 {offsets = [0, 64], sizes = [1, 64], strides = [1, 1]} : vector<1x128xf32> to vector<1x64xf32>
    %22 = vector.broadcast %21 : vector<1x64xf32> to vector<8x64xf32>
    %23 = arith.mulf %15, %22 : vector<8x64xf32>
    %cst_19 = arith.constant dense<0.000000e+00> : vector<8xf32>
    %24 = vector.multi_reduction <add>, %23, %cst_19 [1] : vector<8x64xf32> to vector<8xf32>
    %25 = vector.shape_cast %24 : vector<8xf32> to vector<8x1xf32>
    %26 = arith.addf %20, %25 : vector<8x1xf32>
    %27 = vector.broadcast %12 : vector<1x1xf32> to vector<8x1xf32>
    %28 = arith.addf %26, %27 : vector<8x1xf32>
    %c0_20 = arith.constant 0 : index
    %c0_21 = arith.constant 0 : index
    %29 = vector.load %arg9[%c0_20, %c0_21] : memref<8x1xf32, #tpu.memory_space<vmem>>, vector<8x1xf32>
    tpu.vector_store %arg9[%c0_20, %c0_21], %28 {strides = array<i32>} : memref<8x1xf32, #tpu.memory_space<vmem>>, vector<8x1xf32>,
    return
  }
  func.func @transform_0(%arg0: i32) -> (i32, i32, i32) {
    %c0_i32 = arith.constant 0 : i32
    %c0_i32_0 = arith.constant 0 : i32
    %c0_i32_1 = arith.constant 0 : i32
    return %arg0, %c0_i32, %c0_i32_0 : i32, i32, i32
  }
  func.func @transform_1(%arg0: i32) -> (i32, i32) {
    %c0_i32 = arith.constant 0 : i32
    %c0_i32_0 = arith.constant 0 : i32
    return %arg0, %c0_i32 : i32, i32
  }
  func.func @transform_2(%arg0: i32) -> (i32, i32) {
    %c0_i32 = arith.constant 0 : i32
    %c0_i32_0 = arith.constant 0 : i32
    %c0_i32_1 = arith.constant 0 : i32
    return %c0_i32, %c0_i32_0 : i32, i32
  }
  func.func @transform_3(%arg0: i32) -> (i32, i32) {
    %c0_i32 = arith.constant 0 : i32
    %c0_i32_0 = arith.constant 0 : i32
    %c0_i32_1 = arith.constant 0 : i32
    return %c0_i32, %c0_i32_0 : i32, i32
  }
  func.func @transform_4(%arg0: i32) -> (i32, i32) {
    %c0_i32 = arith.constant 0 : i32
    %c0_i32_0 = arith.constant 0 : i32
    %c0_i32_1 = arith.constant 0 : i32
    return %c0_i32, %c0_i32_0 : i32, i32
  }
  func.func @transform_5(%arg0: i32) -> (i32, i32) {
    %c0_i32 = arith.constant 0 : i32
    %c0_i32_0 = arith.constant 0 : i32
    %c0_i32_1 = arith.constant 0 : i32
    return %c0_i32, %c0_i32_0 : i32, i32
  }
  func.func @transform_6(%arg0: i32) -> (i32, i32) {
    %c0_i32 = arith.constant 0 : i32
    %c0_i32_0 = arith.constant 0 : i32
    %c0_i32_1 = arith.constant 0 : i32
    return %c0_i32, %c0_i32_0 : i32, i32
  }
  func.func @transform_7(%arg0: i32) -> (i32, i32) {
    %c0_i32 = arith.constant 0 : i32
    %c0_i32_0 = arith.constant 0 : i32
    %c0_i32_1 = arith.constant 0 : i32
    return %c0_i32, %c0_i32_0 : i32, i32
  }
  func.func @transform_8(%arg0: i32) -> (i32, i32) {
    %c0_i32 = arith.constant 0 : i32
    %c0_i32_0 = arith.constant 0 : i32
    return %arg0, %c0_i32 : i32, i32
  }
}

</mosaic_0001>

<bundles_post_ra>
// kernel: cancernet2_head.1
= control target key start
LH: loop header
LB: loop body
LE: loop exit
PB: predicated region body
PF: predicated region fallthrough
CT: control target
= control target key end

     0   :  { %s3688_s29 = smov 0   ;;  %s5099_s0 = inlined_call_operand.vmem [shape: f32[16,256,64], index: 0, kind: input, shape index: {}]   ;;  %s5100_s1 = inlined_call_operand.vmem [shape: f32[16,8], index: 1, kind: input, shape index: {}]   ;;  %s5101_s2 = inlined_call_operand.vmem [shape: bf16[256,64], index: 2, kind: input, shape index: {}]   ;;  %s5102_s3 = inlined_call_operand.vmem [shape: f32[1,64], index: 3, kind: input, shape index: {}]   ;;  %s5103_s4 = inlined_call_operand.vmem [shape: f32[8,64], index: 4, kind: input, shape index: {}]   ;;  %s5104_s5 = inlined_call_operand.vmem [shape: f32[1,64], index: 5, kind: input, shape index: {}]   ;;  %s5105_s6 = inlined_call_operand.vmem [shape: f32[1,128], index: 6, kind: input, shape index: {}]   ;;  %s5106_s7 = inlined_call_operand.<no memory space> [shape: f32[1,1], index: 7, kind: input, shape index: {}]   ;;  %s5107_s8 = inlined_call_operand.vmem [shape: f32[16,1], index: 8, kind: output, shape index: {}]  }
   0x1   :  { %v13_v0 = vstv %s5106_s7 }
   0x2   :  { %14 = vst [vmem:[#allocation2] sm:$0x1] %v13_v0 }
   0x3 LB: > { %s3694_s30 = sadd.s32 4294967295, %s3635_s29   ;;  %p3543_p0 = scmp.ge.s32.totalorder %s3635_s29, 1  ;;  %s3635_s29 = sphi %s3688_s29, %s20_s29  }
   0x4   : > { %p275_p1 = scmp.lt.s32.totalorder %s3635_s29, 3 }
   0x6   : > { %p276_p2 = pnand %p3543_p0, %p275_p1 }
   0x7   : > { %s3544_s9 = sshll.u32 (!%p276_p2), %s3694_s30, 3  ;;  %p320_p4 = scmp.lt.s32.totalorder (!%p276_p2), %s3694_s30, 1 }
   0x8   : > { %279 = sbr.rel (%p276_p2) target bundleno = 1024 (0x400), region = 52  ;;  %p314_p3 = scmp.lt.s32.totalorder (!%p276_p2), %s3544_s9, 15 }
   0x9   : > { %s3639_s28 = smov (!%p276_p2), 64  }
   0xd   : > { %s5133_s9 = smov (!%p314_p3, %s3544_s9), 15  ;;  %vm585_vm0 = vcmask 523264   ;;  %vm1916_vm1 = vcmask 130112   ;;  %vm1923_vm2 = vcmask 195712   ;;  %vm1930_vm3 = vcmask 261312   ;;  %s5135_s30 = smov (!%p320_p4, %s3694_s30), 1 }
   0xe   : > { %s3572_s7 = sshll.u32 %s5133_s9, 8  ;;  %vm1937_vm4 = vcmask 326912   ;;  %vm1944_vm5 = vcmask 392512   ;;  %vm1951_vm6 = vcmask 458112   ;;  %vm1958_vm7 = vcmask 523712   ;;  %s3547_s9 = sshll.u32 %s5135_s30, 3 }
   0xf   : > { %s3702_s12 = scalar_lea.vmem %s5099_s0, %s3572_s7  ;;  %vm1965_vm8 = vcmask 589312   ;;  %vm1972_vm9 = vcmask 654912   ;;  %vm5109_vm10 = vcmask 720512   ;;  %vm1986_vm11 = vcmask 786112   ;;  %s323_s11 = scalar_lea.vmem %s5100_s1, %s3547_s9 }
  0x10   : > { %v331_v1 = vld [vmem:[%s3702_s12 + $0x10] sm:$0xff]  ;;  %v329_v2 = vld [vmem:[%s3702_s12] sm:$0xff]  ;;  %v332_v3 = vld [vmem:[%s3702_s12 + $0x18] sm:$0xff]  ;;  %vm5108_vm12 = vcmask 851712   ;;  %vm2000_vm13 = vcmask 917312   ;;  %vm2007_vm14 = vcmask 982912   ;;  %s327_s18 = scalar_lea.vmem %s5107_s8, %s3547_s9 }
  0x11   : > { %v592_v4 = vsel %vm585_vm0, %v331_v1, 0.0  ;;  %v586_v5 = vsel %vm585_vm0, %v329_v2, 0.0  ;;  %v330_v6 = vld [vmem:[%s3702_s12 + $0x8] sm:$0xff]  ;;  %v595_v7 = vsel %vm585_vm0, %v332_v3, 0.0  ;;  %v333_v10 = vld [vmem:[%s3702_s12 + $0x20] sm:$0xff]  ;;  %v336_v13 = vld [vmem:[%s3702_s12 + $0x38] sm:$0xff] }
  0x12   : > { %593 = vadd.xlane.f32.xlu1 %v592_v4  ;;  %587 = vadd.xlane.f32.xlu0 %v586_v5  ;;  %v589_v8 = vsel %vm585_vm0, %v330_v6, 0.0  ;;  %v334_v9 = vld [vmem:[%s3702_s12 + $0x28] sm:$0xff]  ;;  %v598_v12 = vsel %vm585_vm0, %v333_v10, 0.0  ;;  %v335_v14 = vld [vmem:[%s3702_s12 + $0x30] sm:$0xff]  ;;  %v607_v15 = vsel %vm585_vm0, %v336_v13, 0.0  ;;  %v337_v18 = vld [vmem:[%s3702_s12 + $0x40] sm:$0xff] }
  0x13   : > { %v601_v11 = vsel %vm585_vm0, %v334_v9, 0.0  ;;  %v604_v16 = vsel %vm585_vm0, %v335_v14, 0.0  ;;  %v338_v17 = vld [vmem:[%s3702_s12 + $0x48] sm:$0xff]  ;;  %v610_v20 = vsel %vm585_vm0, %v337_v18, 0.0  ;;  %v340_v21 = vld [vmem:[%s3702_s12 + $0x58] sm:$0xff]  ;;  %v339_v22 = vld [vmem:[%s3702_s12 + $0x50] sm:$0xff] }
  0x14   : > { %v613_v19 = vsel %vm585_vm0, %v338_v17, 0.0  ;;  %v619_v23 = vsel %vm585_vm0, %v340_v21, 0.0  ;;  %v616_v24 = vsel %vm585_vm0, %v339_v22, 0.0  ;;  %v342_v25 = vld [vmem:[%s3702_s12 + $0x68] sm:$0xff]  ;;  %v341_v26 = vld [vmem:[%s3702_s12 + $0x60] sm:$0xff]  ;;  %v344_v29 = vld [vmem:[%s3702_s12 + $0x78] sm:$0xff] }
  0x15   : > { %v625_v27 = vsel %vm585_vm0, %v342_v25, 0.0  ;;  %v622_v28 = vsel %vm585_vm0, %v341_v26, 0.0  ;;  %v343_v30 = vld [vmem:[%s3702_s12 + $0x70] sm:$0xff]  ;;  %v631_v31 = vsel %vm585_vm0, %v344_v29, 0.0  ;;  %v346_v33 = vld [vmem:[%s3702_s12 + $0x88] sm:$0xff]  ;;  %v345_v34 = vld [vmem:[%s3702_s12 + $0x80] sm:$0xff] }
  0x16   : > { %596 = vadd.xlane.f32.xlu1 %v595_v7  ;;  %590 = vadd.xlane.f32.xlu0 %v589_v8  ;;  %v628_v32 = vsel %vm585_vm0, %v343_v30, 0.0  ;;  %v637_v35 = vsel %vm585_vm0, %v346_v33, 0.0  ;;  %v634_v36 = vsel %vm585_vm0, %v345_v34, 0.0  ;;  %v348_v37 = vld [vmem:[%s3702_s12 + $0x98] sm:$0xff]  ;;  %v347_v38 = vld [vmem:[%s3702_s12 + $0x90] sm:$0xff]  ;;  %v350_v41 = vld [vmem:[%s3702_s12 + $0xa8] sm:$0xff] }
  0x17   : > { %v643_v39 = vsel %vm585_vm0, %v348_v37, 0.0  ;;  %v640_v40 = vsel %vm585_vm0, %v347_v38, 0.0  ;;  %v349_v42 = vld [vmem:[%s3702_s12 + $0xa0] sm:$0xff]  ;;  %v649_v43 = vsel %vm585_vm0, %v350_v41, 0.0  ;;  %v352_v45 = vld [vmem:[%s3702_s12 + $0xb8] sm:$0xff]  ;;  %v351_v46 = vld [vmem:[%s3702_s12 + $0xb0] sm:$0xff] }
  0x18   : > { %v646_v44 = vsel %vm585_vm0, %v349_v42, 0.0  ;;  %v655_v47 = vsel %vm585_vm0, %v352_v45, 0.0  ;;  %v652_v48 = vsel %vm585_vm0, %v351_v46, 0.0  ;;  %v354_v49 = vld [vmem:[%s3702_s12 + $0xc8] sm:$0xff]  ;;  %v353_v50 = vld [vmem:[%s3702_s12 + $0xc0] sm:$0xff]  ;;  %v356_v53 = vld [vmem:[%s3702_s12 + $0xd8] sm:$0xff] }
  0x19   : > { %v661_v51 = vsel %vm585_vm0, %v354_v49, 0.0  ;;  %v658_v52 = vsel %vm585_vm0, %v353_v50, 0.0  ;;  %v355_v54 = vld [vmem:[%s3702_s12 + $0xd0] sm:$0xff]  ;;  %v667_v55 = vsel %vm585_vm0, %v356_v53, 0.0  ;;  %v358_v57 = vld [vmem:[%s3702_s12 + $0xe8] sm:$0xff]  ;;  %v357_v58 = vld [vmem:[%s3702_s12 + $0xe0] sm:$0xff] }
  0x1a   : > { %602 = vadd.xlane.f32.xlu1 %v601_v11  ;;  %599 = vadd.xlane.f32.xlu0 %v598_v12  ;;  %v664_v56 = vsel %vm585_vm0, %v355_v54, 0.0  ;;  %v673_v59 = vsel %vm585_vm0, %v358_v57, 0.0  ;;  %v670_v60 = vsel %vm585_vm0, %v357_v58, 0.0  ;;  %v360_v61 = vld [vmem:[%s3702_s12 + $0xf8] sm:$0xff]  ;;  %v359_v62 = vld [vmem:[%s3702_s12 + $0xf0] sm:$0xff]  ;;  %v362_v1 = vld [vmem:[%s3702_s12 + $0x108] sm:$0xff] }
  0x1b   : > { %v679_v63 = vsel %vm585_vm0, %v360_v61, 0.0  ;;  %v676_v0 = vsel %vm585_vm0, %v359_v62, 0.0  ;;  %v361_v2 = vld [vmem:[%s3702_s12 + $0x100] sm:$0xff]  ;;  %v685_v3 = vsel %vm585_vm0, %v362_v1, 0.0  ;;  %v364_v5 = vld [vmem:[%s3702_s12 + $0x118] sm:$0xff]  ;;  %v363_v6 = vld [vmem:[%s3702_s12 + $0x110] sm:$0xff] }
  0x1c   : > { %v682_v4 = vsel %vm585_vm0, %v361_v2, 0.0  ;;  %v691_v7 = vsel %vm585_vm0, %v364_v5, 0.0  ;;  %v688_v8 = vsel %vm585_vm0, %v363_v6, 0.0  ;;  %v366_v9 = vld [vmem:[%s3702_s12 + $0x128] sm:$0xff]  ;;  %v365_v10 = vld [vmem:[%s3702_s12 + $0x120] sm:$0xff]  ;;  %v368_v13 = vld [vmem:[%s3702_s12 + $0x138] sm:$0xff] }
  0x1d   : > { %v697_v11 = vsel %vm585_vm0, %v366_v9, 0.0  ;;  %v694_v12 = vsel %vm585_vm0, %v365_v10, 0.0  ;;  %v367_v14 = vld [vmem:[%s3702_s12 + $0x130] sm:$0xff]  ;;  %v370_v17 = vld [vmem:[%s3702_s12 + $0x148] sm:$0xff]  ;;  %v369_v18 = vld [vmem:[%s3702_s12 + $0x140] sm:$0xff]  ;;  %vm2014_vm15 = vcmask 1048512  }
  0x1e   : > { %608 = vadd.xlane.f32.xlu1 %v607_v15  ;;  %605 = vadd.xlane.f32.xlu0 %v604_v16  ;;  %v703_v15 = vsel %vm585_vm0, %v368_v13, 0.0  ;;  %v700_v16 = vsel %vm585_vm0, %v367_v14, 0.0  ;;  %v372_v21 = vld [vmem:[%s3702_s12 + $0x158] sm:$0xff]  ;;  %v371_v22 = vld [vmem:[%s3702_s12 + $0x150] sm:$0xff]  ;;  %v374_v25 = vld [vmem:[%s3702_s12 + $0x168] sm:$0xff] }
  0x1f   : > { %v373_v26 = vld [vmem:[%s3702_s12 + $0x160] sm:$0xff]  ;;  %v376_v29 = vld [vmem:[%s3702_s12 + $0x178] sm:$0xff]  ;;  %v375_v30 = vld [vmem:[%s3702_s12 + $0x170] sm:$0xff] }
  0x20   : > { %v378_v33 = vld [vmem:[%s3702_s12 + $0x188] sm:$0xff]  ;;  %v377_v34 = vld [vmem:[%s3702_s12 + $0x180] sm:$0xff]  ;;  %v380_v37 = vld [vmem:[%s3702_s12 + $0x198] sm:$0xff] }
  0x21   : > { %v379_v38 = vld [vmem:[%s3702_s12 + $0x190] sm:$0xff]  ;;  %v382_v41 = vld [vmem:[%s3702_s12 + $0x1a8] sm:$0xff]  ;;  %v381_v42 = vld [vmem:[%s3702_s12 + $0x1a0] sm:$0xff] }
  0x22   : > { %614 = vadd.xlane.f32.xlu1 %v613_v19  ;;  %611 = vadd.xlane.f32.xlu0 %v610_v20  ;;  %v709_v19 = vsel %vm585_vm0, %v370_v17, 0.0  ;;  %v706_v20 = vsel %vm585_vm0, %v369_v18, 0.0  ;;  %v384_v45 = vld [vmem:[%s3702_s12 + $0x1b8] sm:$0xff]  ;;  %v383_v46 = vld [vmem:[%s3702_s12 + $0x1b0] sm:$0xff]  ;;  %v386_v49 = vld [vmem:[%s3702_s12 + $0x1c8] sm:$0xff] }
  0x23   : > { %v385_v50 = vld [vmem:[%s3702_s12 + $0x1c0] sm:$0xff]  ;;  %v388_v53 = vld [vmem:[%s3702_s12 + $0x1d8] sm:$0xff]  ;;  %v387_v54 = vld [vmem:[%s3702_s12 + $0x1d0] sm:$0xff] }
  0x24   : > { %v390_v57 = vld [vmem:[%s3702_s12 + $0x1e8] sm:$0xff]  ;;  %v389_v58 = vld [vmem:[%s3702_s12 + $0x1e0] sm:$0xff]  ;;  %v392_v61 = vld [vmem:[%s3702_s12 + $0x1f8] sm:$0xff] }
  0x25   : > { %v391_v62 = vld [vmem:[%s3702_s12 + $0x1f0] sm:$0xff]  ;;  %v394_v1 = vld [vmem:[%s3702_s12 + $0x208] sm:$0xff]  ;;  %v393_v2 = vld [vmem:[%s3702_s12 + $0x200] sm:$0xff] }
  0x26   : > { %620 = vadd.xlane.f32.xlu1 %v619_v23  ;;  %617 = vadd.xlane.f32.xlu0 %v616_v24  ;;  %v715_v23 = vsel %vm585_vm0, %v372_v21, 0.0  ;;  %v712_v24 = vsel %vm585_vm0, %v371_v22, 0.0  ;;  %v396_v5 = vld [vmem:[%s3702_s12 + $0x218] sm:$0xff]  ;;  %v395_v6 = vld [vmem:[%s3702_s12 + $0x210] sm:$0xff]  ;;  %v398_v9 = vld [vmem:[%s3702_s12 + $0x228] sm:$0xff] }
  0x27   : > { %v397_v10 = vld [vmem:[%s3702_s12 + $0x220] sm:$0xff]  ;;  %v400_v14 = vld [vmem:[%s3702_s12 + $0x238] sm:$0xff] }
  0x28   : > { %v790_v13 = vsel %vm585_vm0, %v397_v10, 0.0 }
  0x2a   : > { %626 = vadd.xlane.f32.xlu1 %v625_v27  ;;  %623 = vadd.xlane.f32.xlu0 %v622_v28  ;;  %v721_v27 = vsel %vm585_vm0, %v374_v25, 0.0  ;;  %v718_v28 = vsel %vm585_vm0, %v373_v26, 0.0  ;;  %v401_v25 = vld [vmem:[%s3702_s12 + $0x240] sm:$0xff] }
  0x2e   : > { %632 = vadd.xlane.f32.xlu1 %v631_v31  ;;  %629 = vadd.xlane.f32.xlu0 %v628_v32  ;;  %v727_v31 = vsel %vm585_vm0, %v376_v29, 0.0  ;;  %v724_v32 = vsel %vm585_vm0, %v375_v30, 0.0 }
  0x32   : > { %638 = vadd.xlane.f32.xlu1 %v637_v35  ;;  %635 = vadd.xlane.f32.xlu0 %v634_v36  ;;  %v733_v35 = vsel %vm585_vm0, %v378_v33, 0.0  ;;  %v730_v36 = vsel %vm585_vm0, %v377_v34, 0.0 }
  0x36   : > { %644 = vadd.xlane.f32.xlu1 %v643_v39  ;;  %641 = vadd.xlane.f32.xlu0 %v640_v40  ;;  %v739_v39 = vsel %vm585_vm0, %v380_v37, 0.0  ;;  %v736_v40 = vsel %vm585_vm0, %v379_v38, 0.0  ;;  %v404_v37 = vld [vmem:[%s3702_s12 + $0x258] sm:$0xff]  ;;  %v403_v38 = vld [vmem:[%s3702_s12 + $0x250] sm:$0xff] }
  0x3a   : > { %650 = vadd.xlane.f32.xlu1 %v649_v43  ;;  %647 = vadd.xlane.f32.xlu0 %v646_v44  ;;  %v745_v43 = vsel %vm585_vm0, %v382_v41, 0.0  ;;  %v742_v44 = vsel %vm585_vm0, %v381_v42, 0.0 }
  0x3e   : > { %656 = vadd.xlane.f32.xlu1 %v655_v47  ;;  %653 = vadd.xlane.f32.xlu0 %v652_v48  ;;  %v751_v47 = vsel %vm585_vm0, %v384_v45, 0.0  ;;  %v748_v48 = vsel %vm585_vm0, %v383_v46, 0.0 }
  0x42   : > { %662 = vadd.xlane.f32.xlu1 %v661_v51  ;;  %659 = vadd.xlane.f32.xlu0 %v658_v52  ;;  %v757_v51 = vsel %vm585_vm0, %v386_v49, 0.0  ;;  %v754_v52 = vsel %vm585_vm0, %v385_v50, 0.0  ;;  %v808_v49 = vsel %vm585_vm0, %v403_v38, 0.0 }
  0x46   : > { %668 = vadd.xlane.f32.xlu1 %v667_v55  ;;  %665 = vadd.xlane.f32.xlu0 %v664_v56  ;;  %v763_v55 = vsel %vm585_vm0, %v388_v53, 0.0  ;;  %v760_v56 = vsel %vm585_vm0, %v387_v54, 0.0 }
  0x4a   : > { %674 = vadd.xlane.f32.xlu1 %v673_v59  ;;  %671 = vadd.xlane.f32.xlu0 %v670_v60  ;;  %v769_v59 = vsel %vm585_vm0, %v390_v57, 0.0  ;;  %v766_v60 = vsel %vm585_vm0, %v389_v58, 0.0 }
  0x4e   : > { %680 = vadd.xlane.f32.xlu1 %v679_v63  ;;  %677 = vadd.xlane.f32.xlu0 %v676_v0  ;;  %v775_v63 = vsel %vm585_vm0, %v392_v61, 0.0  ;;  %v772_v0 = vsel %vm585_vm0, %v391_v62, 0.0 }
  0x52   : > { %686 = vadd.xlane.f32.xlu1 %v685_v3  ;;  %683 = vadd.xlane.f32.xlu0 %v682_v4  ;;  %v781_v3 = vsel %vm585_vm0, %v394_v1, 0.0  ;;  %v778_v4 = vsel %vm585_vm0, %v393_v2, 0.0 }
  0x56   : > { %692 = vadd.xlane.f32.xlu1 %v691_v7  ;;  %689 = vadd.xlane.f32.xlu0 %v688_v8  ;;  %v787_v7 = vsel %vm585_vm0, %v396_v5, 0.0  ;;  %v784_v8 = vsel %vm585_vm0, %v395_v6, 0.0  ;;  %v408_v6 = vld [vmem:[%s3702_s12 + $0x278] sm:$0xff] }
  0x5a   : > { %698 = vadd.xlane.f32.xlu1 %v697_v11  ;;  %695 = vadd.xlane.f32.xlu0 %v694_v12  ;;  %v1905_v11 = vlaneseq  ;;  %v793_v12 = vsel %vm585_vm0, %v398_v9, 0.0 }
  0x5c   : > { %v3850_v21 = vshrl.u32 %v1905_v11, 7 }
  0x5e   : > { %704 = vadd.xlane.f32.xlu1 %v703_v15  ;;  %701 = vadd.xlane.f32.xlu0 %v700_v16  ;;  %v399_v15 = vld [vmem:[%s3702_s12 + $0x230] sm:$0xff]  ;;  %v3846_v16 = vand.u32 127, %v1905_v11 }
  0x60   : > { %v1918_v22 = vadd.s32 4294967280, %v3846_v16  ;;  %v1925_v26 = vadd.s32 4294967272, %v3846_v16  ;;  %v3860_v29 = vsub.s32 %v3846_v16, %v3850_v21  ;;  %v1939_v41 = vadd.s32 4294967256, %v3846_v16 }
  0x61   : > { %v1946_v50 = vadd.s32 4294967248, %v3846_v16  ;;  %v1967_v5 = vadd.s32 4294967224, %v3846_v16 }
  0x62   : > { %710 = vadd.xlane.f32.xlu1 %v709_v19  ;;  %707 = vadd.xlane.f32.xlu0 %v706_v20  ;;  %v799_v19 = vsel %vm585_vm0, %v400_v14, 0.0  ;;  %v796_v20 = vsel %vm585_vm0, %v399_v15, 0.0  ;;  %v3865_v33 = vsub.s32 %v1918_v22, %v3850_v21  ;;  %v3889_v57 = vsub.s32 %v1939_v41, %v3850_v21 }
  0x63   : > { %v3902_v9 = vsub.s32 %v1946_v50, %v3850_v21  ;;  %v411_v50 = vld [vmem:[%s3702_s12 + $0x290] sm:$0xff] }
  0x66   : > { %716 = vadd.xlane.f32.xlu1 %v715_v23  ;;  %713 = vadd.xlane.f32.xlu0 %v712_v24  ;;  %v1911_v23 = vadd.s32 4294967288, %v3846_v16  ;;  %v402_v24 = vld [vmem:[%s3702_s12 + $0x248] sm:$0xff] }
  0x6a   : > { %722 = vadd.xlane.f32.xlu1 %v721_v27  ;;  %719 = vadd.xlane.f32.xlu0 %v718_v28  ;;  %v1932_v27 = vadd.s32 4294967264, %v3846_v16 }
  0x6e   : > { %728 = vadd.xlane.f32.xlu1 %v727_v31  ;;  %725 = vadd.xlane.f32.xlu0 %v724_v32  ;;  %v805_v31 = vsel %vm585_vm0, %v402_v24, 0.0  ;;  %v802_v32 = vsel %vm585_vm0, %v401_v25, 0.0  ;;  %v3917_v24 = vsub.s32 %v1967_v5, %v3850_v21 }
  0x72   : > { %734 = vadd.xlane.f32.xlu1 %v733_v35  ;;  %731 = vadd.xlane.f32.xlu0 %v730_v36  ;;  %v3868_v35 = vsub.s32 %v1911_v23, %v3850_v21 }
  0x76   : > { %740 = vadd.xlane.f32.xlu1 %v739_v39  ;;  %737 = vadd.xlane.f32.xlu0 %v736_v40  ;;  %v3873_v39 = vsub.s32 %v1925_v26, %v3850_v21  ;;  %v3876_v40 = vsub.s32 %v1932_v27, %v3850_v21  ;;  %v1974_v26 = vadd.s32 4294967216, %v3846_v16  ;;  %v1981_v27 = vadd.s32 4294967208, %v3846_v16 }
  0x7a   : > { %746 = vadd.xlane.f32.xlu1 %v745_v43  ;;  %743 = vadd.xlane.f32.xlu0 %v742_v44 }
  0x7e   : > { %752 = vadd.xlane.f32.xlu1 %v751_v47  ;;  %749 = vadd.xlane.f32.xlu0 %v748_v48  ;;  %v811_v48 = vsel %vm585_vm0, %v404_v37, 0.0 }
  0x82   : > { %758 = vadd.xlane.f32.xlu1 %v757_v51  ;;  %755 = vadd.xlane.f32.xlu0 %v754_v52  ;;  %v406_v51 = vld [vmem:[%s3702_s12 + $0x268] sm:$0xff]  ;;  %v405_v52 = vld [vmem:[%s3702_s12 + $0x260] sm:$0xff] }
  0x83   : > { %v817_v62 = vsel %vm585_vm0, %v406_v51, 0.0 }
  0x86   : > { %764 = vadd.xlane.f32.xlu1 %v763_v55  ;;  %761 = vadd.xlane.f32.xlu0 %v760_v56  ;;  %v1953_v56 = vadd.s32 4294967240, %v3846_v16 }
  0x88   : > { %v3905_v10 = vsub.s32 %v1953_v56, %v3850_v21 }
  0x8a   : > { %770 = vadd.xlane.f32.xlu1 %v769_v59  ;;  %767 = vadd.xlane.f32.xlu0 %v766_v60  ;;  %v1960_v59 = vadd.s32 4294967232, %v3846_v16 }
  0x8c   : > { %v3910_v14 = vsub.s32 %v1960_v59, %v3850_v21 }
  0x8e   : > { %776 = vadd.xlane.f32.xlu1 %v775_v63  ;;  %773 = vadd.xlane.f32.xlu0 %v772_v0  ;;  %v814_v63 = vsel %vm585_vm0, %v405_v52, 0.0 }
  0x92   : > { %782 = vadd.xlane.f32.xlu1 %v781_v3  ;;  %779 = vadd.xlane.f32.xlu0 %v778_v4 }
  0x96   : > { %788 = vadd.xlane.f32.xlu1 %v787_v7  ;;  %785 = vadd.xlane.f32.xlu0 %v784_v8  ;;  %v407_v7 = vld [vmem:[%s3702_s12 + $0x270] sm:$0xff] }
  0x9a   : > { %794 = vadd.xlane.f32.xlu1 %v793_v12  ;;  %791 = vadd.xlane.f32.xlu0 %v790_v13 }
  0x9b   : > { %v594_v17 = vpop.xlane.xlu1 %593  ;;  %v588_v18 = vpop.xlane.xlu0 %587 }
  0x9e   : > { %800 = vadd.xlane.f32.xlu1 %v799_v19  ;;  %797 = vadd.xlane.f32.xlu0 %v796_v20  ;;  %v820_v19 = vsel %vm585_vm0, %v407_v7, 0.0  ;;  %v410_v20 = vld [vmem:[%s3702_s12 + $0x288] sm:$0xff] }
  0x9f   : > { %v597_v28 = vpop.xlane.xlu1 %596  ;;  %v591_v30 = vpop.xlane.xlu0 %590  ;;  %v442_v7 = vld [vmem:[%s3702_s12 + $0x388] sm:$0xff] }
  0xa0   : > { %v1355_v34 = vpack.c.bf16 %v597_v28, %v594_v17  ;;  %v1354_v36 = vpack.c.bf16 %v591_v30, %v588_v18  ;;  %v823_v18 = vsel %vm585_vm0, %v408_v6, 0.0  ;;  %v409_v28 = vld [vmem:[%s3702_s12 + $0x280] sm:$0xff]  ;;  %v2009_v6 = vadd.s32 4294967176, %v3846_v16 }
  0xa2   : > { %v1651_v42 = vunpack.c.l.b16 %v1355_v34  ;;  %v1652_v43 = vunpack.c.h.b16 %v1355_v34  ;;  %v1649_v44 = vunpack.c.l.b16 %v1354_v36  ;;  %v1650_v45 = vunpack.c.h.b16 %v1354_v36  ;;  %806 = vadd.xlane.f32.xlu1 %v805_v31  ;;  %803 = vadd.xlane.f32.xlu0 %v802_v32 }
  0xa3   : > { %v603_v46 = vpop.xlane.xlu1 %602  ;;  %v600_v47 = vpop.xlane.xlu0 %599  ;;  %v829_v36 = vsel %vm585_vm0, %v410_v20, 0.0 }
  0xa4   : > { %v1922_v53 = vrot.slane %v1651_v42, %v3865_v33  ;;  %v1910_v54 = vrot.slane %v1649_v44, %v3860_v29  ;;  %v1915_v55 = vrot.slane %v1650_v45, %v3868_v35  ;;  %v1356_v58 = vpack.c.bf16 %v603_v46, %v600_v47 }
  0xa5   : > { %v1929_v60 = vrot.slane %v1652_v43, %v3873_v39  ;;  %v826_v42 = vsel %vm585_vm0, %v409_v28, 0.0  ;;  %v412_v43 = vld [vmem:[%s3702_s12 + $0x298] sm:$0xff]  ;;  %v3931_v46 = vsub.s32 %v1974_v26, %v3850_v21  ;;  %v425_v28 = vld [vmem:[%s3702_s12 + $0x300] sm:$0xff] }
  0xa6   : > { %v1917_v61 = vsel %vm1916_vm1, %v1915_v55, %v1910_v54  ;;  %812 = vadd.xlane.f32.xlu1 %v811_v48  ;;  %809 = vadd.xlane.f32.xlu0 %v808_v49  ;;  %v1653_v1 = vunpack.c.l.b16 %v1356_v58  ;;  %v1654_v2 = vunpack.c.h.b16 %v1356_v58  ;;  %v1988_v48 = vadd.s32 4294967200, %v3846_v16 }
  0xa7   : > { %v1924_v0 = vsel %vm1923_vm2, %v1922_v53, %v1917_v61  ;;  %v609_v3 = vpop.xlane.xlu1 %608  ;;  %v606_v4 = vpop.xlane.xlu0 %605  ;;  %v1995_v49 = vadd.s32 4294967192, %v3846_v16  ;;  %v3939_v53 = vsub.s32 %v1981_v27, %v3850_v21  ;;  %v835_v55 = vsel %vm585_vm0, %v412_v43, 0.0  ;;  %v426_v27 = vld [vmem:[%s3702_s12 + $0x308] sm:$0xff] }
  0xa8   : > { %v1931_v8 = vsel %vm1930_vm3, %v1929_v60, %v1924_v0  ;;  %v1357_v11 = vpack.c.bf16 %v609_v3, %v606_v4  ;;  %v1936_v12 = vrot.slane %v1653_v1, %v3876_v40  ;;  %v1943_v13 = vrot.slane %v1654_v2, %v3889_v57 }
  0xa9   : > { %v832_v60 = vsel %vm585_vm0, %v411_v50, 0.0  ;;  %v3949_v0 = vsub.s32 %v1995_v49, %v3850_v21  ;;  %v2002_v2 = vadd.s32 4294967184, %v3846_v16  ;;  %v925_v16 = vsel %vm585_vm0, %v442_v7, 0.0 }
  0xaa   : > { %v1655_v15 = vunpack.c.l.b16 %v1357_v11  ;;  %v1656_v17 = vunpack.c.h.b16 %v1357_v11  ;;  %818 = vadd.xlane.f32.xlu1 %v817_v62  ;;  %815 = vadd.xlane.f32.xlu0 %v814_v63  ;;  %v1938_v22 = vsel %vm1937_vm4, %v1936_v12, %v1931_v8  ;;  %v3946_v63 = vsub.s32 %v1988_v48, %v3850_v21  ;;  %v441_v8 = vld [vmem:[%s3702_s12 + $0x380] sm:$0xff] }
  0xab   : > { %v615_v23 = vpop.xlane.xlu1 %614  ;;  %v612_v25 = vpop.xlane.xlu0 %611  ;;  %v1945_v30 = vsel %vm1944_vm5, %v1943_v13, %v1938_v22  ;;  %v922_v20 = vsel %vm585_vm0, %v441_v8, 0.0 }
  0xac   : > { %v1950_v31 = vrot.slane %v1655_v15, %v3902_v9  ;;  %v1957_v32 = vrot.slane %v1656_v17, %v3905_v10  ;;  %v1358_v34 = vpack.c.bf16 %v615_v23, %v612_v25  ;;  %v3967_v25 = vsub.s32 %v2009_v6, %v3850_v21 }
  0xae   : > { %v1952_v37 = vsel %vm1951_vm6, %v1950_v31, %v1945_v30  ;;  %v1657_v38 = vunpack.c.l.b16 %v1358_v34  ;;  %v1658_v41 = vunpack.c.h.b16 %v1358_v34  ;;  %824 = vadd.xlane.f32.xlu1 %v823_v18  ;;  %821 = vadd.xlane.f32.xlu0 %v820_v19  ;;  %v3960_v18 = vsub.s32 %v2002_v2, %v3850_v21 }
  0xaf   : > { %v1959_v44 = vsel %vm1958_vm7, %v1957_v32, %v1952_v37  ;;  %v621_v45 = vpop.xlane.xlu1 %620  ;;  %v618_v47 = vpop.xlane.xlu0 %617  ;;  %v874_v21 = vsel %vm585_vm0, %v425_v28, 0.0 }
  0xb0   : > { %v1964_v51 = vrot.slane %v1657_v38, %v3910_v14  ;;  %v1971_v52 = vrot.slane %v1658_v41, %v3917_v24  ;;  %v1359_v54 = vpack.c.bf16 %v621_v45, %v618_v47  ;;  %v877_v38 = vsel %vm585_vm0, %v426_v27, 0.0  ;;  %v443_v45 = vld [vmem:[%s3702_s12 + $0x390] sm:$0xff] }
  0xb2   : > { %v1966_v56 = vsel %vm1965_vm8, %v1964_v51, %v1959_v44  ;;  %v1659_v58 = vunpack.c.l.b16 %v1359_v54  ;;  %v1660_v59 = vunpack.c.h.b16 %v1359_v54  ;;  %830 = vadd.xlane.f32.xlu1 %v829_v36  ;;  %827 = vadd.xlane.f32.xlu0 %v826_v42  ;;  %v444_v44 = vld [vmem:[%s3702_s12 + $0x398] sm:$0xff] }
  0xb3   : > { %v1973_v61 = vsel %vm1972_vm9, %v1971_v52, %v1966_v56  ;;  %v627_v62 = vpop.xlane.xlu1 %626  ;;  %v624_v1 = vpop.xlane.xlu0 %623  ;;  %v931_v54 = vsel %vm585_vm0, %v444_v44, 0.0 }
  0xb4   : > { %v1978_v3 = vrot.slane %v1659_v58, %v3931_v46  ;;  %v1985_v4 = vrot.slane %v1660_v59, %v3939_v53  ;;  %v1360_v5 = vpack.c.bf16 %v627_v62, %v624_v1  ;;  %v474_v58 = vld [vmem:[%s3702_s12 + $0x488] sm:$0xff]  ;;  %v473_v59 = vld [vmem:[%s3702_s12 + $0x480] sm:$0xff] }
  0xb6   : > { %v1980_v11 = vsel %vm5109_vm10, %v1978_v3, %v1973_v61  ;;  %v1661_v12 = vunpack.c.l.b16 %v1360_v5  ;;  %v1662_v13 = vunpack.c.h.b16 %v1360_v5  ;;  %836 = vadd.xlane.f32.xlu1 %v835_v55  ;;  %833 = vadd.xlane.f32.xlu0 %v832_v60  ;;  %v928_v55 = vsel %vm585_vm0, %v443_v45, 0.0 }
  0xb7   : > { %v1987_v15 = vsel %vm1986_vm11, %v1985_v4, %v1980_v11  ;;  %v633_v17 = vpop.xlane.xlu1 %632  ;;  %v630_v19 = vpop.xlane.xlu0 %629  ;;  %v1021_v4 = vsel %vm585_vm0, %v474_v58, 0.0  ;;  %v1018_v5 = vsel %vm585_vm0, %v473_v59, 0.0  ;;  %v414_v11 = vld [vmem:[%s3702_s12 + $0x2a8] sm:$0xff] }
  0xb8   : > { %v1992_v22 = vrot.slane %v1661_v12, %v3946_v63  ;;  %v1999_v23 = vrot.slane %v1662_v13, %v3949_v0  ;;  %v1361_v26 = vpack.c.bf16 %v633_v17, %v630_v19  ;;  %v413_v12 = vld [vmem:[%s3702_s12 + $0x2a0] sm:$0xff] }
  0xba   : > { %v1994_v30 = vsel %vm5108_vm12, %v1992_v22, %v1987_v15  ;;  %v1663_v31 = vunpack.c.l.b16 %v1361_v26  ;;  %v1664_v32 = vunpack.c.h.b16 %v1361_v26  ;;  %926 = vadd.xlane.f32.xlu1 %v925_v16  ;;  %923 = vadd.xlane.f32.xlu0 %v922_v20  ;;  %v838_v26 = vsel %vm585_vm0, %v413_v12, 0.0 }
  0xbb   : > { %v2001_v34 = vsel %vm2000_vm13, %v1999_v23, %v1994_v30  ;;  %v639_v36 = vpop.xlane.xlu1 %638  ;;  %v636_v37 = vpop.xlane.xlu0 %635  ;;  %v841_v23 = vsel %vm585_vm0, %v414_v11, 0.0 }
  0xbc   : > { %v2006_v41 = vrot.slane %v1663_v31, %v3960_v18  ;;  %v2013_v42 = vrot.slane %v1664_v32, %v3967_v25  ;;  %v1362_v43 = vpack.c.bf16 %v639_v36, %v636_v37  ;;  %v428_v31 = vld [vmem:[%s3702_s12 + $0x318] sm:$0xff]  ;;  %v427_v32 = vld [vmem:[%s3702_s12 + $0x310] sm:$0xff] }
  0xbe   : > { %v2008_v47 = vsel %vm2007_vm14, %v2006_v41, %v2001_v34  ;;  %v1665_v48 = vunpack.c.l.b16 %v1362_v43  ;;  %v1666_v49 = vunpack.c.h.b16 %v1362_v43  ;;  %878 = vadd.xlane.f32.xlu1 %v877_v38  ;;  %875 = vadd.xlane.f32.xlu0 %v874_v21  ;;  %v880_v43 = vsel %vm585_vm0, %v427_v32, 0.0 }
  0xbf   : > { %v3981_v50 = vsel %vm2014_vm15, %v2013_v42, %v2008_v47  ;;  %v645_v51 = vpop.xlane.xlu1 %644  ;;  %v642_v52 = vpop.xlane.xlu0 %641  ;;  %v883_v42 = vsel %vm585_vm0, %v428_v31, 0.0 }
  0xc0   : > { %v1363_v56 = vpack.c.bf16 %v645_v51, %v642_v52  ;;  %v2019_v60 = vrot.slane %v1665_v48, %v3860_v29  ;;  %v2023_v61 = vrot.slane %v1666_v49, %v3868_v35  ;;  %v458_v48 = vld [vmem:[%s3702_s12 + $0x408] sm:$0xff]  ;;  %v457_v49 = vld [vmem:[%s3702_s12 + $0x400] sm:$0xff] }
  0xc1   : > { %v973_v59 = vsel %vm585_vm0, %v458_v48, 0.0 }
  0xc2   : > { %v1667_v62 = vunpack.c.l.b16 %v1363_v56  ;;  %v1668_v1 = vunpack.c.h.b16 %v1363_v56  ;;  %932 = vadd.xlane.f32.xlu1 %v931_v54  ;;  %929 = vadd.xlane.f32.xlu0 %v928_v55  ;;  %v2024_v13 = vsel %vm1916_vm1, %v2023_v61, %v2019_v60  ;;  %v970_v60 = vsel %vm585_vm0, %v457_v49, 0.0 }
  0xc3   : > { %v651_v2 = vpop.xlane.xlu1 %650  ;;  %v648_v3 = vpop.xlane.xlu0 %647 }
  0xc4   : > { %v2028_v6 = vrot.slane %v1667_v62, %v3865_v33  ;;  %v2033_v7 = vrot.slane %v1668_v1, %v3873_v39  ;;  %v1364_v8 = vpack.c.bf16 %v651_v2, %v648_v3  ;;  %v476_v2 = vld [vmem:[%s3702_s12 + $0x498] sm:$0xff]  ;;  %v475_v3 = vld [vmem:[%s3702_s12 + $0x490] sm:$0xff] }
  0xc5   : > { %v1027_v12 = vsel %vm585_vm0, %v476_v2, 0.0 }
  0xc6   : > { %v2029_v15 = vsel %vm1923_vm2, %v2028_v6, %v2024_v13  ;;  %v1669_v17 = vunpack.c.l.b16 %v1364_v8  ;;  %v1670_v19 = vunpack.c.h.b16 %v1364_v8  ;;  %1022 = vadd.xlane.f32.xlu1 %v1021_v4  ;;  %1019 = vadd.xlane.f32.xlu0 %v1018_v5  ;;  %v1024_v13 = vsel %vm585_vm0, %v475_v3, 0.0 }
  0xc7   : > { %v2034_v16 = vsel %vm1930_vm3, %v2033_v7, %v2029_v15  ;;  %v657_v20 = vpop.xlane.xlu1 %656  ;;  %v654_v22 = vpop.xlane.xlu0 %653 }
  0xc8   : > { %v2038_v27 = vrot.slane %v1669_v17, %v3876_v40  ;;  %v2043_v28 = vrot.slane %v1670_v19, %v3889_v57  ;;  %v1365_v30 = vpack.c.bf16 %v657_v20, %v654_v22  ;;  %v505_v20 = vld [vmem:[%s3702_s12 + $0x580] sm:$0xff] }
  0xc9   : > { %v1114_v32 = vsel %vm585_vm0, %v505_v20, 0.0 }
  0xca   : > { %v2039_v34 = vsel %vm1937_vm4, %v2038_v27, %v2034_v16  ;;  %v1671_v36 = vunpack.c.l.b16 %v1365_v30  ;;  %v1672_v37 = vunpack.c.h.b16 %v1365_v30  ;;  %842 = vadd.xlane.f32.xlu1 %v841_v23  ;;  %839 = vadd.xlane.f32.xlu0 %v838_v26  ;;  %v506_v16 = vld [vmem:[%s3702_s12 + $0x588] sm:$0xff] }
  0xcb   : > { %v2044_v38 = vsel %vm1944_vm5, %v2043_v28, %v2039_v34  ;;  %v663_v21 = vpop.xlane.xlu1 %662  ;;  %v660_v41 = vpop.xlane.xlu0 %659  ;;  %v1117_v31 = vsel %vm585_vm0, %v506_v16, 0.0 }
  0xcc   : > { %v2048_v44 = vrot.slane %v1671_v36, %v3902_v9  ;;  %v2053_v45 = vrot.slane %v1672_v37, %v3905_v10  ;;  %v1366_v47 = vpack.c.bf16 %v663_v21, %v660_v41  ;;  %v445_v21 = vld [vmem:[%s3702_s12 + $0x3a0] sm:$0xff] }
  0xcd   : > { %v934_v49 = vsel %vm585_vm0, %v445_v21, 0.0 }
  0xce   : > { %v2049_v51 = vsel %vm1951_vm6, %v2048_v44, %v2044_v38  ;;  %v1673_v52 = vunpack.c.l.b16 %v1366_v47  ;;  %v1674_v54 = vunpack.c.h.b16 %v1366_v47  ;;  %884 = vadd.xlane.f32.xlu1 %v883_v42  ;;  %881 = vadd.xlane.f32.xlu0 %v880_v43  ;;  %v446_v38 = vld [vmem:[%s3702_s12 + $0x3a8] sm:$0xff] }
  0xcf   : > { %v2054_v55 = vsel %vm1958_vm7, %v2053_v45, %v2049_v51  ;;  %v669_v56 = vpop.xlane.xlu1 %668  ;;  %v666_v58 = vpop.xlane.xlu0 %665  ;;  %v937_v48 = vsel %vm585_vm0, %v446_v38, 0.0 }
  0xd0   : > { %v2058_v61 = vrot.slane %v1673_v52, %v3910_v14  ;;  %v2063_v62 = vrot.slane %v1674_v54, %v3917_v24  ;;  %v1367_v1 = vpack.c.bf16 %v669_v56, %v666_v58  ;;  %v459_v56 = vld [vmem:[%s3702_s12 + $0x410] sm:$0xff] }
  0xd1   : > { %v976_v3 = vsel %vm585_vm0, %v459_v56, 0.0 }
  0xd2   : > { %v2059_v4 = vsel %vm1965_vm8, %v2058_v61, %v2054_v55  ;;  %v1675_v5 = vunpack.c.l.b16 %v1367_v1  ;;  %v1676_v6 = vunpack.c.h.b16 %v1367_v1  ;;  %974 = vadd.xlane.f32.xlu1 %v973_v59  ;;  %971 = vadd.xlane.f32.xlu0 %v970_v60  ;;  %v460_v55 = vld [vmem:[%s3702_s12 + $0x418] sm:$0xff] }
  0xd3   : > { %v2064_v7 = vsel %vm1972_vm9, %v2063_v62, %v2059_v4  ;;  %v675_v8 = vpop.xlane.xlu1 %674  ;;  %v672_v11 = vpop.xlane.xlu0 %671  ;;  %v979_v2 = vsel %vm585_vm0, %v460_v55, 0.0 }
  0xd4   : > { %v2068_v15 = vrot.slane %v1675_v5, %v3931_v46  ;;  %v2073_v17 = vrot.slane %v1676_v6, %v3939_v53  ;;  %v1368_v19 = vpack.c.bf16 %v675_v8, %v672_v11  ;;  %v490_v5 = vld [vmem:[%s3702_s12 + $0x508] sm:$0xff]  ;;  %v489_v6 = vld [vmem:[%s3702_s12 + $0x500] sm:$0xff] }
  0xd6   : > { %v2069_v22 = vsel %vm5109_vm10, %v2068_v15, %v2064_v7  ;;  %v1677_v23 = vunpack.c.l.b16 %v1368_v19  ;;  %v1678_v26 = vunpack.c.h.b16 %v1368_v19  ;;  %1028 = vadd.xlane.f32.xlu1 %v1027_v12  ;;  %1025 = vadd.xlane.f32.xlu0 %v1024_v13  ;;  %v1066_v19 = vsel %vm585_vm0, %v489_v6, 0.0 }
  0xd7   : > { %v2074_v27 = vsel %vm1986_vm11, %v2073_v17, %v2069_v22  ;;  %v681_v28 = vpop.xlane.xlu1 %680  ;;  %v678_v30 = vpop.xlane.xlu0 %677  ;;  %v1069_v17 = vsel %vm585_vm0, %v490_v5, 0.0 }
  0xd8   : > { %v2078_v34 = vrot.slane %v1677_v23, %v3946_v63  ;;  %v2083_v36 = vrot.slane %v1678_v26, %v3949_v0  ;;  %v1369_v37 = vpack.c.bf16 %v681_v28, %v678_v30  ;;  %v508_v23 = vld [vmem:[%s3702_s12 + $0x598] sm:$0xff]  ;;  %v507_v26 = vld [vmem:[%s3702_s12 + $0x590] sm:$0xff] }
  0xd9   : > { %v1120_v38 = vsel %vm585_vm0, %v507_v26, 0.0 }
  0xda   : > { %v2079_v41 = vsel %vm5108_vm12, %v2078_v34, %v2074_v27  ;;  %v1679_v42 = vunpack.c.l.b16 %v1369_v37  ;;  %v1680_v43 = vunpack.c.h.b16 %v1369_v37  ;;  %1118 = vadd.xlane.f32.xlu1 %v1117_v31  ;;  %1115 = vadd.xlane.f32.xlu0 %v1114_v32  ;;  %v1123_v37 = vsel %vm585_vm0, %v508_v23, 0.0 }
  0xdb   : > { %v2084_v44 = vsel %vm2000_vm13, %v2083_v36, %v2079_v41  ;;  %v687_v45 = vpop.xlane.xlu1 %686  ;;  %v684_v47 = vpop.xlane.xlu0 %683 }
  0xdc   : > { %v2088_v51 = vrot.slane %v1679_v42, %v3960_v18  ;;  %v2093_v52 = vrot.slane %v1680_v43, %v3967_v25  ;;  %v1370_v54 = vpack.c.bf16 %v687_v45, %v684_v47  ;;  %v538_v43 = vld [vmem:[%s3702_s12 + $0x688] sm:$0xff] }
  0xde   : > { %v2089_v58 = vsel %vm2007_vm14, %v2088_v51, %v2084_v44  ;;  %v1681_v59 = vunpack.c.l.b16 %v1370_v54  ;;  %v1682_v60 = vunpack.c.h.b16 %v1370_v54  ;;  %938 = vadd.xlane.f32.xlu1 %v937_v48  ;;  %935 = vadd.xlane.f32.xlu0 %v934_v49  ;;  %v537_v44 = vld [vmem:[%s3702_s12 + $0x680] sm:$0xff]  ;;  %v1213_v54 = vsel %vm585_vm0, %v538_v43, 0.0 }
  0xdf   : > { %v4046_v61 = vsel %vm2014_vm15, %v2093_v52, %v2089_v58  ;;  %v693_v62 = vpop.xlane.xlu1 %692  ;;  %v690_v1 = vpop.xlane.xlu0 %689  ;;  %v1210_v55 = vsel %vm585_vm0, %v537_v44, 0.0 }
  0xe0   : > { %v1371_v4 = vpack.c.bf16 %v693_v62, %v690_v1  ;;  %v2098_v7 = vrot.slane %v1681_v59, %v3860_v29  ;;  %v2102_v8 = vrot.slane %v1682_v60, %v3868_v35  ;;  %v416_v60 = vld [vmem:[%s3702_s12 + $0x2b8] sm:$0xff]  ;;  %v415_v62 = vld [vmem:[%s3702_s12 + $0x2b0] sm:$0xff] }
  0xe2   : > { %v1683_v11 = vunpack.c.l.b16 %v1371_v4  ;;  %v1684_v12 = vunpack.c.h.b16 %v1371_v4  ;;  %980 = vadd.xlane.f32.xlu1 %v979_v2  ;;  %977 = vadd.xlane.f32.xlu0 %v976_v3  ;;  %v2103_v27 = vsel %vm1916_vm1, %v2102_v8, %v2098_v7  ;;  %v847_v7 = vsel %vm585_vm0, %v416_v60, 0.0 }
  0xe3   : > { %v699_v13 = vpop.xlane.xlu1 %698  ;;  %v696_v15 = vpop.xlane.xlu0 %695  ;;  %v844_v8 = vsel %vm585_vm0, %v415_v62, 0.0 }
  0xe4   : > { %v2107_v16 = vrot.slane %v1683_v11, %v3865_v33  ;;  %v2112_v20 = vrot.slane %v1684_v12, %v3873_v39  ;;  %v1372_v22 = vpack.c.bf16 %v699_v13, %v696_v15  ;;  %v430_v15 = vld [vmem:[%s3702_s12 + $0x328] sm:$0xff] }
  0xe6   : > { %v2108_v28 = vsel %vm1923_vm2, %v2107_v16, %v2103_v27  ;;  %v1685_v30 = vunpack.c.l.b16 %v1372_v22  ;;  %v1686_v31 = vunpack.c.h.b16 %v1372_v22  ;;  %1070 = vadd.xlane.f32.xlu1 %v1069_v17  ;;  %1067 = vadd.xlane.f32.xlu0 %v1066_v19  ;;  %v429_v17 = vld [vmem:[%s3702_s12 + $0x320] sm:$0xff]  ;;  %v889_v27 = vsel %vm585_vm0, %v430_v15, 0.0 }
  0xe7   : > { %v2113_v32 = vsel %vm1930_vm3, %v2112_v20, %v2108_v28  ;;  %v705_v34 = vpop.xlane.xlu1 %704  ;;  %v702_v36 = vpop.xlane.xlu0 %701  ;;  %v886_v28 = vsel %vm585_vm0, %v429_v17, 0.0 }
  0xe8   : > { %v2117_v21 = vrot.slane %v1685_v30, %v3876_v40  ;;  %v2122_v41 = vrot.slane %v1686_v31, %v3889_v57  ;;  %v1373_v42 = vpack.c.bf16 %v705_v34, %v702_v36  ;;  %v478_v34 = vld [vmem:[%s3702_s12 + $0x4a8] sm:$0xff]  ;;  %v477_v36 = vld [vmem:[%s3702_s12 + $0x4a0] sm:$0xff] }
  0xe9   : > { %v1033_v44 = vsel %vm585_vm0, %v478_v34, 0.0 }
  0xea   : > { %v2118_v45 = vsel %vm1937_vm4, %v2117_v21, %v2113_v32  ;;  %v1687_v47 = vunpack.c.l.b16 %v1373_v42  ;;  %v1688_v48 = vunpack.c.h.b16 %v1373_v42  ;;  %1124 = vadd.xlane.f32.xlu1 %v1123_v37  ;;  %1121 = vadd.xlane.f32.xlu0 %v1120_v38 }
  0xeb   : > { %v2123_v49 = vsel %vm1944_vm5, %v2122_v41, %v2118_v45  ;;  %v711_v51 = vpop.xlane.xlu1 %710  ;;  %v708_v52 = vpop.xlane.xlu0 %707  ;;  %v1030_v45 = vsel %vm585_vm0, %v477_v36, 0.0 }
  0xec   : > { %v2127_v56 = vrot.slane %v1687_v47, %v3902_v9  ;;  %v2132_v58 = vrot.slane %v1688_v48, %v3905_v10  ;;  %v1374_v59 = vpack.c.bf16 %v711_v51, %v708_v52  ;;  %v492_v51 = vld [vmem:[%s3702_s12 + $0x518] sm:$0xff]  ;;  %v491_v52 = vld [vmem:[%s3702_s12 + $0x510] sm:$0xff] }
  0xed   : > { %v1075_v62 = vsel %vm585_vm0, %v492_v51, 0.0 }
  0xee   : > { %v2128_v1 = vsel %vm1951_vm6, %v2127_v56, %v2123_v49  ;;  %v1689_v2 = vunpack.c.l.b16 %v1374_v59  ;;  %v1690_v3 = vunpack.c.h.b16 %v1374_v59  ;;  %1214 = vadd.xlane.f32.xlu1 %v1213_v54  ;;  %1211 = vadd.xlane.f32.xlu0 %v1210_v55 }
  0xef   : > { %v2133_v4 = vsel %vm1958_vm7, %v2132_v58, %v2128_v1  ;;  %v717_v5 = vpop.xlane.xlu1 %716  ;;  %v714_v6 = vpop.xlane.xlu0 %713  ;;  %v1072_v1 = vsel %vm585_vm0, %v491_v52, 0.0 }
  0xf0   : > { %v2137_v11 = vrot.slane %v1689_v2, %v3910_v14  ;;  %v2142_v12 = vrot.slane %v1690_v3, %v3917_v24  ;;  %v1375_v13 = vpack.c.bf16 %v717_v5, %v714_v6  ;;  %v522_v5 = vld [vmem:[%s3702_s12 + $0x608] sm:$0xff]  ;;  %v521_v6 = vld [vmem:[%s3702_s12 + $0x600] sm:$0xff] }
  0xf1   : > { %v1165_v17 = vsel %vm585_vm0, %v522_v5, 0.0 }
  0xf2   : > { %v2138_v19 = vsel %vm1965_vm8, %v2137_v11, %v2133_v4  ;;  %v1691_v16 = vunpack.c.l.b16 %v1375_v13  ;;  %v1692_v20 = vunpack.c.h.b16 %v1375_v13  ;;  %848 = vadd.xlane.f32.xlu1 %v847_v7  ;;  %845 = vadd.xlane.f32.xlu0 %v844_v8 }
  0xf3   : > { %v2143_v22 = vsel %vm1972_vm9, %v2142_v12, %v2138_v19  ;;  %v723_v23 = vpop.xlane.xlu1 %722  ;;  %v720_v26 = vpop.xlane.xlu0 %719  ;;  %v1162_v19 = vsel %vm585_vm0, %v521_v6, 0.0 }
  0xf4   : > { %v2147_v30 = vrot.slane %v1691_v16, %v3931_v46  ;;  %v2152_v31 = vrot.slane %v1692_v20, %v3939_v53  ;;  %v1376_v32 = vpack.c.bf16 %v723_v23, %v720_v26  ;;  %v539_v23 = vld [vmem:[%s3702_s12 + $0x690] sm:$0xff] }
  0xf6   : > { %v2148_v37 = vsel %vm5109_vm10, %v2147_v30, %v2143_v22  ;;  %v1693_v38 = vunpack.c.l.b16 %v1376_v32  ;;  %v1694_v21 = vunpack.c.h.b16 %v1376_v32  ;;  %890 = vadd.xlane.f32.xlu1 %v889_v27  ;;  %887 = vadd.xlane.f32.xlu0 %v886_v28  ;;  %v540_v22 = vld [vmem:[%s3702_s12 + $0x698] sm:$0xff] }
  0xf7   : > { %v2153_v41 = vsel %vm1986_vm11, %v2152_v31, %v2148_v37  ;;  %v729_v42 = vpop.xlane.xlu1 %728  ;;  %v726_v43 = vpop.xlane.xlu0 %725  ;;  %v1219_v34 = vsel %vm585_vm0, %v540_v22, 0.0 }
  0xf8   : > { %v2157_v47 = vrot.slane %v1693_v38, %v3946_v63  ;;  %v2162_v48 = vrot.slane %v1694_v21, %v3949_v0  ;;  %v1377_v49 = vpack.c.bf16 %v729_v42, %v726_v43  ;;  %v570_v21 = vld [vmem:[%s3702_s12 + $0x788] sm:$0xff] }
  0xf9   : > { %v1309_v51 = vsel %vm585_vm0, %v570_v21, 0.0 }
  0xfa   : > { %v2158_v54 = vsel %vm5108_vm12, %v2157_v47, %v2153_v41  ;;  %v1695_v55 = vunpack.c.l.b16 %v1377_v49  ;;  %v1696_v56 = vunpack.c.h.b16 %v1377_v49  ;;  %1034 = vadd.xlane.f32.xlu1 %v1033_v44  ;;  %1031 = vadd.xlane.f32.xlu0 %v1030_v45  ;;  %vm3201_vm12 = vcmask 1041409   ;;  %v569_v41 = vld [vmem:[%s3702_s12 + $0x780] sm:$0xff] }
  0xfb   : > { %v2163_v58 = vsel %vm2000_vm13, %v2162_v48, %v2158_v54  ;;  %v735_v59 = vpop.xlane.xlu1 %734  ;;  %v732_v60 = vpop.xlane.xlu0 %731  ;;  %v1306_v52 = vsel %vm585_vm0, %v569_v41, 0.0 }
  0xfc   : > { %v2167_v2 = vrot.slane %v1695_v55, %v3960_v18  ;;  %v2172_v3 = vrot.slane %v1696_v56, %v3967_v25  ;;  %v1378_v4 = vpack.c.bf16 %v735_v59, %v732_v60  ;;  %v447_v59 = vld [vmem:[%s3702_s12 + $0x3b0] sm:$0xff] }
  0xfd   : > { %v940_v6 = vsel %vm585_vm0, %v447_v59, 0.0 }
  0xfe   : > { %v2168_v7 = vsel %vm2007_vm14, %v2167_v2, %v2163_v58  ;;  %v1697_v8 = vunpack.c.l.b16 %v1378_v4  ;;  %v1698_v11 = vunpack.c.h.b16 %v1378_v4  ;;  %1076 = vadd.xlane.f32.xlu1 %v1075_v62  ;;  %1073 = vadd.xlane.f32.xlu0 %v1072_v1  ;;  %v448_v58 = vld [vmem:[%s3702_s12 + $0x3b8] sm:$0xff] }
  0xff   : > { %v2173_v12 = vsel %vm2014_vm15, %v2172_v3, %v2168_v7  ;;  %v741_v13 = vpop.xlane.xlu1 %740  ;;  %v738_v15 = vpop.xlane.xlu0 %737  ;;  %v943_v5 = vsel %vm585_vm0, %v448_v58, 0.0 }
 0x100   : > { %v4115_v16 = vsel %vm3201_vm12, %v2173_v12, %v3981_v50  ;;  %v1379_v20 = vpack.c.bf16 %v741_v13, %v738_v15  ;;  %v2177_v26 = vrot.slane %v1697_v8, %v3860_v29  ;;  %v2181_v27 = vrot.slane %v1698_v11, %v3868_v35  ;;  %v462_v12 = vld [vmem:[%s3702_s12 + $0x428] sm:$0xff]  ;;  %v461_v13 = vld [vmem:[%s3702_s12 + $0x420] sm:$0xff] }
 0x101   : > { %v1216_v50 = vsel %vm585_vm0, %v539_v23, 0.0 }
 0x102   : > { %v1699_v28 = vunpack.c.l.b16 %v1379_v20  ;;  %v1700_v30 = vunpack.c.h.b16 %v1379_v20  ;;  %1166 = vadd.xlane.f32.xlu1 %v1165_v17  ;;  %1163 = vadd.xlane.f32.xlu0 %v1162_v19  ;;  %v2182_v42 = vsel %vm1916_vm1, %v2181_v27, %v2177_v26  ;;  %v985_v26 = vsel %vm585_vm0, %v462_v12, 0.0 }
 0x103   : > { %v747_v31 = vpop.xlane.xlu1 %746  ;;  %v744_v32 = vpop.xlane.xlu0 %743  ;;  %v982_v27 = vsel %vm585_vm0, %v461_v13, 0.0 }
 0x104   : > { %v2186_v36 = vrot.slane %v1699_v28, %v3865_v33  ;;  %v2191_v37 = vrot.slane %v1700_v30, %v3873_v39  ;;  %v1380_v38 = vpack.c.bf16 %v747_v31, %v744_v32  ;;  %v510_v32 = vld [vmem:[%s3702_s12 + $0x5a8] sm:$0xff] }
 0x106   : > { %v2187_v43 = vsel %vm1923_vm2, %v2186_v36, %v2182_v42  ;;  %v1701_v44 = vunpack.c.l.b16 %v1380_v38  ;;  %v1702_v45 = vunpack.c.h.b16 %v1380_v38  ;;  %1220 = vadd.xlane.f32.xlu1 %v1219_v34  ;;  %1217 = vadd.xlane.f32.xlu0 %v1216_v50  ;;  %v509_v34 = vld [vmem:[%s3702_s12 + $0x5a0] sm:$0xff]  ;;  %v1129_v42 = vsel %vm585_vm0, %v510_v32, 0.0 }
 0x107   : > { %v2192_v47 = vsel %vm1930_vm3, %v2191_v37, %v2187_v43  ;;  %v753_v48 = vpop.xlane.xlu1 %752  ;;  %v750_v49 = vpop.xlane.xlu0 %749  ;;  %v1126_v43 = vsel %vm585_vm0, %v509_v34, 0.0 }
 0x108   : > { %v2196_v54 = vrot.slane %v1701_v44, %v3876_v40  ;;  %v2201_v55 = vrot.slane %v1702_v45, %v3889_v57  ;;  %v1381_v56 = vpack.c.bf16 %v753_v48, %v750_v49  ;;  %v524_v48 = vld [vmem:[%s3702_s12 + $0x618] sm:$0xff]  ;;  %v523_v49 = vld [vmem:[%s3702_s12 + $0x610] sm:$0xff] }
 0x109   : > { %v1171_v59 = vsel %vm585_vm0, %v524_v48, 0.0 }
 0x10a   : > { %v2197_v60 = vsel %vm1937_vm4, %v2196_v54, %v2192_v47  ;;  %v1703_v62 = vunpack.c.l.b16 %v1381_v56  ;;  %v1704_v1 = vunpack.c.h.b16 %v1381_v56  ;;  %1310 = vadd.xlane.f32.xlu1 %v1309_v51  ;;  %1307 = vadd.xlane.f32.xlu0 %v1306_v52 }
 0x10b   : > { %v2202_v2 = vsel %vm1944_vm5, %v2201_v55, %v2197_v60  ;;  %v759_v3 = vpop.xlane.xlu1 %758  ;;  %v756_v4 = vpop.xlane.xlu0 %755  ;;  %v1168_v60 = vsel %vm585_vm0, %v523_v49, 0.0 }
 0x10c   : > { %v2206_v7 = vrot.slane %v1703_v62, %v3902_v9  ;;  %v2211_v8 = vrot.slane %v1704_v1, %v3905_v10  ;;  %v1382_v11 = vpack.c.bf16 %v759_v3, %v756_v4  ;;  %v554_v3 = vld [vmem:[%s3702_s12 + $0x708] sm:$0xff]  ;;  %v553_v4 = vld [vmem:[%s3702_s12 + $0x700] sm:$0xff] }
 0x10d   : > { %v1261_v13 = vsel %vm585_vm0, %v554_v3, 0.0 }
 0x10e   : > { %v2207_v15 = vsel %vm1951_vm6, %v2206_v7, %v2202_v2  ;;  %v1705_v17 = vunpack.c.l.b16 %v1382_v11  ;;  %v1706_v19 = vunpack.c.h.b16 %v1382_v11  ;;  %944 = vadd.xlane.f32.xlu1 %v943_v5  ;;  %941 = vadd.xlane.f32.xlu0 %v940_v6 }
 0x10f   : > { %v2212_v20 = vsel %vm1958_vm7, %v2211_v8, %v2207_v15  ;;  %v765_v22 = vpop.xlane.xlu1 %764  ;;  %v762_v23 = vpop.xlane.xlu0 %761  ;;  %v1258_v15 = vsel %vm585_vm0, %v553_v4, 0.0 }
 0x110   : > { %v2216_v28 = vrot.slane %v1705_v17, %v3910_v14  ;;  %v2221_v30 = vrot.slane %v1706_v19, %v3917_v24  ;;  %v1383_v31 = vpack.c.bf16 %v765_v22, %v762_v23  ;;  %v572_v22 = vld [vmem:[%s3702_s12 + $0x798] sm:$0xff]  ;;  %v571_v23 = vld [vmem:[%s3702_s12 + $0x790] sm:$0xff] }
 0x111   : > { %v1315_v34 = vsel %vm585_vm0, %v572_v22, 0.0 }
 0x112   : > { %v2217_v50 = vsel %vm1965_vm8, %v2216_v28, %v2212_v20  ;;  %v1707_v36 = vunpack.c.l.b16 %v1383_v31  ;;  %v1708_v37 = vunpack.c.h.b16 %v1383_v31  ;;  %986 = vadd.xlane.f32.xlu1 %v985_v26  ;;  %983 = vadd.xlane.f32.xlu0 %v982_v27 }
 0x113   : > { %v2222_v38 = vsel %vm1972_vm9, %v2221_v30, %v2217_v50  ;;  %v771_v21 = vpop.xlane.xlu1 %770  ;;  %v768_v41 = vpop.xlane.xlu0 %767  ;;  %v1312_v50 = vsel %vm585_vm0, %v571_v23, 0.0 }
 0x114   : > { %v2226_v44 = vrot.slane %v1707_v36, %v3931_v46  ;;  %v2231_v45 = vrot.slane %v1708_v37, %v3939_v53  ;;  %v1384_v47 = vpack.c.bf16 %v771_v21, %v768_v41  ;;  %v417_v21 = vld [vmem:[%s3702_s12 + $0x2c0] sm:$0xff] }
 0x116   : > { %v2227_v51 = vsel %vm5109_vm10, %v2226_v44, %v2222_v38  ;;  %v1709_v52 = vunpack.c.l.b16 %v1384_v47  ;;  %v1710_v54 = vunpack.c.h.b16 %v1384_v47  ;;  %1130 = vadd.xlane.f32.xlu1 %v1129_v42  ;;  %1127 = vadd.xlane.f32.xlu0 %v1126_v43  ;;  %vm5110_vm10 = vcmask 851712   ;;  %v418_v38 = vld [vmem:[%s3702_s12 + $0x2c8] sm:$0xff] }
 0x117   : > { %v2232_v55 = vsel %vm1986_vm11, %v2231_v45, %v2227_v51  ;;  %v777_v56 = vpop.xlane.xlu1 %776  ;;  %v774_v58 = vpop.xlane.xlu0 %773  ;;  %v853_v48 = vsel %vm585_vm0, %v418_v38, 0.0 }
 0x118   : > { %v2236_v62 = vrot.slane %v1709_v52, %v3946_v63  ;;  %v2241_v1 = vrot.slane %v1710_v54, %v3949_v0  ;;  %v1385_v2 = vpack.c.bf16 %v777_v56, %v774_v58  ;;  %v432_v54 = vld [vmem:[%s3702_s12 + $0x338] sm:$0xff] }
 0x119   : > { %v895_v3 = vsel %vm585_vm0, %v432_v54, 0.0 }
 0x11a   : > { %v2237_v5 = vsel %vm5110_vm10, %v2236_v62, %v2232_v55  ;;  %v1711_v6 = vunpack.c.l.b16 %v1385_v2  ;;  %v1712_v7 = vunpack.c.h.b16 %v1385_v2  ;;  %1172 = vadd.xlane.f32.xlu1 %v1171_v59  ;;  %1169 = vadd.xlane.f32.xlu0 %v1168_v60  ;;  %v431_v55 = vld [vmem:[%s3702_s12 + $0x330] sm:$0xff]  ;;  %vm5111_vm10 = vcmask 720512  }
 0x11b   : > { %v2242_v8 = vsel %vm2000_vm13, %v2241_v1, %v2237_v5  ;;  %v783_v11 = vpop.xlane.xlu1 %782  ;;  %v780_v12 = vpop.xlane.xlu0 %779  ;;  %v892_v4 = vsel %vm585_vm0, %v431_v55, 0.0 }
 0x11c   : > { %v2246_v17 = vrot.slane %v1711_v6, %v3960_v18  ;;  %v2251_v19 = vrot.slane %v1712_v7, %v3967_v25  ;;  %v1386_v20 = vpack.c.bf16 %v783_v11, %v780_v12  ;;  %v479_v11 = vld [vmem:[%s3702_s12 + $0x4b0] sm:$0xff] }
 0x11d   : > { %v1036_v23 = vsel %vm585_vm0, %v479_v11, 0.0 }
 0x11e   : > { %v2247_v26 = vsel %vm2007_vm14, %v2246_v17, %v2242_v8  ;;  %v1713_v27 = vunpack.c.l.b16 %v1386_v20  ;;  %v1714_v28 = vunpack.c.h.b16 %v1386_v20  ;;  %1262 = vadd.xlane.f32.xlu1 %v1261_v13  ;;  %1259 = vadd.xlane.f32.xlu0 %v1258_v15  ;;  %v480_v8 = vld [vmem:[%s3702_s12 + $0x4b8] sm:$0xff] }
 0x11f   : > { %v2252_v30 = vsel %vm2014_vm15, %v2251_v19, %v2247_v26  ;;  %v789_v31 = vpop.xlane.xlu1 %788  ;;  %v786_v32 = vpop.xlane.xlu0 %785  ;;  %v1039_v22 = vsel %vm585_vm0, %v480_v8, 0.0 }
 0x120   : > { %v4182_v36 = vsel %vm3201_vm12, %v2252_v30, %v4046_v61  ;;  %v1387_v37 = vpack.c.bf16 %v789_v31, %v786_v32  ;;  %v2256_v41 = vrot.slane %v1713_v27, %v3860_v29  ;;  %v2260_v42 = vrot.slane %v1714_v28, %v3868_v35  ;;  %v494_v30 = vld [vmem:[%s3702_s12 + $0x528] sm:$0xff]  ;;  %v493_v31 = vld [vmem:[%s3702_s12 + $0x520] sm:$0xff] }
 0x121   : > { %v850_v61 = vsel %vm585_vm0, %v417_v21, 0.0  ;;  %vm5112_vm12 = vcmask 851712  }
 0x122   : > { %v1715_v43 = vunpack.c.l.b16 %v1387_v37  ;;  %v1716_v44 = vunpack.c.h.b16 %v1387_v37  ;;  %1316 = vadd.xlane.f32.xlu1 %v1315_v34  ;;  %1313 = vadd.xlane.f32.xlu0 %v1312_v50  ;;  %v2261_v56 = vsel %vm1916_vm1, %v2260_v42, %v2256_v41  ;;  %v1081_v41 = vsel %vm585_vm0, %v494_v30, 0.0 }
 0x123   : > { %v795_v45 = vpop.xlane.xlu1 %794  ;;  %v792_v47 = vpop.xlane.xlu0 %791  ;;  %v1078_v42 = vsel %vm585_vm0, %v493_v31, 0.0 }
 0x124   : > { %v2265_v49 = vrot.slane %v1715_v43, %v3865_v33  ;;  %v2270_v51 = vrot.slane %v1716_v44, %v3873_v39  ;;  %v1388_v52 = vpack.c.bf16 %v795_v45, %v792_v47  ;;  %v542_v47 = vld [vmem:[%s3702_s12 + $0x6a8] sm:$0xff] }
 0x126   : > { %v2266_v58 = vsel %vm1923_vm2, %v2265_v49, %v2261_v56  ;;  %v1717_v59 = vunpack.c.l.b16 %v1388_v52  ;;  %v1718_v60 = vunpack.c.h.b16 %v1388_v52  ;;  %854 = vadd.xlane.f32.xlu1 %v853_v48  ;;  %851 = vadd.xlane.f32.xlu0 %v850_v61  ;;  %v541_v48 = vld [vmem:[%s3702_s12 + $0x6a0] sm:$0xff]  ;;  %v1225_v56 = vsel %vm585_vm0, %v542_v47, 0.0 }
 0x127   : > { %v2271_v62 = vsel %vm1930_vm3, %v2270_v51, %v2266_v58  ;;  %v801_v1 = vpop.xlane.xlu1 %800  ;;  %v798_v2 = vpop.xlane.xlu0 %797  ;;  %v1222_v58 = vsel %vm585_vm0, %v541_v48, 0.0 }
 0x128   : > { %v2275_v5 = vrot.slane %v1717_v59, %v3876_v40  ;;  %v2280_v6 = vrot.slane %v1718_v60, %v3889_v57  ;;  %v1389_v7 = vpack.c.bf16 %v801_v1, %v798_v2  ;;  %v556_v1 = vld [vmem:[%s3702_s12 + $0x718] sm:$0xff]  ;;  %v555_v2 = vld [vmem:[%s3702_s12 + $0x710] sm:$0xff] }
 0x129   : > { %v1267_v11 = vsel %vm585_vm0, %v556_v1, 0.0 }
 0x12a   : > { %v2276_v12 = vsel %vm1937_vm4, %v2275_v5, %v2271_v62  ;;  %v1719_v13 = vunpack.c.l.b16 %v1389_v7  ;;  %v1720_v15 = vunpack.c.h.b16 %v1389_v7  ;;  %896 = vadd.xlane.f32.xlu1 %v895_v3  ;;  %893 = vadd.xlane.f32.xlu0 %v892_v4 }
 0x12b   : > { %v2281_v17 = vsel %vm1944_vm5, %v2280_v6, %v2276_v12  ;;  %v807_v19 = vpop.xlane.xlu1 %806  ;;  %v804_v20 = vpop.xlane.xlu0 %803  ;;  %v1264_v12 = vsel %vm585_vm0, %v555_v2, 0.0 }
 0x12c   : > { %v2285_v26 = vrot.slane %v1719_v13, %v3902_v9  ;;  %v2290_v27 = vrot.slane %v1720_v15, %v3905_v10  ;;  %v1390_v28 = vpack.c.bf16 %v807_v19, %v804_v20  ;;  %v450_v19 = vld [vmem:[%s3702_s12 + $0x3c8] sm:$0xff]  ;;  %v449_v20 = vld [vmem:[%s3702_s12 + $0x3c0] sm:$0xff] }
 0x12d   : > { %v949_v31 = vsel %vm585_vm0, %v450_v19, 0.0 }
 0x12e   : > { %v2286_v32 = vsel %vm1951_vm6, %v2285_v26, %v2281_v17  ;;  %v1721_v34 = vunpack.c.l.b16 %v1390_v28  ;;  %v1722_v50 = vunpack.c.h.b16 %v1390_v28  ;;  %1040 = vadd.xlane.f32.xlu1 %v1039_v22  ;;  %1037 = vadd.xlane.f32.xlu0 %v1036_v23 }
 0x12f   : > { %v2291_v37 = vsel %vm1958_vm7, %v2290_v27, %v2286_v32  ;;  %v813_v38 = vpop.xlane.xlu1 %812  ;;  %v810_v21 = vpop.xlane.xlu0 %809  ;;  %v946_v32 = vsel %vm585_vm0, %v449_v20, 0.0  ;;  %v574_v20 = vld [vmem:[%s3702_s12 + $0x7a8] sm:$0xff] }
 0x130   : > { %v2295_v43 = vrot.slane %v1721_v34, %v3910_v14  ;;  %v2300_v44 = vrot.slane %v1722_v50, %v3917_v24  ;;  %v1391_v45 = vpack.c.bf16 %v813_v38, %v810_v21  ;;  %v464_v38 = vld [vmem:[%s3702_s12 + $0x438] sm:$0xff]  ;;  %v463_v21 = vld [vmem:[%s3702_s12 + $0x430] sm:$0xff] }
 0x131   : > { %v991_v48 = vsel %vm585_vm0, %v464_v38, 0.0 }
 0x132   : > { %v2296_v61 = vsel %vm1965_vm8, %v2295_v43, %v2291_v37  ;;  %v1723_v49 = vunpack.c.l.b16 %v1391_v45  ;;  %v1724_v51 = vunpack.c.h.b16 %v1391_v45  ;;  %1082 = vadd.xlane.f32.xlu1 %v1081_v41  ;;  %1079 = vadd.xlane.f32.xlu0 %v1078_v42 }
 0x133   : > { %v2301_v52 = vsel %vm1972_vm9, %v2300_v44, %v2296_v61  ;;  %v819_v54 = vpop.xlane.xlu1 %818  ;;  %v816_v55 = vpop.xlane.xlu0 %815  ;;  %v988_v61 = vsel %vm585_vm0, %v463_v21, 0.0 }
 0x134   : > { %v2305_v59 = vrot.slane %v1723_v49, %v3931_v46  ;;  %v2310_v60 = vrot.slane %v1724_v51, %v3939_v53  ;;  %v1392_v62 = vpack.c.bf16 %v819_v54, %v816_v55  ;;  %v511_v54 = vld [vmem:[%s3702_s12 + $0x5b0] sm:$0xff] }
 0x136   : > { %v2306_v3 = vsel %vm5111_vm10, %v2305_v59, %v2301_v52  ;;  %v1725_v4 = vunpack.c.l.b16 %v1392_v62  ;;  %v1726_v5 = vunpack.c.h.b16 %v1392_v62  ;;  %1226 = vadd.xlane.f32.xlu1 %v1225_v56  ;;  %1223 = vadd.xlane.f32.xlu0 %v1222_v58  ;;  %vm3203_vm10 = vcmask 1042434   ;;  %v512_v52 = vld [vmem:[%s3702_s12 + $0x5b8] sm:$0xff] }
 0x137   : > { %v2311_v6 = vsel %vm1986_vm11, %v2310_v60, %v2306_v3  ;;  %v825_v7 = vpop.xlane.xlu1 %824  ;;  %v822_v8 = vpop.xlane.xlu0 %821  ;;  %v1135_v1 = vsel %vm585_vm0, %v512_v52, 0.0  ;;  %v433_v52 = vld [vmem:[%s3702_s12 + $0x340] sm:$0xff] }
 0x138   : > { %v2315_v13 = vrot.slane %v1725_v4, %v3946_v63  ;;  %v2320_v15 = vrot.slane %v1726_v5, %v3949_v0  ;;  %v1393_v17 = vpack.c.bf16 %v825_v7, %v822_v8  ;;  %v526_v5 = vld [vmem:[%s3702_s12 + $0x628] sm:$0xff] }
 0x13a   : > { %v2316_v22 = vsel %vm5112_vm12, %v2315_v13, %v2311_v6  ;;  %v1727_v23 = vunpack.c.l.b16 %v1393_v17  ;;  %v1728_v26 = vunpack.c.h.b16 %v1393_v17  ;;  %1268 = vadd.xlane.f32.xlu1 %v1267_v11  ;;  %1265 = vadd.xlane.f32.xlu0 %v1264_v12  ;;  %v525_v6 = vld [vmem:[%s3702_s12 + $0x620] sm:$0xff] }
 0x13b   : > { %v2321_v27 = vsel %vm2000_vm13, %v2320_v15, %v2316_v22  ;;  %v831_v28 = vpop.xlane.xlu1 %830  ;;  %v828_v30 = vpop.xlane.xlu0 %827  ;;  %v1177_v15 = vsel %vm585_vm0, %v526_v5, 0.0  ;;  %v1174_v17 = vsel %vm585_vm0, %v525_v6, 0.0  ;;  %v573_v22 = vld [vmem:[%s3702_s12 + $0x7a0] sm:$0xff] }
 0x13c   : > { %v2325_v34 = vrot.slane %v1727_v23, %v3960_v18  ;;  %v2330_v50 = vrot.slane %v1728_v26, %v3967_v25  ;;  %v1394_v37 = vpack.c.bf16 %v831_v28, %v828_v30  ;;  %v1321_v30 = vsel %vm585_vm0, %v574_v20, 0.0 }
 0x13e   : > { %v2326_v41 = vsel %vm2007_vm14, %v2325_v34, %v2321_v27  ;;  %v1729_v42 = vunpack.c.l.b16 %v1394_v37  ;;  %v1730_v43 = vunpack.c.h.b16 %v1394_v37  ;;  %950 = vadd.xlane.f32.xlu1 %v949_v31  ;;  %947 = vadd.xlane.f32.xlu0 %v946_v32  ;;  %v1318_v31 = vsel %vm585_vm0, %v573_v22, 0.0  ;;  %v420_v34 = vld [vmem:[%s3702_s12 + $0x2d8] sm:$0xff] }
 0x13f   : > { %v2331_v44 = vsel %vm2014_vm15, %v2330_v50, %v2326_v41  ;;  %v837_v45 = vpop.xlane.xlu1 %836  ;;  %v834_v47 = vpop.xlane.xlu0 %833  ;;  %v419_v50 = vld [vmem:[%s3702_s12 + $0x2d0] sm:$0xff]  ;;  %v496_v22 = vld [vmem:[%s3702_s12 + $0x538] sm:$0xff] }
 0x140   : > { %v4249_v49 = vsel %vm3203_vm10, %v2331_v44, %v4115_v16  ;;  %v1395_v51 = vpack.c.bf16 %v837_v45, %v834_v47  ;;  %v2335_v55 = vrot.slane %v1729_v42, %v3860_v29  ;;  %v2339_v56 = vrot.slane %v1730_v43, %v3868_v35 }
 0x141   : > { %v1132_v16 = vsel %vm585_vm0, %v511_v54, 0.0  ;;  %v859_v44 = vsel %vm585_vm0, %v420_v34, 0.0  ;;  %v856_v45 = vsel %vm585_vm0, %v419_v50, 0.0  ;;  %v1087_v50 = vsel %vm585_vm0, %v496_v22, 0.0 }
 0x142   : > { %v1731_v58 = vunpack.c.l.b16 %v1395_v51  ;;  %v1732_v59 = vunpack.c.h.b16 %v1395_v51  ;;  %992 = vadd.xlane.f32.xlu1 %v991_v48  ;;  %989 = vadd.xlane.f32.xlu0 %v988_v61  ;;  %v2340_v7 = vsel %vm1916_vm1, %v2339_v56, %v2335_v55  ;;  %v434_v51 = vld [vmem:[%s3702_s12 + $0x348] sm:$0xff] }
 0x143   : > { %v927_v60 = vpop.xlane.xlu1 %926  ;;  %v924_v62 = vpop.xlane.xlu0 %923 }
 0x144   : > { %v2344_v2 = vrot.slane %v1731_v58, %v3865_v33  ;;  %v2349_v3 = vrot.slane %v1732_v59, %v3873_v39  ;;  %v1410_v4 = vpack.c.bf16 %v927_v60, %v924_v62  ;;  %v901_v60 = vsel %vm585_vm0, %v434_v51, 0.0 }
 0x145   : > { %v898_v62 = vsel %vm585_vm0, %v433_v52, 0.0 }
 0x146   : > { %v2345_v8 = vsel %vm1923_vm2, %v2344_v2, %v2340_v7  ;;  %1136 = vadd.xlane.f32.xlu1 %v1135_v1  ;;  %1133 = vadd.xlane.f32.xlu0 %v1132_v16  ;;  %v1761_v23 = vunpack.c.l.b16 %v1410_v4  ;;  %v1762_v26 = vunpack.c.h.b16 %v1410_v4  ;;  %v482_v16 = vld [vmem:[%s3702_s12 + $0x4c8] sm:$0xff]  ;;  %v481_v2 = vld [vmem:[%s3702_s12 + $0x4c0] sm:$0xff] }
 0x147   : > { %v4264_v11 = vsel %vm1930_vm3, %v2349_v3, %v2345_v8  ;;  %v879_v12 = vpop.xlane.xlu1 %878  ;;  %v876_v13 = vpop.xlane.xlu0 %875 }
 0x148   : > { %v1402_v19 = vpack.c.bf16 %v879_v12, %v876_v13  ;;  %v2493_v37 = vrot.slane %v1761_v23, %v3860_v29  ;;  %v2497_v38 = vrot.slane %v1762_v26, %v3868_v35  ;;  %v1045_v12 = vsel %vm585_vm0, %v482_v16, 0.0  ;;  %v495_v23 = vld [vmem:[%s3702_s12 + $0x530] sm:$0xff] }
 0x149   : > { %v1042_v13 = vsel %vm585_vm0, %v481_v2, 0.0 }
 0x14a   : > { %1178 = vadd.xlane.f32.xlu1 %v1177_v15  ;;  %1175 = vadd.xlane.f32.xlu0 %v1174_v17  ;;  %v2498_v54 = vsel %vm1916_vm1, %v2497_v38, %v2493_v37  ;;  %v1745_v3 = vunpack.c.l.b16 %v1402_v19  ;;  %v1746_v4 = vunpack.c.h.b16 %v1402_v19  ;;  %v1084_v37 = vsel %vm585_vm0, %v495_v23, 0.0 }
 0x14b   : > { %v933_v27 = vpop.xlane.xlu1 %932  ;;  %v930_v28 = vpop.xlane.xlu0 %929 }
 0x14c   : > { %v1411_v32 = vpack.c.bf16 %v933_v27, %v930_v28  ;;  %v2414_v19 = vrot.slane %v1745_v3, %v3860_v29  ;;  %v2418_v26 = vrot.slane %v1746_v4, %v3868_v35 }
 0x14e   : > { %v1763_v21 = vunpack.c.l.b16 %v1411_v32  ;;  %v1764_v41 = vunpack.c.h.b16 %v1411_v32  ;;  %1322 = vadd.xlane.f32.xlu1 %v1321_v30  ;;  %1319 = vadd.xlane.f32.xlu0 %v1318_v31 }
 0x14f   : > { %v1023_v42 = vpop.xlane.xlu1 %1022  ;;  %v1020_v43 = vpop.xlane.xlu0 %1019 }
 0x150   : > { %v2502_v47 = vrot.slane %v1763_v21, %v3865_v33  ;;  %v2507_v48 = vrot.slane %v1764_v41, %v3873_v39  ;;  %v4280_v61 = vpack.c.bf16 %v1023_v42, %v1020_v43  ;;  %v543_v42 = vld [vmem:[%s3702_s12 + $0x6b0] sm:$0xff]  ;;  %v2419_v43 = vsel %vm1916_vm1, %v2418_v26, %v2414_v19 }
 0x152   : > { %v2503_v55 = vsel %vm1923_vm2, %v2502_v47, %v2498_v54  ;;  %860 = vadd.xlane.f32.xlu1 %v859_v44  ;;  %857 = vadd.xlane.f32.xlu0 %v856_v45  ;;  %v1793_v44 = vunpack.c.l.b16 %v4280_v61  ;;  %v1794_v45 = vunpack.c.h.b16 %v4280_v61 }
 0x153   : > { %v4287_v56 = vsel %vm1930_vm3, %v2507_v48, %v2503_v55  ;;  %v843_v58 = vpop.xlane.xlu1 %842  ;;  %v840_v59 = vpop.xlane.xlu0 %839  ;;  %v1228_v55 = vsel %vm585_vm0, %v543_v42, 0.0 }
 0x154   : > { %v1396_v1 = vpack.c.bf16 %v843_v58, %v840_v59  ;;  %v558_v59 = vld [vmem:[%s3702_s12 + $0x728] sm:$0xff]  ;;  %v2651_v61 = vrot.slane %v1793_v44, %v3860_v29 }
 0x155   : > { %v1273_v4 = vsel %vm585_vm0, %v558_v59, 0.0 }
 0x156   : > { %v1733_v5 = vunpack.c.l.b16 %v1396_v1  ;;  %v1734_v6 = vunpack.c.h.b16 %v1396_v1  ;;  %902 = vadd.xlane.f32.xlu1 %v901_v60  ;;  %899 = vadd.xlane.f32.xlu0 %v898_v62  ;;  %v557_v60 = vld [vmem:[%s3702_s12 + $0x720] sm:$0xff]  ;;  %v2655_v62 = vrot.slane %v1794_v45, %v3868_v35 }
 0x157   : > { %v885_v7 = vpop.xlane.xlu1 %884  ;;  %v882_v8 = vpop.xlane.xlu0 %881 }
 0x158   : > { %v2354_v15 = vrot.slane %v1733_v5, %v3876_v40  ;;  %v2359_v17 = vrot.slane %v1734_v6, %v3889_v57  ;;  %v1403_v20 = vpack.c.bf16 %v885_v7, %v882_v8  ;;  %v1270_v5 = vsel %vm585_vm0, %v557_v60, 0.0 }
 0x15a   : > { %v2355_v27 = vsel %vm1937_vm4, %v2354_v15, %v4264_v11  ;;  %v1747_v28 = vunpack.c.l.b16 %v1403_v20  ;;  %v1748_v30 = vunpack.c.h.b16 %v1403_v20  ;;  %1046 = vadd.xlane.f32.xlu1 %v1045_v12  ;;  %1043 = vadd.xlane.f32.xlu0 %v1042_v13  ;;  %v544_v11 = vld [vmem:[%s3702_s12 + $0x6b8] sm:$0xff]  ;;  %v451_v13 = vld [vmem:[%s3702_s12 + $0x3d0] sm:$0xff]  ;;  %v2656_v15 = vsel %vm1916_vm1, %v2655_v62, %v2651_v61 }
 0x15b   : > { %v4304_v31 = vsel %vm1944_vm5, %v2359_v17, %v2355_v27  ;;  %v975_v32 = vpop.xlane.xlu1 %974  ;;  %v972_v34 = vpop.xlane.xlu0 %971  ;;  %v1231_v54 = vsel %vm585_vm0, %v544_v11, 0.0  ;;  %v452_v12 = vld [vmem:[%s3702_s12 + $0x3d8] sm:$0xff]  ;;  %v952_v26 = vsel %vm585_vm0, %v451_v13, 0.0 }
 0x15c   : > { %v2423_v38 = vrot.slane %v1747_v28, %v3865_v33  ;;  %v2428_v21 = vrot.slane %v1748_v30, %v3873_v39  ;;  %v1418_v41 = vpack.c.bf16 %v975_v32, %v972_v34  ;;  %v955_v19 = vsel %vm585_vm0, %v452_v12, 0.0  ;;  %v466_v28 = vld [vmem:[%s3702_s12 + $0x448] sm:$0xff]  ;;  %v465_v30 = vld [vmem:[%s3702_s12 + $0x440] sm:$0xff] }
 0x15d   : > { %v997_v11 = vsel %vm585_vm0, %v466_v28, 0.0  ;;  %v994_v42 = vsel %vm585_vm0, %v465_v30, 0.0 }
 0x15e   : > { %v2424_v47 = vsel %vm1923_vm2, %v2423_v38, %v2419_v43  ;;  %1088 = vadd.xlane.f32.xlu1 %v1087_v50  ;;  %1085 = vadd.xlane.f32.xlu0 %v1084_v37  ;;  %v1777_v32 = vunpack.c.l.b16 %v1418_v41  ;;  %v1778_v34 = vunpack.c.h.b16 %v1418_v41 }
 0x15f   : > { %v4317_v48 = vsel %vm1930_vm3, %v2428_v21, %v2424_v47  ;;  %v1029_v51 = vpop.xlane.xlu1 %1028  ;;  %v1026_v52 = vpop.xlane.xlu0 %1025  ;;  %v514_v47 = vld [vmem:[%s3702_s12 + $0x5c8] sm:$0xff] }
 0x160   : > { %v1427_v58 = vpack.c.bf16 %v1029_v51, %v1026_v52  ;;  %v513_v51 = vld [vmem:[%s3702_s12 + $0x5c0] sm:$0xff]  ;;  %v2572_v41 = vrot.slane %v1777_v32, %v3860_v29  ;;  %v2576_v52 = vrot.slane %v1778_v34, %v3868_v35  ;;  %v1141_v62 = vsel %vm585_vm0, %v514_v47, 0.0 }
 0x162   : > { %v1795_v1 = vunpack.c.l.b16 %v1427_v58  ;;  %v1796_v16 = vunpack.c.h.b16 %v1427_v58  ;;  %1232 = vadd.xlane.f32.xlu1 %v1231_v54  ;;  %1229 = vadd.xlane.f32.xlu0 %v1228_v55 }
 0x163   : > { %v1119_v2 = vpop.xlane.xlu1 %1118  ;;  %v1116_v3 = vpop.xlane.xlu0 %1115 }
 0x164   : > { %v2660_v6 = vrot.slane %v1795_v1, %v3865_v33  ;;  %v2665_v7 = vrot.slane %v1796_v16, %v3873_v39  ;;  %v4329_v8 = vpack.c.bf16 %v1119_v2, %v1116_v3  ;;  %v1138_v1 = vsel %vm585_vm0, %v513_v51, 0.0 }
 0x166   : > { %v2661_v17 = vsel %vm1923_vm2, %v2660_v6, %v2656_v15  ;;  %1274 = vadd.xlane.f32.xlu1 %v1273_v4  ;;  %1271 = vadd.xlane.f32.xlu0 %v1270_v5  ;;  %v527_v4 = vld [vmem:[%s3702_s12 + $0x630] sm:$0xff]  ;;  %v2577_v5 = vsel %vm1916_vm1, %v2576_v52, %v2572_v41  ;;  %v1825_v6 = vunpack.c.l.b16 %v4329_v8 }
 0x167   : > { %v4336_v20 = vsel %vm1930_vm3, %v2665_v7, %v2661_v17  ;;  %v939_v22 = vpop.xlane.xlu1 %938  ;;  %v936_v23 = vpop.xlane.xlu0 %935  ;;  %v1826_v7 = vunpack.c.h.b16 %v4329_v8 }
 0x168   : > { %v1412_v27 = vpack.c.bf16 %v939_v22, %v936_v23  ;;  %v1180_v23 = vsel %vm585_vm0, %v527_v4, 0.0  ;;  %v2809_v8 = vrot.slane %v1825_v6, %v3860_v29 }
 0x169   : > { %v2813_v28 = vrot.slane %v1826_v7, %v3868_v35 }
 0x16a   : > { %v1765_v50 = vunpack.c.l.b16 %v1412_v27  ;;  %v1766_v37 = vunpack.c.h.b16 %v1412_v27  ;;  %956 = vadd.xlane.f32.xlu1 %v955_v19  ;;  %953 = vadd.xlane.f32.xlu0 %v952_v26  ;;  %v576_v26 = vld [vmem:[%s3702_s12 + $0x7b8] sm:$0xff]  ;;  %v575_v27 = vld [vmem:[%s3702_s12 + $0x7b0] sm:$0xff] }
 0x16b   : > { %v981_v38 = vpop.xlane.xlu1 %980  ;;  %v978_v21 = vpop.xlane.xlu0 %977 }
 0x16c   : > { %v2512_v43 = vrot.slane %v1765_v50, %v3876_v40  ;;  %v2517_v44 = vrot.slane %v1766_v37, %v3889_v57  ;;  %v1419_v45 = vpack.c.bf16 %v981_v38, %v978_v21  ;;  %v1327_v37 = vsel %vm585_vm0, %v576_v26, 0.0 }
 0x16d   : > { %v1324_v38 = vsel %vm585_vm0, %v575_v27, 0.0 }
 0x16e   : > { %v2513_v54 = vsel %vm1937_vm4, %v2512_v43, %v4287_v56  ;;  %v1779_v55 = vunpack.c.l.b16 %v1419_v45  ;;  %v1780_v58 = vunpack.c.h.b16 %v1419_v45  ;;  %998 = vadd.xlane.f32.xlu1 %v997_v11  ;;  %995 = vadd.xlane.f32.xlu0 %v994_v42  ;;  %v528_v56 = vld [vmem:[%s3702_s12 + $0x638] sm:$0xff]  ;;  %v422_v43 = vld [vmem:[%s3702_s12 + $0x2e8] sm:$0xff]  ;;  %v2814_v45 = vsel %vm1916_vm1, %v2813_v28, %v2809_v8 }
 0x16f   : > { %v4353_v59 = vsel %vm1944_vm5, %v2517_v44, %v2513_v54  ;;  %v1071_v60 = vpop.xlane.xlu1 %1070  ;;  %v1068_v61 = vpop.xlane.xlu0 %1067  ;;  %v1183_v22 = vsel %vm585_vm0, %v528_v56, 0.0  ;;  %v421_v44 = vld [vmem:[%s3702_s12 + $0x2e0] sm:$0xff]  ;;  %v865_v54 = vsel %vm585_vm0, %v422_v43, 0.0 }
 0x170   : > { %v2581_v16 = vrot.slane %v1779_v55, %v3865_v33  ;;  %v2586_v2 = vrot.slane %v1780_v58, %v3873_v39  ;;  %v4359_v3 = vpack.c.bf16 %v1071_v60, %v1068_v61  ;;  %v862_v55 = vsel %vm585_vm0, %v421_v44, 0.0  ;;  %v436_v60 = vld [vmem:[%s3702_s12 + $0x358] sm:$0xff]  ;;  %v435_v61 = vld [vmem:[%s3702_s12 + $0x350] sm:$0xff] }
 0x171   : > { %v907_v56 = vsel %vm585_vm0, %v436_v60, 0.0  ;;  %v904_v4 = vsel %vm585_vm0, %v435_v61, 0.0 }
 0x172   : > { %v2582_v12 = vsel %vm1923_vm2, %v2581_v16, %v2577_v5  ;;  %1142 = vadd.xlane.f32.xlu1 %v1141_v62  ;;  %1139 = vadd.xlane.f32.xlu0 %v1138_v1 }
 0x173   : > { %v4368_v13 = vsel %vm1930_vm3, %v2586_v2, %v2582_v12  ;;  %v1125_v15 = vpop.xlane.xlu1 %1124  ;;  %v1122_v17 = vpop.xlane.xlu0 %1121  ;;  %v484_v12 = vld [vmem:[%s3702_s12 + $0x4d8] sm:$0xff] }
 0x174   : > { %v1443_v19 = vpack.c.bf16 %v1125_v15, %v1122_v17  ;;  %v483_v15 = vld [vmem:[%s3702_s12 + $0x4d0] sm:$0xff]  ;;  %v1051_v8 = vsel %vm585_vm0, %v484_v12, 0.0 }
 0x175   : > { %v1048_v28 = vsel %vm585_vm0, %v483_v15, 0.0 }
 0x176   : > { %v1827_v30 = vunpack.c.l.b16 %v1443_v19  ;;  %v1828_v32 = vunpack.c.h.b16 %v1443_v19  ;;  %1184 = vadd.xlane.f32.xlu1 %v1183_v22  ;;  %1181 = vadd.xlane.f32.xlu0 %v1180_v23 }
 0x177   : > { %v1215_v34 = vpop.xlane.xlu1 %1214  ;;  %v1212_v50 = vpop.xlane.xlu0 %1211 }
 0x178   : > { %v2818_v21 = vrot.slane %v1827_v30, %v3865_v33  ;;  %v2823_v11 = vrot.slane %v1828_v32, %v3873_v39  ;;  %v4380_v42 = vpack.c.bf16 %v1215_v34, %v1212_v50  ;;  %v498_v50 = vld [vmem:[%s3702_s12 + $0x548] sm:$0xff] }
 0x17a   : > { %v2819_v47 = vsel %vm1923_vm2, %v2818_v21, %v2814_v45  ;;  %1328 = vadd.xlane.f32.xlu1 %v1327_v37  ;;  %1325 = vadd.xlane.f32.xlu0 %v1324_v38  ;;  %v1809_v37 = vunpack.c.l.b16 %v4359_v3  ;;  %v1810_v38 = vunpack.c.h.b16 %v4359_v3 }
 0x17b   : > { %v4387_v51 = vsel %vm1930_vm3, %v2823_v11, %v2819_v47  ;;  %v849_v41 = vpop.xlane.xlu1 %848  ;;  %v846_v52 = vpop.xlane.xlu0 %845 }
 0x17c   : > { %v1397_v58 = vpack.c.bf16 %v849_v41, %v846_v52  ;;  %v1093_v41 = vsel %vm585_vm0, %v498_v50, 0.0  ;;  %v2730_v60 = vrot.slane %v1809_v37, %v3860_v29  ;;  %v2734_v61 = vrot.slane %v1810_v38, %v3868_v35  ;;  %v453_v37 = vld [vmem:[%s3702_s12 + $0x3e0] sm:$0xff] }
 0x17e   : > { %v1735_v62 = vunpack.c.l.b16 %v1397_v58  ;;  %v1736_v1 = vunpack.c.h.b16 %v1397_v58  ;;  %866 = vadd.xlane.f32.xlu1 %v865_v54  ;;  %863 = vadd.xlane.f32.xlu0 %v862_v55  ;;  %v546_v58 = vld [vmem:[%s3702_s12 + $0x6c8] sm:$0xff] }
 0x17f   : > { %v891_v16 = vpop.xlane.xlu1 %890  ;;  %v888_v2 = vpop.xlane.xlu0 %887 }
 0x180   : > { %v2364_v5 = vrot.slane %v1735_v62, %v3902_v9  ;;  %v2369_v6 = vrot.slane %v1736_v1, %v3905_v10  ;;  %v1404_v7 = vpack.c.bf16 %v891_v16, %v888_v2 }
 0x182   : > { %v2365_v17 = vsel %vm1951_vm6, %v2364_v5, %v4304_v31  ;;  %v1749_v22 = vunpack.c.l.b16 %v1404_v7  ;;  %v1750_v23 = vunpack.c.h.b16 %v1404_v7  ;;  %908 = vadd.xlane.f32.xlu1 %v907_v56  ;;  %905 = vadd.xlane.f32.xlu0 %v904_v4  ;;  %v497_v31 = vld [vmem:[%s3702_s12 + $0x540] sm:$0xff]  ;;  %v1237_v5 = vsel %vm585_vm0, %v546_v58, 0.0  ;;  %v467_v58 = vld [vmem:[%s3702_s12 + $0x450] sm:$0xff] }
 0x183   : > { %v4402_v19 = vsel %vm1958_vm7, %v2369_v6, %v2365_v17  ;;  %v1035_v26 = vpop.xlane.xlu1 %1034  ;;  %v1032_v27 = vpop.xlane.xlu0 %1031  ;;  %v1090_v52 = vsel %vm585_vm0, %v497_v31, 0.0  ;;  %v559_v17 = vld [vmem:[%s3702_s12 + $0x730] sm:$0xff]  ;;  %v454_v31 = vld [vmem:[%s3702_s12 + $0x3e8] sm:$0xff] }
 0x184   : > { %v2433_v30 = vrot.slane %v1749_v22, %v3876_v40  ;;  %v2438_v32 = vrot.slane %v1750_v23, %v3889_v57  ;;  %v1428_v34 = vpack.c.bf16 %v1035_v26, %v1032_v27  ;;  %v2735_v22 = vsel %vm1916_vm1, %v2734_v61, %v2730_v60 }
 0x185   : > { %v1857_v23 = vunpack.c.l.b16 %v4380_v42  ;;  %v1858_v26 = vunpack.c.h.b16 %v4380_v42 }
 0x186   : > { %v2434_v21 = vsel %vm1937_vm4, %v2433_v30, %v4317_v48  ;;  %v1797_v11 = vunpack.c.l.b16 %v1428_v34  ;;  %v1798_v43 = vunpack.c.h.b16 %v1428_v34  ;;  %1052 = vadd.xlane.f32.xlu1 %v1051_v8  ;;  %1049 = vadd.xlane.f32.xlu0 %v1048_v28  ;;  %v545_v48 = vld [vmem:[%s3702_s12 + $0x6c0] sm:$0xff]  ;;  %v1276_v34 = vsel %vm585_vm0, %v559_v17, 0.0 }
 0x187   : > { %v4415_v44 = vsel %vm1944_vm5, %v2438_v32, %v2434_v21  ;;  %v1077_v45 = vpop.xlane.xlu1 %1076  ;;  %v1074_v47 = vpop.xlane.xlu0 %1073  ;;  %v1234_v6 = vsel %vm585_vm0, %v545_v48, 0.0  ;;  %v2967_v42 = vrot.slane %v1857_v23, %v3860_v29  ;;  %v2971_v38 = vrot.slane %v1858_v26, %v3868_v35 }
 0x188   : > { %v2670_v54 = vrot.slane %v1797_v11, %v3876_v40  ;;  %v2675_v3 = vrot.slane %v1798_v43, %v3889_v57  ;;  %v1435_v55 = vpack.c.bf16 %v1077_v45, %v1074_v47  ;;  %v961_v47 = vsel %vm585_vm0, %v454_v31, 0.0 }
 0x189   : > { %v2972_v48 = vsel %vm1916_vm1, %v2971_v38, %v2967_v42 }
 0x18a   : > { %v2671_v62 = vsel %vm1937_vm4, %v2670_v54, %v4336_v20  ;;  %v1811_v1 = vunpack.c.l.b16 %v1435_v55  ;;  %v1812_v16 = vunpack.c.h.b16 %v1435_v55  ;;  %1094 = vadd.xlane.f32.xlu1 %v1093_v41  ;;  %1091 = vadd.xlane.f32.xlu0 %v1090_v52  ;;  %v560_v20 = vld [vmem:[%s3702_s12 + $0x738] sm:$0xff]  ;;  %v958_v41 = vsel %vm585_vm0, %v453_v37, 0.0 }
 0x18b   : > { %v4428_v2 = vsel %vm1944_vm5, %v2675_v3, %v2671_v62  ;;  %v1167_v56 = vpop.xlane.xlu1 %1166  ;;  %v1164_v4 = vpop.xlane.xlu0 %1163  ;;  %v1279_v32 = vsel %vm585_vm0, %v560_v20, 0.0  ;;  %v468_v55 = vld [vmem:[%s3702_s12 + $0x458] sm:$0xff] }
 0x18c   : > { %v2739_v7 = vrot.slane %v1811_v1, %v3865_v33  ;;  %v2744_v12 = vrot.slane %v1812_v16, %v3873_v39  ;;  %v4434_v15 = vpack.c.bf16 %v1167_v56, %v1164_v4  ;;  %v1003_v16 = vsel %vm585_vm0, %v468_v55, 0.0 }
 0x18d   : > { %v1000_v56 = vsel %vm585_vm0, %v467_v58, 0.0 }
 0x18e   : > { %v2740_v27 = vsel %vm1923_vm2, %v2739_v7, %v2735_v22  ;;  %1238 = vadd.xlane.f32.xlu1 %v1237_v5  ;;  %1235 = vadd.xlane.f32.xlu0 %v1234_v6  ;;  %v516_v5 = vld [vmem:[%s3702_s12 + $0x5d8] sm:$0xff]  ;;  %v515_v6 = vld [vmem:[%s3702_s12 + $0x5d0] sm:$0xff] }
 0x18f   : > { %v4443_v8 = vsel %vm1930_vm3, %v2744_v12, %v2740_v27  ;;  %v1221_v28 = vpop.xlane.xlu1 %1220  ;;  %v1218_v30 = vpop.xlane.xlu0 %1217  ;;  %v1147_v22 = vsel %vm585_vm0, %v516_v5, 0.0  ;;  %v1144_v23 = vsel %vm585_vm0, %v515_v6, 0.0  ;;  %v424_v6 = vld [vmem:[%s3702_s12 + $0x2f8] sm:$0xff] }
 0x190   : > { %v1459_v50 = vpack.c.bf16 %v1221_v28, %v1218_v30  ;;  %v530_v30 = vld [vmem:[%s3702_s12 + $0x648] sm:$0xff] }
 0x192   : > { %v1859_v21 = vunpack.c.l.b16 %v1459_v50  ;;  %v1860_v11 = vunpack.c.h.b16 %v1459_v50  ;;  %1280 = vadd.xlane.f32.xlu1 %v1279_v32  ;;  %1277 = vadd.xlane.f32.xlu0 %v1276_v34  ;;  %v529_v32 = vld [vmem:[%s3702_s12 + $0x640] sm:$0xff] }
 0x193   : > { %v1311_v43 = vpop.xlane.xlu1 %1310  ;;  %v1308_v45 = vpop.xlane.xlu0 %1307 }
 0x194   : > { %v2976_v52 = vrot.slane %v1859_v21, %v3865_v33  ;;  %v2981_v54 = vrot.slane %v1860_v11, %v3873_v39  ;;  %v4455_v3 = vpack.c.bf16 %v1311_v43, %v1308_v45  ;;  %v1189_v21 = vsel %vm585_vm0, %v530_v30, 0.0 }
 0x195   : > { %v1186_v11 = vsel %vm585_vm0, %v529_v32, 0.0 }
 0x196   : > { %v2977_v60 = vsel %vm1923_vm2, %v2976_v52, %v2972_v48  ;;  %962 = vadd.xlane.f32.xlu1 %v961_v47  ;;  %959 = vadd.xlane.f32.xlu0 %v958_v41  ;;  %v578_v41 = vld [vmem:[%s3702_s12 + $0x7c8] sm:$0xff]  ;;  %v1841_v52 = vunpack.c.l.b16 %v4434_v15 }
 0x197   : > { %v4462_v61 = vsel %vm1930_vm3, %v2981_v54, %v2977_v60  ;;  %v945_v62 = vpop.xlane.xlu1 %944  ;;  %v942_v1 = vpop.xlane.xlu0 %941  ;;  %v1842_v54 = vunpack.c.h.b16 %v4434_v15 }
 0x198   : > { %v1413_v4 = vpack.c.bf16 %v945_v62, %v942_v1 }
 0x19a   : > { %v1767_v7 = vunpack.c.l.b16 %v1413_v4  ;;  %v1768_v12 = vunpack.c.h.b16 %v1413_v4  ;;  %1004 = vadd.xlane.f32.xlu1 %v1003_v16  ;;  %1001 = vadd.xlane.f32.xlu0 %v1000_v56  ;;  %v1333_v16 = vsel %vm585_vm0, %v578_v41, 0.0 }
 0x19b   : > { %v987_v20 = vpop.xlane.xlu1 %986  ;;  %v984_v17 = vpop.xlane.xlu0 %983 }
 0x19c   : > { %v2522_v26 = vrot.slane %v1767_v7, %v3902_v9  ;;  %v2527_v27 = vrot.slane %v1768_v12, %v3905_v10  ;;  %v1420_v28 = vpack.c.bf16 %v987_v20, %v984_v17  ;;  %v2888_v7 = vrot.slane %v1841_v52, %v3860_v29 }
 0x19d   : > { %v2892_v12 = vrot.slane %v1842_v54, %v3868_v35  ;;  %v486_v54 = vld [vmem:[%s3702_s12 + $0x4e8] sm:$0xff] }
 0x19e   : > { %v2523_v34 = vsel %vm1951_vm6, %v2522_v26, %v4353_v59  ;;  %v1781_v50 = vunpack.c.l.b16 %v1420_v28  ;;  %v1782_v31 = vunpack.c.h.b16 %v1420_v28  ;;  %1148 = vadd.xlane.f32.xlu1 %v1147_v22  ;;  %1145 = vadd.xlane.f32.xlu0 %v1144_v23  ;;  %v577_v59 = vld [vmem:[%s3702_s12 + $0x7c0] sm:$0xff]  ;;  %v871_v28 = vsel %vm585_vm0, %v424_v6, 0.0 }
 0x19f   : > { %v4477_v37 = vsel %vm1958_vm7, %v2527_v27, %v2523_v34  ;;  %v1131_v42 = vpop.xlane.xlu1 %1130  ;;  %v1128_v38 = vpop.xlane.xlu0 %1127  ;;  %v1330_v56 = vsel %vm585_vm0, %v577_v59, 0.0 }
 0x1a0   : > { %v2591_v43 = vrot.slane %v1781_v50, %v3876_v40  ;;  %v2596_v45 = vrot.slane %v1782_v31, %v3889_v57  ;;  %v1444_v47 = vpack.c.bf16 %v1131_v42, %v1128_v38  ;;  %v437_v31 = vld [vmem:[%s3702_s12 + $0x360] sm:$0xff]  ;;  %v2893_v42 = vsel %vm1916_vm1, %v2892_v12, %v2888_v7  ;;  %v499_v7 = vld [vmem:[%s3702_s12 + $0x550] sm:$0xff] }
 0x1a1   : > { %v1889_v38 = vunpack.c.l.b16 %v4455_v3  ;;  %v910_v59 = vsel %vm585_vm0, %v437_v31, 0.0 }
 0x1a2   : > { %v2592_v55 = vsel %vm1937_vm4, %v2591_v43, %v4368_v13  ;;  %v1829_v58 = vunpack.c.l.b16 %v1444_v47  ;;  %v1830_v48 = vunpack.c.h.b16 %v1444_v47  ;;  %1190 = vadd.xlane.f32.xlu1 %v1189_v21  ;;  %1187 = vadd.xlane.f32.xlu0 %v1186_v11  ;;  %v423_v13 = vld [vmem:[%s3702_s12 + $0x2f0] sm:$0xff]  ;;  %v1890_v21 = vunpack.c.h.b16 %v4455_v3 }
 0x1a3   : > { %v4490_v60 = vsel %vm1944_vm5, %v2596_v45, %v2592_v55  ;;  %v1173_v62 = vpop.xlane.xlu1 %1172  ;;  %v1170_v1 = vpop.xlane.xlu0 %1169  ;;  %v868_v30 = vsel %vm585_vm0, %v423_v13, 0.0  ;;  %v485_v55 = vld [vmem:[%s3702_s12 + $0x4e0] sm:$0xff]  ;;  %v3125_v3 = vrot.slane %v1889_v38, %v3860_v29  ;;  %v500_v13 = vld [vmem:[%s3702_s12 + $0x558] sm:$0xff]  ;;  %v547_v38 = vld [vmem:[%s3702_s12 + $0x6d0] sm:$0xff] }
 0x1a4   : > { %v2828_v4 = vrot.slane %v1829_v58, %v3876_v40  ;;  %v2833_v15 = vrot.slane %v1830_v48, %v3889_v57  ;;  %v1451_v5 = vpack.c.bf16 %v1173_v62, %v1170_v1  ;;  %v3129_v58 = vrot.slane %v1890_v21, %v3868_v35 }
 0x1a6   : > { %v2829_v20 = vsel %vm1937_vm4, %v2828_v4, %v4387_v51  ;;  %v1843_v17 = vunpack.c.l.b16 %v1451_v5  ;;  %v1844_v22 = vunpack.c.h.b16 %v1451_v5  ;;  %1334 = vadd.xlane.f32.xlu1 %v1333_v16  ;;  %1331 = vadd.xlane.f32.xlu0 %v1330_v56  ;;  %v438_v51 = vld [vmem:[%s3702_s12 + $0x368] sm:$0xff]  ;;  %v1057_v56 = vsel %vm585_vm0, %v486_v54, 0.0 }
 0x1a7   : > { %v4503_v23 = vsel %vm1944_vm5, %v2833_v15, %v2829_v20  ;;  %v1263_v26 = vpop.xlane.xlu1 %1262  ;;  %v1260_v27 = vpop.xlane.xlu0 %1259  ;;  %v913_v41 = vsel %vm585_vm0, %v438_v51, 0.0  ;;  %v1054_v4 = vsel %vm585_vm0, %v485_v55, 0.0  ;;  %v3130_v12 = vsel %vm1916_vm1, %v3129_v58, %v3125_v3 }
 0x1a8   : > { %v2897_v32 = vrot.slane %v1843_v17, %v3865_v33  ;;  %v2902_v34 = vrot.slane %v1844_v22, %v3873_v39  ;;  %v4509_v50 = vpack.c.bf16 %v1263_v26, %v1260_v27  ;;  %v1240_v54 = vsel %vm585_vm0, %v547_v38, 0.0 }
 0x1aa   : > { %v2898_v11 = vsel %vm1923_vm2, %v2897_v32, %v2893_v42  ;;  %872 = vadd.xlane.f32.xlu1 %v871_v28  ;;  %869 = vadd.xlane.f32.xlu0 %v868_v30  ;;  %v1099_v30 = vsel %vm585_vm0, %v500_v13, 0.0  ;;  %v1096_v32 = vsel %vm585_vm0, %v499_v7, 0.0  ;;  %v548_v42 = vld [vmem:[%s3702_s12 + $0x6d8] sm:$0xff] }
 0x1ab   : > { %v4518_v43 = vsel %vm1930_vm3, %v2902_v34, %v2898_v11  ;;  %v1317_v45 = vpop.xlane.xlu1 %1316  ;;  %v1314_v47 = vpop.xlane.xlu0 %1313 }
 0x1ac   : > { %v1475_v52 = vpack.c.bf16 %v1317_v45, %v1314_v47 }
 0x1ae   : > { %v1891_v48 = vunpack.c.l.b16 %v1475_v52  ;;  %v1892_v62 = vunpack.c.h.b16 %v1475_v52  ;;  %914 = vadd.xlane.f32.xlu1 %v913_v41  ;;  %911 = vadd.xlane.f32.xlu0 %v910_v59  ;;  %v1243_v52 = vsel %vm585_vm0, %v548_v42, 0.0 }
 0x1af   : > { %v855_v1 = vpop.xlane.xlu1 %854  ;;  %v852_v16 = vpop.xlane.xlu0 %851 }
 0x1b0   : > { %v3134_v15 = vrot.slane %v1891_v48, %v3865_v33  ;;  %v3139_v5 = vrot.slane %v1892_v62, %v3873_v39  ;;  %v1398_v6 = vpack.c.bf16 %v855_v1, %v852_v16  ;;  %v561_v48 = vld [vmem:[%s3702_s12 + $0x740] sm:$0xff] }
 0x1b2   : > { %v3135_v20 = vsel %vm1923_vm2, %v3134_v15, %v3130_v12  ;;  %v1737_v17 = vunpack.c.l.b16 %v1398_v6  ;;  %v1738_v22 = vunpack.c.h.b16 %v1398_v6  ;;  %1058 = vadd.xlane.f32.xlu1 %v1057_v56  ;;  %1055 = vadd.xlane.f32.xlu0 %v1054_v4  ;;  %v1282_v6 = vsel %vm585_vm0, %v561_v48, 0.0 }
 0x1b3   : > { %v4535_v26 = vsel %vm1930_vm3, %v3139_v5, %v3135_v20  ;;  %v897_v27 = vpop.xlane.xlu1 %896  ;;  %v894_v28 = vpop.xlane.xlu0 %893  ;;  %v455_v20 = vld [vmem:[%s3702_s12 + $0x3f0] sm:$0xff] }
 0x1b4   : > { %v2374_v34 = vrot.slane %v1737_v17, %v3910_v14  ;;  %v2379_v51 = vrot.slane %v1738_v22, %v3917_v24  ;;  %v1405_v31 = vpack.c.bf16 %v897_v27, %v894_v28 }
 0x1b6   : > { %v2375_v21 = vsel %vm1965_vm8, %v2374_v34, %v4402_v19  ;;  %v1751_v11 = vunpack.c.l.b16 %v1405_v31  ;;  %v1752_v45 = vunpack.c.h.b16 %v1405_v31  ;;  %1100 = vadd.xlane.f32.xlu1 %v1099_v30  ;;  %1097 = vadd.xlane.f32.xlu0 %v1096_v32  ;;  %v562_v19 = vld [vmem:[%s3702_s12 + $0x748] sm:$0xff] }
 0x1b7   : > { %v4546_v47 = vsel %vm1972_vm9, %v2379_v51, %v2375_v21  ;;  %v1041_v41 = vpop.xlane.xlu1 %1040  ;;  %v1038_v59 = vpop.xlane.xlu0 %1037  ;;  %v1285_v5 = vsel %vm585_vm0, %v562_v19, 0.0  ;;  %v964_v51 = vsel %vm585_vm0, %v455_v20, 0.0  ;;  %v470_v21 = vld [vmem:[%s3702_s12 + $0x468] sm:$0xff] }
 0x1b8   : > { %v2443_v55 = vrot.slane %v1751_v11, %v3902_v9  ;;  %v2448_v3 = vrot.slane %v1752_v45, %v3905_v10  ;;  %v1429_v58 = vpack.c.bf16 %v1041_v41, %v1038_v59  ;;  %v1873_v11 = vunpack.c.l.b16 %v4509_v50 }
 0x1b9   : > { %v1874_v45 = vunpack.c.h.b16 %v4509_v50 }
 0x1ba   : > { %v2444_v62 = vsel %vm1951_vm6, %v2443_v55, %v4415_v44  ;;  %v1799_v1 = vunpack.c.l.b16 %v1429_v58  ;;  %v1800_v16 = vunpack.c.h.b16 %v1429_v58  ;;  %1244 = vadd.xlane.f32.xlu1 %v1243_v52  ;;  %1241 = vadd.xlane.f32.xlu0 %v1240_v54  ;;  %v456_v44 = vld [vmem:[%s3702_s12 + $0x3f8] sm:$0xff]  ;;  %v1009_v58 = vsel %vm585_vm0, %v470_v21, 0.0 }
 0x1bb   : > { %v4557_v56 = vsel %vm1958_vm7, %v2448_v3, %v2444_v62  ;;  %v1083_v4 = vpop.xlane.xlu1 %1082  ;;  %v1080_v15 = vpop.xlane.xlu0 %1079  ;;  %v967_v34 = vsel %vm585_vm0, %v456_v44, 0.0 }
 0x1bc   : > { %v2680_v13 = vrot.slane %v1799_v1, %v3902_v9  ;;  %v2685_v7 = vrot.slane %v1800_v16, %v3905_v10  ;;  %v1436_v12 = vpack.c.bf16 %v1083_v4, %v1080_v15  ;;  %v518_v1 = vld [vmem:[%s3702_s12 + $0x5e8] sm:$0xff]  ;;  %v3046_v16 = vrot.slane %v1873_v11, %v3860_v29  ;;  %v580_v11 = vld [vmem:[%s3702_s12 + $0x7d8] sm:$0xff] }
 0x1bd   : > { %v3050_v4 = vrot.slane %v1874_v45, %v3868_v35  ;;  %v1153_v44 = vsel %vm585_vm0, %v518_v1, 0.0  ;;  %v579_v45 = vld [vmem:[%s3702_s12 + $0x7d0] sm:$0xff] }
 0x1be   : > { %v2681_v17 = vsel %vm1951_vm6, %v2680_v13, %v4428_v2  ;;  %v1813_v22 = vunpack.c.l.b16 %v1436_v12  ;;  %v1814_v27 = vunpack.c.h.b16 %v1436_v12  ;;  %1286 = vadd.xlane.f32.xlu1 %v1285_v5  ;;  %1283 = vadd.xlane.f32.xlu0 %v1282_v6  ;;  %v469_v2 = vld [vmem:[%s3702_s12 + $0x460] sm:$0xff] }
 0x1bf   : > { %v4568_v28 = vsel %vm1958_vm7, %v2685_v7, %v2681_v17  ;;  %v1227_v30 = vpop.xlane.xlu1 %1226  ;;  %v1224_v32 = vpop.xlane.xlu0 %1223  ;;  %v1006_v19 = vsel %vm585_vm0, %v469_v2, 0.0 }
 0x1c0   : > { %v2749_v31 = vrot.slane %v1813_v22, %v3876_v40  ;;  %v2754_v42 = vrot.slane %v1814_v27, %v3889_v57  ;;  %v1460_v38 = vpack.c.bf16 %v1227_v30, %v1224_v32  ;;  %v532_v22 = vld [vmem:[%s3702_s12 + $0x658] sm:$0xff]  ;;  %v3051_v27 = vsel %vm1916_vm1, %v3050_v4, %v3046_v16 }
 0x1c1   : > { %vm5113_vm1 = vcmask 720512  }
 0x1c2   : > { %v2750_v41 = vsel %vm1937_vm4, %v2749_v31, %v4443_v8  ;;  %v1861_v59 = vunpack.c.l.b16 %v1460_v38  ;;  %v1862_v52 = vunpack.c.h.b16 %v1460_v38  ;;  %968 = vadd.xlane.f32.xlu1 %v967_v34  ;;  %965 = vadd.xlane.f32.xlu0 %v964_v51  ;;  %v517_v8 = vld [vmem:[%s3702_s12 + $0x5e0] sm:$0xff] }
 0x1c3   : > { %v4581_v54 = vsel %vm1944_vm5, %v2754_v42, %v2750_v41  ;;  %v1269_v55 = vpop.xlane.xlu1 %1268  ;;  %v1266_v3 = vpop.xlane.xlu0 %1265  ;;  %v1150_v20 = vsel %vm585_vm0, %v517_v8, 0.0  ;;  %v439_v8 = vld [vmem:[%s3702_s12 + $0x370] sm:$0xff] }
 0x1c4   : > { %v2986_v48 = vrot.slane %v1861_v59, %v3876_v40  ;;  %v2991_v50 = vrot.slane %v1862_v52, %v3889_v57  ;;  %v1467_v62 = vpack.c.bf16 %v1269_v55, %v1266_v3 }
 0x1c6   : > { %v2987_v15 = vsel %vm1937_vm4, %v2986_v48, %v4462_v61  ;;  %v1875_v5 = vunpack.c.l.b16 %v1467_v62  ;;  %v1876_v6 = vunpack.c.h.b16 %v1467_v62  ;;  %1010 = vadd.xlane.f32.xlu1 %v1009_v58  ;;  %1007 = vadd.xlane.f32.xlu0 %v1006_v19  ;;  %v531_v61 = vld [vmem:[%s3702_s12 + $0x650] sm:$0xff]  ;;  %v1339_v19 = vsel %vm585_vm0, %v580_v11, 0.0 }
 0x1c7   : > { %v4594_v13 = vsel %vm1944_vm5, %v2991_v50, %v2987_v15  ;;  %v951_v7 = vpop.xlane.xlu1 %950  ;;  %v948_v12 = vpop.xlane.xlu0 %947  ;;  %v1192_v42 = vsel %vm585_vm0, %v531_v61, 0.0  ;;  %v1336_v48 = vsel %vm585_vm0, %v579_v45, 0.0 }
 0x1c8   : > { %v3055_v29 = vrot.slane %v1875_v5, %v3865_v33  ;;  %v3060_v35 = vrot.slane %v1876_v6, %v3873_v39  ;;  %v1414_v17 = vpack.c.bf16 %v951_v7, %v948_v12  ;;  %v1195_v39 = vsel %vm585_vm0, %v532_v22, 0.0 }
 0x1ca   : > { %v3056_v30 = vsel %vm1923_vm2, %v3055_v29, %v3051_v27  ;;  %v1769_v32 = vunpack.c.l.b16 %v1414_v17  ;;  %v1770_v34 = vunpack.c.h.b16 %v1414_v17  ;;  %1154 = vadd.xlane.f32.xlu1 %v1153_v44  ;;  %1151 = vadd.xlane.f32.xlu0 %v1150_v20  ;;  %v916_v44 = vsel %vm585_vm0, %v439_v8, 0.0  ;;  %v487_v17 = vld [vmem:[%s3702_s12 + $0x4f0] sm:$0xff]  ;;  %vm5114_vm2 = vmmov %vm5113_vm1 }
 0x1cb   : > { %v4605_v51 = vsel %vm1930_vm3, %v3060_v35, %v3056_v30  ;;  %v993_v31 = vpop.xlane.xlu1 %992  ;;  %v990_v33 = vpop.xlane.xlu0 %989  ;;  %vm5115_vm3 = vmmov %vm5112_vm12  ;;  %vm3373_vm12 = vcmask 64512  }
 0x1cc   : > { %v2532_v38 = vrot.slane %v1769_v32, %v3910_v14  ;;  %v2537_v21 = vrot.slane %v1770_v34, %v3917_v24  ;;  %v1421_v2 = vpack.c.bf16 %v993_v31, %v990_v33  ;;  %v1060_v33 = vsel %vm585_vm0, %v487_v17, 0.0 }
 0x1ce   : > { %v2533_v41 = vsel %vm1965_vm8, %v2532_v38, %v4477_v37  ;;  %v1783_v59 = vunpack.c.l.b16 %v1421_v2  ;;  %v1784_v52 = vunpack.c.h.b16 %v1421_v2  ;;  %1196 = vadd.xlane.f32.xlu1 %v1195_v39  ;;  %1193 = vadd.xlane.f32.xlu0 %v1192_v42  ;;  %v440_v37 = vld [vmem:[%s3702_s12 + $0x378] sm:$0xff]  ;;  %v502_v42 = vld [vmem:[%s3702_s12 + $0x568] sm:$0xff]  ;;  %v501_v38 = vld [vmem:[%s3702_s12 + $0x560] sm:$0xff] }
 0x1cf   : > { %v4616_v55 = vsel %vm1972_vm9, %v2537_v21, %v2533_v41  ;;  %v1137_v3 = vpop.xlane.xlu1 %1136  ;;  %v1134_v58 = vpop.xlane.xlu0 %1133  ;;  %v919_v12 = vsel %vm585_vm0, %v440_v37, 0.0  ;;  %v1105_v41 = vsel %vm585_vm0, %v502_v42, 0.0 }
 0x1d0   : > { %v2601_v50 = vrot.slane %v1783_v59, %v3902_v9  ;;  %v2606_v62 = vrot.slane %v1784_v52, %v3905_v10  ;;  %v1445_v1 = vpack.c.bf16 %v1137_v3, %v1134_v58  ;;  %v1102_v59 = vsel %vm585_vm0, %v501_v38, 0.0  ;;  %v550_v3 = vld [vmem:[%s3702_s12 + $0x6e8] sm:$0xff]  ;;  %v549_v58 = vld [vmem:[%s3702_s12 + $0x6e0] sm:$0xff] }
 0x1d2   : > { %v2602_v16 = vsel %vm1951_vm6, %v2601_v50, %v4490_v60  ;;  %v1831_v4 = vunpack.c.l.b16 %v1445_v1  ;;  %v1832_v15 = vunpack.c.h.b16 %v1445_v1  ;;  %1340 = vadd.xlane.f32.xlu1 %v1339_v19  ;;  %1337 = vadd.xlane.f32.xlu0 %v1336_v48  ;;  %v488_v60 = vld [vmem:[%s3702_s12 + $0x4f8] sm:$0xff]  ;;  %v1246_v1 = vsel %vm585_vm0, %v549_v58, 0.0 }
 0x1d3   : > { %v4627_v5 = vsel %vm1958_vm7, %v2606_v62, %v2602_v16  ;;  %v1179_v6 = vpop.xlane.xlu1 %1178  ;;  %v1176_v7 = vpop.xlane.xlu0 %1175  ;;  %v1063_v31 = vsel %vm585_vm0, %v488_v60, 0.0  ;;  %v1249_v62 = vsel %vm585_vm0, %v550_v3, 0.0 }
 0x1d4   : > { %v2838_v20 = vrot.slane %v1831_v4, %v3902_v9  ;;  %v2843_v29 = vrot.slane %v1832_v15, %v3905_v10  ;;  %v1452_v35 = vpack.c.bf16 %v1179_v6, %v1176_v7  ;;  %v564_v4 = vld [vmem:[%s3702_s12 + $0x758] sm:$0xff]  ;;  %v563_v15 = vld [vmem:[%s3702_s12 + $0x750] sm:$0xff] }
 0x1d5   : > { %v1288_v60 = vsel %vm585_vm0, %v563_v15, 0.0 }
 0x1d6   : > { %v2839_v22 = vsel %vm1951_vm6, %v2838_v20, %v4503_v23  ;;  %v1845_v61 = vunpack.c.l.b16 %v1452_v35  ;;  %v1846_v27 = vunpack.c.h.b16 %v1452_v35  ;;  %920 = vadd.xlane.f32.xlu1 %v919_v12  ;;  %917 = vadd.xlane.f32.xlu0 %v916_v44  ;;  %v1291_v35 = vsel %vm585_vm0, %v564_v4, 0.0  ;;  %v533_v4 = vld [vmem:[%s3702_s12 + $0x660] sm:$0xff] }
 0x1d7   : > { %v4638_v30 = vsel %vm1958_vm7, %v2843_v29, %v2839_v22  ;;  %v4640_v32 = vpop.xlane.xlu1 %1322  ;;  %v4642_v34 = vpop.xlane.xlu0 %1319 }
 0x1d8   : > { %v2907_v39 = vrot.slane %v1845_v61, %v3876_v40  ;;  %v2912_v23 = vrot.slane %v1846_v27, %v3889_v57  ;;  %v471_v27 = vld [vmem:[%s3702_s12 + $0x470] sm:$0xff] }
 0x1da   : > { %v2908_v21 = vsel %vm1937_vm4, %v2907_v39, %v4518_v43  ;;  %1064 = vadd.xlane.f32.xlu1 %v1063_v31  ;;  %1061 = vadd.xlane.f32.xlu0 %v1060_v33 }
 0x1db   : > { %v4653_v2 = vsel %vm1944_vm5, %v2912_v23, %v2908_v21  ;;  %v861_v11 = vpop.xlane.xlu1 %860  ;;  %v858_v45 = vpop.xlane.xlu0 %857 }
 0x1dc   : > { %v1399_v52 = vpack.c.bf16 %v861_v11, %v858_v45  ;;  %v1012_v11 = vsel %vm585_vm0, %v471_v27, 0.0 }
 0x1de   : > { %v1739_v19 = vunpack.c.l.b16 %v1399_v52  ;;  %v1740_v48 = vunpack.c.h.b16 %v1399_v52  ;;  %1106 = vadd.xlane.f32.xlu1 %v1105_v41  ;;  %1103 = vadd.xlane.f32.xlu0 %v1102_v59  ;;  %v519_v52 = vld [vmem:[%s3702_s12 + $0x5f0] sm:$0xff] }
 0x1df   : > { %v903_v43 = vpop.xlane.xlu1 %902  ;;  %v900_v50 = vpop.xlane.xlu0 %899 }
 0x1e0   : > { %v2384_v37 = vrot.slane %v1739_v19, %v3931_v46  ;;  %v2389_v8 = vrot.slane %v1740_v48, %v3939_v53  ;;  %v1406_v16 = vpack.c.bf16 %v903_v43, %v900_v50 }
 0x1e2   : > { %v2385_v6 = vsel %vm5113_vm1, %v2384_v37, %v4546_v47  ;;  %v1753_v7 = vunpack.c.l.b16 %v1406_v16  ;;  %v1754_v12 = vunpack.c.h.b16 %v1406_v16  ;;  %1250 = vadd.xlane.f32.xlu1 %v1249_v62  ;;  %1247 = vadd.xlane.f32.xlu0 %v1246_v1  ;;  %v472_v47 = vld [vmem:[%s3702_s12 + $0x478] sm:$0xff]  ;;  %v1156_v1 = vsel %vm585_vm0, %v519_v52, 0.0 }
 0x1e3   : > { %v4668_v44 = vsel %vm1986_vm11, %v2389_v8, %v2385_v6  ;;  %v1047_v20 = vpop.xlane.xlu1 %1046  ;;  %v1044_v29 = vpop.xlane.xlu0 %1043  ;;  %v1015_v21 = vsel %vm585_vm0, %v472_v47, 0.0  ;;  %v581_v47 = vld [vmem:[%s3702_s12 + $0x7e0] sm:$0xff] }
 0x1e4   : > { %v2453_v17 = vrot.slane %v1753_v7, %v3910_v14  ;;  %v2458_v22 = vrot.slane %v1754_v12, %v3917_v24  ;;  %v1430_v61 = vpack.c.bf16 %v1047_v20, %v1044_v29 }
 0x1e6   : > { %v2454_v31 = vsel %vm1965_vm8, %v2453_v17, %v4557_v56  ;;  %v1801_v33 = vunpack.c.l.b16 %v1430_v61  ;;  %v1802_v39 = vunpack.c.h.b16 %v1430_v61  ;;  %1292 = vadd.xlane.f32.xlu1 %v1291_v35  ;;  %1289 = vadd.xlane.f32.xlu0 %v1288_v60  ;;  %v520_v56 = vld [vmem:[%s3702_s12 + $0x5f8] sm:$0xff]  ;;  %v1198_v60 = vsel %vm585_vm0, %v533_v4, 0.0 }
 0x1e7   : > { %v4679_v23 = vsel %vm1972_vm9, %v2458_v22, %v2454_v31  ;;  %v1089_v42 = vpop.xlane.xlu1 %1088  ;;  %v1086_v38 = vpop.xlane.xlu0 %1085  ;;  %v1159_v62 = vsel %vm585_vm0, %v520_v56, 0.0  ;;  %v503_v56 = vld [vmem:[%s3702_s12 + $0x570] sm:$0xff]  ;;  %v1476_v4 = vpack.c.bf16 %v4640_v32, %v4642_v34 }
 0x1e8   : > { %v2690_v45 = vrot.slane %v1801_v33, %v3910_v14  ;;  %v2695_v41 = vrot.slane %v1802_v39, %v3917_v24  ;;  %v1437_v59 = vpack.c.bf16 %v1089_v42, %v1086_v38 }
 0x1ea   : > { %v2691_v3 = vsel %vm1965_vm8, %v2690_v45, %v4568_v28  ;;  %v1815_v58 = vunpack.c.l.b16 %v1437_v59  ;;  %v1816_v19 = vunpack.c.h.b16 %v1437_v59  ;;  %1016 = vadd.xlane.f32.xlu1 %v1015_v21  ;;  %1013 = vadd.xlane.f32.xlu0 %v1012_v11  ;;  %v534_v28 = vld [vmem:[%s3702_s12 + $0x668] sm:$0xff]  ;;  %v1342_v11 = vsel %vm585_vm0, %v581_v47, 0.0 }
 0x1eb   : > { %v4690_v48 = vsel %vm1972_vm9, %v2695_v41, %v2691_v3  ;;  %v1233_v43 = vpop.xlane.xlu1 %1232  ;;  %v1230_v50 = vpop.xlane.xlu0 %1229  ;;  %v1201_v35 = vsel %vm585_vm0, %v534_v28, 0.0  ;;  %v552_v28 = vld [vmem:[%s3702_s12 + $0x6f8] sm:$0xff] }
 0x1ec   : > { %v2759_v37 = vrot.slane %v1815_v58, %v3902_v9  ;;  %v2764_v8 = vrot.slane %v1816_v19, %v3905_v10  ;;  %v1461_v16 = vpack.c.bf16 %v1233_v43, %v1230_v50 }
 0x1ee   : > { %v2760_v15 = vsel %vm1951_vm6, %v2759_v37, %v4581_v54  ;;  %v1863_v6 = vunpack.c.l.b16 %v1461_v16  ;;  %v1864_v7 = vunpack.c.h.b16 %v1461_v16  ;;  %1160 = vadd.xlane.f32.xlu1 %v1159_v62  ;;  %1157 = vadd.xlane.f32.xlu0 %v1156_v1  ;;  %v582_v54 = vld [vmem:[%s3702_s12 + $0x7e8] sm:$0xff]  ;;  %v1108_v1 = vsel %vm585_vm0, %v503_v56, 0.0 }
 0x1ef   : > { %v4701_v12 = vsel %vm1958_vm7, %v2764_v8, %v2760_v15  ;;  %v1275_v20 = vpop.xlane.xlu1 %1274  ;;  %v1272_v29 = vpop.xlane.xlu0 %1271  ;;  %v1345_v21 = vsel %vm585_vm0, %v582_v54, 0.0  ;;  %v1893_v54 = vunpack.c.l.b16 %v1476_v4  ;;  %v1894_v56 = vunpack.c.h.b16 %v1476_v4  ;;  %v584_v4 = vld [vmem:[%s3702_s12 + $0x7f8] sm:$0xff] }
 0x1f0   : > { %v2996_v17 = vrot.slane %v1863_v6, %v3902_v9  ;;  %v3001_v22 = vrot.slane %v1864_v7, %v3905_v10  ;;  %v1468_v61 = vpack.c.bf16 %v1275_v20, %v1272_v29 }
 0x1f2   : > { %v2997_v27 = vsel %vm1951_vm6, %v2996_v17, %v4594_v13  ;;  %v1877_v31 = vunpack.c.l.b16 %v1468_v61  ;;  %v1878_v33 = vunpack.c.h.b16 %v1468_v61  ;;  %1202 = vadd.xlane.f32.xlu1 %v1201_v35  ;;  %1199 = vadd.xlane.f32.xlu0 %v1198_v60  ;;  %v504_v13 = vld [vmem:[%s3702_s12 + $0x578] sm:$0xff]  ;;  %v1255_v60 = vsel %vm585_vm0, %v552_v28, 0.0  ;;  %v566_v61 = vld [vmem:[%s3702_s12 + $0x768] sm:$0xff] }
 0x1f3   : > { %v4712_v39 = vsel %vm1958_vm7, %v3001_v22, %v2997_v27  ;;  %v957_v42 = vpop.xlane.xlu1 %956  ;;  %v954_v38 = vpop.xlane.xlu0 %953  ;;  %v1111_v62 = vsel %vm585_vm0, %v504_v13, 0.0  ;;  %v536_v13 = vld [vmem:[%s3702_s12 + $0x678] sm:$0xff] }
 0x1f4   : > { %v3065_v45 = vrot.slane %v1877_v31, %v3876_v40  ;;  %v3070_v41 = vrot.slane %v1878_v33, %v3889_v57  ;;  %v1415_v59 = vpack.c.bf16 %v957_v42, %v954_v38 }
 0x1f6   : > { %v3066_v52 = vsel %vm1937_vm4, %v3065_v45, %v4605_v51  ;;  %v1771_v3 = vunpack.c.l.b16 %v1415_v59  ;;  %v1772_v58 = vunpack.c.h.b16 %v1415_v59  ;;  %1346 = vadd.xlane.f32.xlu1 %v1345_v21  ;;  %1343 = vadd.xlane.f32.xlu0 %v1342_v11  ;;  %v551_v51 = vld [vmem:[%s3702_s12 + $0x6f0] sm:$0xff]  ;;  %v1297_v21 = vsel %vm585_vm0, %v566_v61, 0.0 }
 0x1f7   : > { %v4723_v19 = vsel %vm1944_vm5, %v3070_v41, %v3066_v52  ;;  %v999_v43 = vpop.xlane.xlu1 %998  ;;  %v996_v50 = vpop.xlane.xlu0 %995  ;;  %v1252_v17 = vsel %vm585_vm0, %v551_v51, 0.0  ;;  %v3144_v52 = vrot.slane %v1893_v54, %v3876_v40  ;;  %v1207_v40 = vsel %vm585_vm0, %v536_v13, 0.0 }
 0x1f8   : > { %v2542_v37 = vrot.slane %v1771_v3, %v3931_v46  ;;  %v2547_v8 = vrot.slane %v1772_v58, %v3939_v53  ;;  %v1422_v16 = vpack.c.bf16 %v999_v43, %v996_v50  ;;  %v3613_v50 = vld [vmem:[%s5101_s2 + $0x78] sm:$0xff]  }
 0x1f9   : > { %3573 = vmatprep.subr.bf16.mxu0 %v3613_v50 }
 0x1fa   : > { %v2543_v15 = vsel %vm5114_vm2, %v2542_v37, %v4616_v55  ;;  %v1785_v6 = vunpack.c.l.b16 %v1422_v16  ;;  %v1786_v7 = vunpack.c.h.b16 %v1422_v16  ;;  %1112 = vadd.xlane.f32.xlu1 %v1111_v62  ;;  %1109 = vadd.xlane.f32.xlu0 %v1108_v1  ;;  %v565_v55 = vld [vmem:[%s3702_s12 + $0x760] sm:$0xff]  ;;  %vm5119_vm2 = vmmov %vm5113_vm1 }
 0x1fb   : > { %v4736_v20 = vsel %vm1986_vm11, %v2547_v8, %v2543_v15  ;;  %v1143_v29 = vpop.xlane.xlu1 %1142  ;;  %v1140_v35 = vpop.xlane.xlu0 %1139  ;;  %v1294_v11 = vsel %vm585_vm0, %v565_v55, 0.0  ;;  %v583_v15 = vld [vmem:[%s3702_s12 + $0x7f0] sm:$0xff] }
 0x1fc   : > { %v2611_v22 = vrot.slane %v1785_v6, %v3910_v14  ;;  %v2616_v32 = vrot.slane %v1786_v7, %v3917_v24  ;;  %v1446_v34 = vpack.c.bf16 %v1143_v29, %v1140_v35  ;;  %v3149_v6 = vrot.slane %v1894_v56, %v3889_v57  ;;  %v3618_v56 = vld [vmem:[%s5101_s2 + $0x28] sm:$0xff]  }
 0x1fd   : > { %v3145_v7 = vsel %vm1937_vm4, %v3144_v52, %v4535_v26  ;;  %v1351_v26 = vsel %vm585_vm0, %v584_v4, 0.0  ;;  %vm5116_vm4 = vmmov %vm5113_vm1 }
 0x1fe   : > { %v2612_v47 = vsel %vm1965_vm8, %v2611_v22, %v4627_v5  ;;  %v1833_v27 = vunpack.c.l.b16 %v1446_v34  ;;  %v1834_v31 = vunpack.c.h.b16 %v1446_v34  ;;  %1256 = vadd.xlane.f32.xlu1 %v1255_v60  ;;  %1253 = vadd.xlane.f32.xlu0 %v1252_v17  ;;  %v535_v5 = vld [vmem:[%s3702_s12 + $0x670] sm:$0xff]  ;;  %v1348_v34 = vsel %vm585_vm0, %v583_v15, 0.0 }
 0x1ff   : > { %v4747_v33 = vsel %vm1972_vm9, %v2616_v32, %v2612_v47  ;;  %v1185_v42 = vpop.xlane.xlu1 %1184  ;;  %v1182_v38 = vpop.xlane.xlu0 %1181  ;;  %v1204_v8 = vsel %vm585_vm0, %v535_v5, 0.0  ;;  %v3615_v17 = vld [vmem:[%s5101_s2 + $0x70] sm:$0xff]   ;;  %v568_v47 = vld [vmem:[%s3702_s12 + $0x778] sm:$0xff] }
 0x200   : > { %v2848_v45 = vrot.slane %v1833_v27, %v3910_v14  ;;  %v2853_v41 = vrot.slane %v1834_v31, %v3917_v24  ;;  %v1453_v59 = vpack.c.bf16 %v1185_v42, %v1182_v38  ;;  %v567_v27 = vld [vmem:[%s3702_s12 + $0x770] sm:$0xff]  ;;  %v3150_v31 = vsel %vm1944_vm5, %v3149_v6, %v3145_v7  ;;  %v3621_v7 = vld [vmem:[%s5101_s2 + $0x58] sm:$0xff]   ;;  %vm5117_vm5 = vmmov %vm5113_vm1 }
 0x201   : > { %v1303_v13 = vsel %vm585_vm0, %v568_v47, 0.0  ;;  %v1300_v5 = vsel %vm585_vm0, %v567_v27, 0.0  ;;  %v3624_v27 = vld [vmem:[%s5101_s2 + $0x10] sm:$0xff]  }
 0x202   : > { %v2849_v3 = vsel %vm1965_vm8, %v2848_v45, %v4638_v30  ;;  %v1847_v58 = vunpack.c.l.b16 %v1453_v59  ;;  %v1848_v43 = vunpack.c.h.b16 %v1453_v59  ;;  %1298 = vadd.xlane.f32.xlu1 %v1297_v21  ;;  %1295 = vadd.xlane.f32.xlu0 %v1294_v11  ;;  %v3614_v30 = vld [vmem:[%s5101_s2 + $0x38] sm:$0xff]   ;;  %v3617_v11 = vld [vmem:[%s5101_s2 + $0x68] sm:$0xff]  }
 0x203   : > { %v4762_v62 = vsel %vm1972_vm9, %v2853_v41, %v2849_v3  ;;  %v1329_v1 = vpop.xlane.xlu1 %1328  ;;  %v1326_v37 = vpop.xlane.xlu0 %1325  ;;  %3574 = vmatpush3.bf16.msra.mxu0 %v3614_v30 }
 0x204   : > { %v2917_v16 = vrot.slane %v1847_v58, %v3902_v9  ;;  %v2922_v28 = vrot.slane %v1848_v43, %v3905_v10  ;;  %v1477_v51 = vpack.c.bf16 %v1329_v1, %v1326_v37  ;;  %3575 = vmatprep.subr.bf16.mxu0 %v3615_v17  ;;  %v3619_v37 = vld [vmem:[%s5101_s2 + $0x60] sm:$0xff]   ;;  %v3622_v17 = vld [vmem:[%s5101_s2 + $0x18] sm:$0xff]  }
 0x206   : > { %v2918_v29 = vsel %vm1951_vm6, %v2917_v16, %v4653_v2  ;;  %v1895_v35 = vunpack.c.l.b16 %v1477_v51  ;;  %v1896_v60 = vunpack.c.h.b16 %v1477_v51  ;;  %1208 = vadd.xlane.f32.xlu1 %v1207_v40  ;;  %1205 = vadd.xlane.f32.xlu0 %v1204_v8  ;;  %v3616_v2 = vld [vmem:[%s5101_s2 + $0x30] sm:$0xff]   ;;  %v3620_v16 = vld [vmem:[%s5101_s2 + $0x20] sm:$0xff]  }
 0x207   : > { %v4782_v22 = vsel %vm1958_vm7, %v2922_v28, %v2918_v29  ;;  %v867_v57 = vpop.xlane.xlu1 %866  ;;  %v864_v32 = vpop.xlane.xlu0 %863  ;;  %3576 = vmatpush3.bf16.msra.mxu0 %v3616_v2 }
 0x208   : > { %v3154_v61 = vrot.slane %v1895_v35, %v3902_v9  ;;  %v3159_v55 = vrot.slane %v1896_v60, %v3905_v10  ;;  %v1400_v54 = vpack.c.bf16 %v867_v57, %v864_v32  ;;  %3577 = vmatprep.subr.bf16.mxu0 %v3617_v11 }
 0x20a   : > { %v3155_v42 = vsel %vm1951_vm6, %v3154_v61, %v3150_v31  ;;  %v1741_v38 = vunpack.c.l.b16 %v1400_v54  ;;  %v1742_v21 = vunpack.c.h.b16 %v1400_v54  ;;  %1352 = vadd.xlane.f32.xlu1 %v1351_v26  ;;  %1349 = vadd.xlane.f32.xlu0 %v1348_v34  ;;  %v3623_v61 = vld [vmem:[%s5101_s2 + $0x50] sm:$0xff]  }
 0x20b   : > { %v4799_v45 = vsel %vm1958_vm7, %v3159_v55, %v3155_v42  ;;  %v909_v41 = vpop.xlane.xlu1 %908  ;;  %v906_v59 = vpop.xlane.xlu0 %905  ;;  %3578 = vmatpush3.bf16.msra.mxu0 %v3618_v56  ;;  %v3626_v56 = vld [vmem:[%s5101_s2 + $0x8] sm:$0xff]  }
 0x20c   : > { %v2394_v52 = vrot.slane %v1741_v38, %v3946_v63  ;;  %v2399_v3 = vrot.slane %v1742_v21, %v3949_v0  ;;  %v1407_v58 = vpack.c.bf16 %v909_v41, %v906_v59  ;;  %3579 = vmatprep.subr.bf16.mxu0 %v3619_v37  ;;  %v3625_v41 = vld [vmem:[%s5101_s2 + $0x48] sm:$0xff]  }
 0x20e   : > { %v2395_v43 = vsel %vm5115_vm3, %v2394_v52, %v4668_v44  ;;  %v1755_v50 = vunpack.c.l.b16 %v1407_v58  ;;  %v1756_v1 = vunpack.c.h.b16 %v1407_v58  ;;  %1304 = vadd.xlane.f32.xlu1 %v1303_v13  ;;  %1301 = vadd.xlane.f32.xlu0 %v1300_v5  ;;  %v3627_v58 = vld [vmem:[%s5101_s2 + $0x40] sm:$0xff]  }
 0x20f   : > { %v4814_v40 = vsel %vm2000_vm13, %v2399_v3, %v2395_v43  ;;  %v1053_v8 = vpop.xlane.xlu1 %1052  ;;  %v1050_v30 = vpop.xlane.xlu0 %1049  ;;  %3580 = vmatpush3.bf16.msra.mxu0 %v3620_v16  ;;  %v3628_v16 = vld [vmem:[%s5101_s2] sm:$0xff]  }
 0x210   : > { %v2463_v28 = vrot.slane %v1755_v50, %v3931_v46  ;;  %v2468_v44 = vrot.slane %v1756_v1, %v3939_v53  ;;  %v1431_v51 = vpack.c.bf16 %v1053_v8, %v1050_v30  ;;  %3581 = vmatprep.subr.bf16.mxu0 %v3621_v7 }
 0x212   : > { %v2464_v4 = vsel %vm5116_vm4, %v2463_v28, %v4679_v23  ;;  %v1803_v15 = vunpack.c.l.b16 %v1431_v51  ;;  %v1804_v6 = vunpack.c.h.b16 %v1431_v51  ;;  %vm5121_vm4 = vmmov %vm5113_vm1 }
 0x213   : > { %v4827_v29 = vsel %vm1986_vm11, %v2468_v44, %v2464_v4  ;;  %v1095_v35 = vpop.xlane.xlu1 %1094  ;;  %v1092_v60 = vpop.xlane.xlu0 %1091  ;;  %3582 = vmatpush3.bf16.msra.mxu0 %v3622_v17 }
 0x214   : > { %v2700_v57 = vrot.slane %v1803_v15, %v3931_v46  ;;  %v2705_v32 = vrot.slane %v1804_v6, %v3939_v53  ;;  %v1438_v23 = vpack.c.bf16 %v1095_v35, %v1092_v60  ;;  %3583 = vmatprep.subr.bf16.mxu0 %v3623_v61  ;;  %v3363_v60 = vld [vmem:[%s5103_s4] sm:$0xff] }
 0x216   : > { %v2701_v26 = vsel %vm5117_vm5, %v2700_v57, %v4690_v48  ;;  %v1817_v34 = vunpack.c.l.b16 %v1438_v23  ;;  %v1818_v2 = vunpack.c.h.b16 %v1438_v23  ;;  %v3637_v57 = vmov 0.0   ;;  %vm5122_vm5 = vmmov %vm5113_vm1 }
 0x217   : > { %v4840_v55 = vsel %vm1986_vm11, %v2705_v32, %v2701_v26  ;;  %v1239_v54 = vpop.xlane.xlu1 %1238  ;;  %v1236_v47 = vpop.xlane.xlu0 %1235  ;;  %3584 = vmatpush3.bf16.msra.mxu0 %v3624_v27  ;;  %3597 = vmatprep.subr.mxu1 %v3637_v57 }
 0x218   : > { %v2769_v31 = vrot.slane %v1817_v34, %v3910_v14  ;;  %v2774_v42 = vrot.slane %v1818_v2, %v3917_v24  ;;  %v1462_v48 = vpack.c.bf16 %v1239_v54, %v1236_v47  ;;  %3585 = vmatprep.subr.bf16.mxu0 %v3625_v41  ;;  %3598 = vmatpush3.msra.mxu1 %v3363_v60 }
 0x21a   : > { %v2770_v38 = vsel %vm1965_vm8, %v2769_v31, %v4701_v12  ;;  %v1865_v21 = vunpack.c.l.b16 %v1462_v48  ;;  %v1866_v11 = vunpack.c.h.b16 %v1462_v48 }
 0x21b   : > { %v4853_v59 = vsel %vm1972_vm9, %v2774_v42, %v2770_v38  ;;  %v1281_v13 = vpop.xlane.xlu1 %1280  ;;  %v1278_v5 = vpop.xlane.xlu0 %1277  ;;  %3586 = vmatpush3.bf16.msra.mxu0 %v3626_v56 }
 0x21c   : > { %v3006_v52 = vrot.slane %v1865_v21, %v3910_v14  ;;  %v3011_v3 = vrot.slane %v1866_v11, %v3917_v24  ;;  %v1469_v12 = vpack.c.bf16 %v1281_v13, %v1278_v5  ;;  %3587 = vmatprep.subr.bf16.mxu0 %v3627_v58 }
 0x21e   : > { %v3007_v43 = vsel %vm1965_vm8, %v3006_v52, %v4712_v39  ;;  %v1879_v50 = vunpack.c.l.b16 %v1469_v12  ;;  %v1880_v1 = vunpack.c.h.b16 %v1469_v12 }
 0x21f   : > { %v4866_v37 = vsel %vm1972_vm9, %v3011_v3, %v3007_v43  ;;  %v963_v8 = vpop.xlane.xlu1 %962  ;;  %v960_v30 = vpop.xlane.xlu0 %959  ;;  %3588 = vmatpush3.bf16.msra.mxu0 %v3628_v16 }
 0x220   : > { %v3075_v28 = vrot.slane %v1879_v50, %v3902_v9  ;;  %v3080_v44 = vrot.slane %v1880_v1, %v3905_v10  ;;  %v1416_v51 = vpack.c.bf16 %v963_v8, %v960_v30 }
 0x222   : > { %v3076_v39 = vsel %vm1951_vm6, %v3075_v28, %v4723_v19  ;;  %v1773_v4 = vunpack.c.l.b16 %v1416_v51  ;;  %v1774_v15 = vunpack.c.h.b16 %v1416_v51  ;;  %vm3638_vm6 = vmmov 0   ;;  %v4887_v19 = vld [vmem:[%s5105_s6] ss:$0 sm:$0xff] }
 0x223   : > { %v4876_v6 = vsel %vm1958_vm7, %v3080_v44, %v3076_v39  ;;  %v1005_v7 = vpop.xlane.xlu1 %1004  ;;  %v1002_v35 = vpop.xlane.xlu0 %1001  ;;  %3599 = vmatprep.mubr.msk.f32.mxu1 %vm3638_vm6, %v3637_v57  ;;  %vm5118_vm7 = vmmov %vm5115_vm3  ;;  %vm3205_vm6 = vcmask 1043459  }
 0x224   : > { %v2552_v9 = vrot.slane %v1773_v4, %v3946_v63  ;;  %v2557_v10 = vrot.slane %v1774_v15, %v3949_v0  ;;  %v1423_v17 = vpack.c.bf16 %v1005_v7, %v1002_v35  ;;  %3457 = vrot.lane.b32.xlu0 %v4887_v19, %s3639_s28 }
 0x226   : > { %v2553_v32 = vsel %vm5118_vm7, %v2552_v9, %v4736_v20  ;;  %v1787_v23 = vunpack.c.l.b16 %v1423_v17  ;;  %v1788_v26 = vunpack.c.h.b16 %v1423_v17  ;;  %v3362_v20 = vld [vmem:[%s323_s11] sm:$0xff]  ;;  %vm5124_vm7 = vmmov %vm5115_vm3 }
 0x227   : > { %v4896_v34 = vsel %vm2000_vm13, %v2557_v10, %v2553_v32  ;;  %v1149_v2 = vpop.xlane.xlu1 %1148  ;;  %v1146_v61 = vpop.xlane.xlu0 %1145  ;;  %3600 = vmatmul.mubr.msk.f32.vlgmr.msra.gmra.mxu1 %vm3373_vm12, %v3362_v20  ;;  %vm3209_vm12 = vcmask 1045509  }
 0x228   : > { %v2621_v54 = vrot.slane %v1787_v23, %v3931_v46  ;;  %v2626_v47 = vrot.slane %v1788_v26, %v3939_v53  ;;  %v1447_v27 = vpack.c.bf16 %v1149_v2, %v1146_v61 }
 0x22a   : > { %v2622_v31 = vsel %vm5113_vm1, %v2621_v54, %v4747_v33  ;;  %v1835_v42 = vunpack.c.l.b16 %v1447_v27  ;;  %v1836_v48 = vunpack.c.h.b16 %v1447_v27  ;;  %vm5125_vm1 = vmmov %vm5115_vm3 }
 0x22b   : > { %v4909_v38 = vsel %vm1986_vm11, %v2626_v47, %v2622_v31  ;;  %v1191_v21 = vpop.xlane.xlu1 %1190  ;;  %v1188_v11 = vpop.xlane.xlu0 %1187 }
 0x22c   : > { %v2858_v41 = vrot.slane %v1835_v42, %v3931_v46  ;;  %v2863_v13 = vrot.slane %v1836_v48, %v3939_v53  ;;  %v1454_v5 = vpack.c.bf16 %v1191_v21, %v1188_v11 }
 0x22e   : > { %v2859_v56 = vsel %vm5119_vm2, %v2858_v41, %v4762_v62  ;;  %v1849_v52 = vunpack.c.l.b16 %v1454_v5  ;;  %v1850_v3 = vunpack.c.h.b16 %v1454_v5  ;;  %vm5126_vm2 = vmmov %vm5125_vm1 }
 0x22f   : > { %v4916_v33 = vsel %vm1986_vm11, %v2863_v13, %v2859_v56  ;;  %v1335_v12 = vpop.xlane.xlu1 %1334  ;;  %v1332_v58 = vpop.xlane.xlu0 %1331 }
 0x230   : > { %v2927_v43 = vrot.slane %v1849_v52, %v3910_v14  ;;  %v2932_v50 = vrot.slane %v1850_v3, %v3917_v24  ;;  %v1478_v1 = vpack.c.bf16 %v1335_v12, %v1332_v58 }
 0x232   : > { %v2928_v8 = vsel %vm1965_vm8, %v2927_v43, %v4782_v22  ;;  %v1897_v30 = vunpack.c.l.b16 %v1478_v1  ;;  %v1898_v16 = vunpack.c.h.b16 %v1478_v1 }
 0x233   : > { %v4923_v28 = vsel %vm1972_vm9, %v2932_v50, %v2928_v8  ;;  %v873_v62 = vpop.xlane.xlu1 %872  ;;  %v870_v44 = vpop.xlane.xlu0 %869 }
 0x234   : > { %v3164_v51 = vrot.slane %v1897_v30, %v3910_v14  ;;  %v3169_v39 = vrot.slane %v1898_v16, %v3917_v24  ;;  %v1401_v4 = vpack.c.bf16 %v873_v62, %v870_v44 }
 0x236   : > { %v3165_v15 = vsel %vm1965_vm8, %v3164_v51, %v4799_v45  ;;  %v1743_v7 = vunpack.c.l.b16 %v1401_v4  ;;  %v1744_v35 = vunpack.c.h.b16 %v1401_v4 }
 0x237   : > { %v4930_v60 = vsel %vm1972_vm9, %v3169_v39, %v3165_v15  ;;  %v915_v22 = vpop.xlane.xlu1 %914  ;;  %v912_v9 = vpop.xlane.xlu0 %911 }
 0x238   : > { %v2404_v10 = vrot.slane %v1743_v7, %v3960_v18  ;;  %v2409_v17 = vrot.slane %v1744_v35, %v3967_v25  ;;  %v1408_v57 = vpack.c.bf16 %v915_v22, %v912_v9 }
 0x23a   : > { %v2405_v32 = vsel %vm2007_vm14, %v2404_v10, %v4814_v40  ;;  %v1757_v23 = vunpack.c.l.b16 %v1408_v57  ;;  %v1758_v26 = vunpack.c.h.b16 %v1408_v57 }
 0x23b   : > { %v2410_v2 = vsel %vm2014_vm15, %v2409_v17, %v2405_v32  ;;  %v1059_v45 = vpop.xlane.xlu1 %1058  ;;  %v1056_v61 = vpop.xlane.xlu0 %1055 }
 0x23c   : > { %v3216_v54 = vsel %vm3203_vm10, %v2410_v2, %v4182_v36  ;;  %v2473_v47 = vrot.slane %v1757_v23, %v3946_v63  ;;  %v2478_v27 = vrot.slane %v1758_v26, %v3949_v0  ;;  %v1432_v20 = vpack.c.bf16 %v1059_v45, %v1056_v61  ;;  %vm5120_vm10 = vmmov %vm5115_vm3 }
 0x23e   : > { %v2474_v31 = vsel %vm5115_vm3, %v2473_v47, %v4827_v29  ;;  %v1805_v42 = vunpack.c.l.b16 %v1432_v20  ;;  %v1806_v48 = vunpack.c.h.b16 %v1432_v20 }
 0x23f   : > { %v4944_v40 = vsel %vm2000_vm13, %v2478_v27, %v2474_v31  ;;  %v1101_v21 = vpop.xlane.xlu1 %1100  ;;  %v1098_v11 = vpop.xlane.xlu0 %1097 }
 0x240   : > { %v2710_v41 = vrot.slane %v1805_v42, %v3946_v63  ;;  %v2715_v13 = vrot.slane %v1806_v48, %v3949_v0  ;;  %v1439_v36 = vpack.c.bf16 %v1101_v21, %v1098_v11 }
 0x242   : > { %v2711_v5 = vsel %vm5120_vm10, %v2710_v41, %v4840_v55  ;;  %v1819_v56 = vunpack.c.l.b16 %v1439_v36  ;;  %v1820_v52 = vunpack.c.h.b16 %v1439_v36  ;;  %vm5127_vm10 = vmmov %vm5121_vm4 }
 0x243   : > { %v4951_v3 = vsel %vm2000_vm13, %v2715_v13, %v2711_v5  ;;  %v1245_v29 = vpop.xlane.xlu1 %1244  ;;  %v1242_v12 = vpop.xlane.xlu0 %1241 }
 0x244   : > { %v2779_v58 = vrot.slane %v1819_v56, %v3931_v46  ;;  %v2784_v43 = vrot.slane %v1820_v52, %v3939_v53  ;;  %v1463_v50 = vpack.c.bf16 %v1245_v29, %v1242_v12 }
 0x246   : > { %v2780_v1 = vsel %vm5121_vm4, %v2779_v58, %v4853_v59  ;;  %v1867_v8 = vunpack.c.l.b16 %v1463_v50  ;;  %v1868_v30 = vunpack.c.h.b16 %v1463_v50 }
 0x247   : > { %v4958_v16 = vsel %vm1986_vm11, %v2784_v43, %v2780_v1  ;;  %v1287_v55 = vpop.xlane.xlu1 %1286  ;;  %v1284_v62 = vpop.xlane.xlu0 %1283 }
 0x248   : > { %v3016_v44 = vrot.slane %v1867_v8, %v3931_v46  ;;  %v3021_v51 = vrot.slane %v1868_v30, %v3939_v53  ;;  %v1470_v39 = vpack.c.bf16 %v1287_v55, %v1284_v62 }
 0x24a   : > { %v3017_v4 = vsel %vm5122_vm5, %v3016_v44, %v4866_v37  ;;  %v1881_v15 = vunpack.c.l.b16 %v1470_v39  ;;  %v1882_v7 = vunpack.c.h.b16 %v1470_v39  ;;  %vm5128_vm5 = vmmov %vm5125_vm1 }
 0x24b   : > { %v4965_v35 = vsel %vm1986_vm11, %v3021_v51, %v3017_v4  ;;  %v969_v59 = vpop.xlane.xlu1 %968  ;;  %v966_v22 = vpop.xlane.xlu0 %965 }
 0x24c   : > { %v3085_v9 = vrot.slane %v1881_v15, %v3910_v14  ;;  %v3090_v10 = vrot.slane %v1882_v7, %v3917_v24  ;;  %v1417_v17 = vpack.c.bf16 %v969_v59, %v966_v22 }
 0x24e   : > { %v3086_v57 = vsel %vm1965_vm8, %v3085_v9, %v4876_v6  ;;  %v1775_v32 = vunpack.c.l.b16 %v1417_v17  ;;  %v1776_v23 = vunpack.c.h.b16 %v1417_v17  ;;  %vm5123_vm8 = vmmov %vm5115_vm3  ;;  %vm3211_vm3 = vcmask 1046534  }
 0x24f   : > { %v4972_v26 = vsel %vm1972_vm9, %v3090_v10, %v3086_v57  ;;  %v1011_v37 = vpop.xlane.xlu1 %1010  ;;  %v1008_v2 = vpop.xlane.xlu0 %1007  ;;  %vm3207_vm9 = vcmask 1044484  }
 0x250   : > { %v2562_v45 = vrot.slane %v1775_v32, %v3960_v18  ;;  %v2567_v61 = vrot.slane %v1776_v23, %v3967_v25  ;;  %v1424_v47 = vpack.c.bf16 %v1011_v37, %v1008_v2 }
 0x252   : > { %v2563_v14 = vsel %vm2007_vm14, %v2562_v45, %v4896_v34  ;;  %v1789_v24 = vunpack.c.l.b16 %v1424_v47  ;;  %v1790_v27 = vunpack.c.h.b16 %v1424_v47 }
 0x253   : > { %v2568_v6 = vsel %vm2014_vm15, %v2567_v61, %v2563_v14  ;;  %v1155_v20 = vpop.xlane.xlu1 %1154  ;;  %v1152_v31 = vpop.xlane.xlu0 %1151 }
 0x254   : > { %v2631_v42 = vrot.slane %v1789_v24, %v3946_v63  ;;  %v2636_v48 = vrot.slane %v1790_v27, %v3949_v0  ;;  %v3217_v21 = vsel %vm3205_vm6, %v2568_v6, %v3216_v54  ;;  %v1448_v10 = vpack.c.bf16 %v1155_v20, %v1152_v31 }
 0x256   : > { %v2632_v11 = vsel %vm5123_vm8, %v2631_v42, %v4909_v38  ;;  %v1837_v32 = vunpack.c.l.b16 %v1448_v10  ;;  %v1838_v2 = vunpack.c.h.b16 %v1448_v10  ;;  %vm5130_vm8 = vmmov %vm5125_vm1 }
 0x257   : > { %v2637_v41 = vsel %vm2000_vm13, %v2636_v48, %v2632_v11  ;;  %v4985_v13 = vpop.xlane.xlu1 %1196  ;;  %v1194_v34 = vpop.xlane.xlu0 %1193 }
 0x258   : > { %v2868_v45 = vrot.slane %v1837_v32, %v3946_v63  ;;  %v2873_v31 = vrot.slane %v1838_v2, %v3949_v0 }
 0x25a   : > { %v2869_v20 = vsel %vm5124_vm7, %v2868_v45, %v4916_v33  ;;  %vm5131_vm7 = vmmov %vm5125_vm1 }
 0x25b   : > { %v4987_v36 = vpop.xlane.xlu1 %1340  ;;  %v4989_v5 = vpop.xlane.xlu0 %1337 }
 0x25f   : > { %v921_v56 = vpop.xlane.xlu1 %920  ;;  %v918_v52 = vpop.xlane.xlu0 %917 }
 0x260   : > { %v1409_v29 = vpack.c.bf16 %v921_v56, %v918_v52 }
 0x262   : > { %v1759_v12 = vunpack.c.l.b16 %v1409_v29  ;;  %v1760_v58 = vunpack.c.h.b16 %v1409_v29 }
 0x263   : > { %v1065_v43 = vpop.xlane.xlu1 %1064  ;;  %v1062_v50 = vpop.xlane.xlu0 %1061 }
 0x264   : > { %v2483_v54 = vrot.slane %v1759_v12, %v3960_v18  ;;  %v2488_v38 = vrot.slane %v1760_v58, %v3967_v25  ;;  %v1433_v1 = vpack.c.bf16 %v1065_v43, %v1062_v50  ;;  %v2874_v50 = vsel %vm2000_vm13, %v2873_v31, %v2869_v20 }
 0x266   : > { %v2484_v8 = vsel %vm2007_vm14, %v2483_v54, %v4944_v40  ;;  %v1807_v30 = vunpack.c.l.b16 %v1433_v1  ;;  %v1808_v55 = vunpack.c.h.b16 %v1433_v1 }
 0x267   : > { %v2489_v62 = vsel %vm2014_vm15, %v2488_v38, %v2484_v8  ;;  %v1107_v44 = vpop.xlane.xlu1 %1106  ;;  %v1104_v51 = vpop.xlane.xlu0 %1103 }
 0x268   : > { %v3206_v39 = vsel %vm3205_vm6, %v2489_v62, %v4249_v49  ;;  %v2720_v4 = vrot.slane %v1807_v30, %v3960_v18  ;;  %v2725_v15 = vrot.slane %v1808_v55, %v3967_v25  ;;  %v1440_v42 = vpack.c.bf16 %v1107_v44, %v1104_v51  ;;  %vm5129_vm6 = vmmov %vm5121_vm4 }
 0x26a   : > { %v2721_v7 = vsel %vm2007_vm14, %v2720_v4, %v4951_v3  ;;  %v1821_v54 = vunpack.c.l.b16 %v1440_v42  ;;  %v1822_v62 = vunpack.c.h.b16 %v1440_v42  ;;  %v1479_v4 = vpack.c.bf16 %v4987_v36, %v4989_v5 }
 0x26b   : > { %v2726_v59 = vsel %vm2014_vm15, %v2725_v15, %v2721_v7  ;;  %v1251_v40 = vpop.xlane.xlu1 %1250  ;;  %v1248_v22 = vpop.xlane.xlu0 %1247 }
 0x26c   : > { %v3218_v9 = vsel %vm3207_vm9, %v2726_v59, %v3217_v21  ;;  %v1464_v33 = vpack.c.bf16 %v1251_v40, %v1248_v22  ;;  %v2789_v51 = vrot.slane %v1821_v54, %v3946_v63  ;;  %v2794_v40 = vrot.slane %v1822_v62, %v3949_v0 }
 0x26d   : > { %v1900_v42 = vunpack.c.h.b16 %v1479_v4 }
 0x26e   : > { %v1869_v44 = vunpack.c.l.b16 %v1464_v33  ;;  %v2790_v22 = vsel %vm5125_vm1, %v2789_v51, %v4958_v16 }
 0x26f   : > { %v1293_v17 = vpop.xlane.xlu1 %1292  ;;  %v1290_v57 = vpop.xlane.xlu0 %1289 }
 0x270   : > { %v1471_v5 = vpack.c.bf16 %v1293_v17, %v1290_v57 }
 0x273   : > { %v1017_v23 = vpop.xlane.xlu1 %1016  ;;  %v1014_v49 = vpop.xlane.xlu0 %1013 }
 0x274   : > { %v1425_v37 = vpack.c.bf16 %v1017_v23, %v1014_v49 }
 0x276   : > { %v1791_v61 = vunpack.c.l.b16 %v1425_v37  ;;  %v1792_v47 = vunpack.c.h.b16 %v1425_v37  ;;  %v1899_v37 = vunpack.c.l.b16 %v1479_v4 }
 0x277   : > { %v1161_v14 = vpop.xlane.xlu1 %1160  ;;  %v1158_v3 = vpop.xlane.xlu0 %1157 }
 0x278   : > { %v2641_v24 = vrot.slane %v1791_v61, %v3960_v18  ;;  %v2646_v27 = vrot.slane %v1792_v47, %v3967_v25  ;;  %v1449_v6 = vpack.c.bf16 %v1161_v14, %v1158_v3  ;;  %v2795_v14 = vsel %vm2000_vm13, %v2794_v40, %v2790_v22 }
 0x279   : > { %v3174_v17 = vrot.slane %v1899_v37, %v3931_v46 }
 0x27a   : > { %v2642_v48 = vsel %vm2007_vm14, %v2641_v24, %v2637_v41  ;;  %v1839_v21 = vunpack.c.l.b16 %v1449_v6  ;;  %v1840_v11 = vunpack.c.h.b16 %v1449_v6  ;;  %v1455_v41 = vpack.c.bf16 %v4985_v13, %v1194_v34 }
 0x27b   : > { %v2647_v56 = vsel %vm2014_vm15, %v2646_v27, %v2642_v48  ;;  %v1203_v52 = vpop.xlane.xlu1 %1202  ;;  %v1200_v29 = vpop.xlane.xlu0 %1199  ;;  %v1870_v13 = vunpack.c.h.b16 %v1464_v33  ;;  %v3026_v34 = vrot.slane %v1869_v44, %v3946_v63  ;;  %v3175_v44 = vsel %vm5121_vm4, %v3174_v17, %v4930_v60 }
 0x27c   : > { %v2878_v12 = vrot.slane %v1839_v21, %v3960_v18  ;;  %v2883_v58 = vrot.slane %v1840_v11, %v3967_v25  ;;  %v3208_v43 = vsel %vm3207_vm9, %v2647_v56, %v3206_v39  ;;  %v1851_v39 = vunpack.c.l.b16 %v1455_v41 }
 0x27d   : > { %v1852_v23 = vunpack.c.h.b16 %v1455_v41  ;;  %v3027_v16 = vsel %vm5126_vm2, %v3026_v34, %v4965_v35  ;;  %v3031_v3 = vrot.slane %v1870_v13, %v3949_v0  ;;  %v1883_v11 = vunpack.c.l.b16 %v1471_v5 }
 0x27e   : > { %v2879_v38 = vsel %vm2007_vm14, %v2878_v12, %v2874_v50  ;;  %v2937_v49 = vrot.slane %v1851_v39, %v3931_v46  ;;  %vm3213_vm9 = vcmask 1047559  }
 0x27f   : > { %v1347_v1 = vpop.xlane.xlu1 %1346  ;;  %v1344_v8 = vpop.xlane.xlu0 %1343  ;;  %v2884_v30 = vsel %vm2014_vm15, %v2883_v58, %v2879_v38  ;;  %v3032_v12 = vsel %vm2000_vm13, %v3031_v3, %v3027_v16  ;;  %v3095_v51 = vrot.slane %v1883_v11, %v3931_v46 }
 0x280   : > { %v3219_v55 = vsel %vm3209_vm12, %v2884_v30, %v3218_v9  ;;  %v1456_v9 = vpack.c.bf16 %v1203_v52, %v1200_v29  ;;  %v1480_v24 = vpack.c.bf16 %v1347_v1, %v1344_v8  ;;  %v2942_v29 = vrot.slane %v1852_v23, %v3939_v53 }
 0x281   : > { %v2938_v33 = vsel %vm5127_vm10, %v2937_v49, %v4923_v28  ;;  %v3179_v1 = vrot.slane %v1900_v42, %v3939_v53  ;;  %v1884_v8 = vunpack.c.h.b16 %v1471_v5 }
 0x282   : > { %v1853_v27 = vunpack.c.l.b16 %v1456_v9  ;;  %v1854_v58 = vunpack.c.h.b16 %v1456_v9  ;;  %v1901_v50 = vunpack.c.l.b16 %v1480_v24  ;;  %v2943_v4 = vsel %vm1986_vm11, %v2942_v29, %v2938_v33 }
 0x283   : > { %v1113_v15 = vpop.xlane.xlu1 %1112  ;;  %v1110_v7 = vpop.xlane.xlu0 %1109  ;;  %v3180_v9 = vsel %vm1986_vm11, %v3179_v1, %v3175_v44  ;;  %v3100_v60 = vrot.slane %v1884_v8, %v3939_v53 }
 0x284   : > { %v1441_v59 = vpack.c.bf16 %v1113_v15, %v1110_v7  ;;  %v2947_v54 = vrot.slane %v1853_v27, %v3946_v63  ;;  %v2952_v15 = vrot.slane %v1854_v58, %v3949_v0  ;;  %v1902_v7 = vunpack.c.h.b16 %v1480_v24 }
 0x286   : > { %v1823_v10 = vunpack.c.l.b16 %v1441_v59  ;;  %v1824_v32 = vunpack.c.h.b16 %v1441_v59  ;;  %v3184_v59 = vrot.slane %v1901_v50, %v3946_v63  ;;  %v2948_v40 = vsel %vm5128_vm5, %v2947_v54, %v2943_v4 }
 0x287   : > { %v1257_v2 = vpop.xlane.xlu1 %1256  ;;  %v1254_v36 = vpop.xlane.xlu0 %1253  ;;  %v2953_v37 = vsel %vm2000_vm13, %v2952_v15, %v2948_v40 }
 0x288   : > { %v2799_v45 = vrot.slane %v1823_v10, %v3960_v18  ;;  %v2804_v61 = vrot.slane %v1824_v32, %v3967_v25  ;;  %v1465_v47 = vpack.c.bf16 %v1257_v2, %v1254_v36  ;;  %v3185_v2 = vsel %vm5130_vm8, %v3184_v59, %v3180_v9 }
 0x289   : > { %v3189_v36 = vrot.slane %v1902_v7, %v3949_v0  ;;  %v3569_v7 = vld [vmem:[#allocation2] ss:$0 sm:$0xff] }
 0x28a   : > { %v2800_v6 = vsel %vm2007_vm14, %v2799_v45, %v2795_v14  ;;  %v1871_v20 = vunpack.c.l.b16 %v1465_v47  ;;  %v1872_v31 = vunpack.c.h.b16 %v1465_v47 }
 0x28b   : > { %v2805_v57 = vsel %vm2014_vm15, %v2804_v61, %v2800_v6  ;;  %v1299_v48 = vpop.xlane.xlu1 %1298  ;;  %v1296_v21 = vpop.xlane.xlu0 %1295 }
 0x28c   : > { %v3036_v56 = vrot.slane %v1871_v20, %v3960_v18  ;;  %v3041_v35 = vrot.slane %v1872_v31, %v3967_v25  ;;  %v3210_v52 = vsel %vm3209_vm12, %v2805_v57, %v3208_v43  ;;  %v1472_v38 = vpack.c.bf16 %v1299_v48, %v1296_v21 }
 0x28e   : > { %v3037_v41 = vsel %vm2007_vm14, %v3036_v56, %v3032_v12  ;;  %v1885_v13 = vunpack.c.l.b16 %v1472_v38  ;;  %v1886_v5 = vunpack.c.h.b16 %v1472_v38 }
 0x28f   : > { %v1209_v30 = vpop.xlane.xlu1 %1208  ;;  %v1206_v62 = vpop.xlane.xlu0 %1205  ;;  %v3042_v43 = vsel %vm2014_vm15, %v3041_v35, %v3037_v41 }
 0x290   : > { %v1457_v39 = vpack.c.bf16 %v1209_v30, %v1206_v62  ;;  %v3220_v28 = vsel %vm3211_vm3, %v3042_v43, %v3219_v55  ;;  %v3096_v55 = vsel %vm5129_vm6, %v3095_v51, %v4972_v26  ;;  %v3105_v45 = vrot.slane %v1885_v13, %v3946_v63 }
 0x291   : > { %v3101_v20 = vsel %vm1986_vm11, %v3100_v60, %v3096_v55  ;;  %v3110_v31 = vrot.slane %v1886_v5, %v3949_v0  ;;  %v3190_v63 = vsel %vm2000_vm13, %v3189_v36, %v3185_v2  ;;  %vm3472_vm11 = vcmask 7168  }
 0x292   : > { %v1855_v34 = vunpack.c.l.b16 %v1457_v39  ;;  %v1856_v22 = vunpack.c.h.b16 %v1457_v39  ;;  %v3106_v42 = vsel %vm5131_vm7, %v3105_v45, %v3101_v20 }
 0x293   : > { %v1353_v46 = vpop.xlane.xlu1 %1352  ;;  %v1350_v10 = vpop.xlane.xlu0 %1349 }
 0x294   : > { %v2957_v32 = vrot.slane %v1855_v34, %v3960_v18  ;;  %v2962_v23 = vrot.slane %v1856_v22, %v3967_v25  ;;  %v1481_v49 = vpack.c.bf16 %v1353_v46, %v1350_v10 }
 0x296   : > { %v2958_v53 = vsel %vm2007_vm14, %v2957_v32, %v2953_v37  ;;  %v1903_v61 = vunpack.c.l.b16 %v1481_v49  ;;  %v1904_v47 = vunpack.c.h.b16 %v1481_v49 }
 0x297   : > { %v1305_v14 = vpop.xlane.xlu1 %1304  ;;  %v1302_v26 = vpop.xlane.xlu0 %1301  ;;  %v2963_v16 = vsel %vm2014_vm15, %v2962_v23, %v2958_v53 }
 0x298   : > { %v3194_v3 = vrot.slane %v1903_v61, %v3960_v18  ;;  %v3199_v24 = vrot.slane %v1904_v47, %v3967_v25  ;;  %v1473_v27 = vpack.c.bf16 %v1305_v14, %v1302_v26  ;;  %v3212_v6 = vsel %vm3211_vm3, %v2963_v16, %v3210_v52 }
 0x299   : > { %v3111_v52 = vsel %vm2000_vm13, %v3110_v31, %v3106_v42 }
 0x29a   : > { %v1887_v17 = vunpack.c.l.b16 %v1473_v27  ;;  %v1888_v57 = vunpack.c.h.b16 %v1473_v27  ;;  %v3195_v48 = vsel %vm2007_vm14, %v3194_v3, %v3190_v63 }
 0x29b   : > { %v3200_v21 = vsel %vm2014_vm15, %v3199_v24, %v3195_v48  ;;  %v3458_v62 = vpop.permute.xlu0 %3457 }
 0x29c   : > { %v3115_v11 = vrot.slane %v1887_v17, %v3960_v18  ;;  %v3120_v56 = vrot.slane %v1888_v57, %v3967_v25  ;;  %v3221_v35 = vsel %vm3213_vm9, %v3200_v21, %v3220_v28  ;;  %v3566_v18 = vld [vmem:[%s5104_s5] ss:$0 sm:$0xff] }
 0x29d   : > { %v3223_v29 = vpack.c.b16 %v3221_v35, %v3221_v35  ;;  %v3549_v25 = vld [vmem:[%s5102_s3] ss:$0 sm:$0xff] }
 0x29e   : > { %v3116_v0 = vsel %vm2007_vm14, %v3115_v11, %v3111_v52 }
 0x29f   : > { %3354 = vmatprep.mubr.bf16.mxu0 %v3223_v29  ;;  %v3121_v12 = vsel %vm2014_vm15, %v3120_v56, %v3116_v0 }
 0x2a0   : > { %v3214_v58 = vsel %vm3213_vm9, %v3121_v12, %v3212_v6 }
 0x2a1   : > { %v3222_v50 = vpack.c.b16 %v3214_v58, %v3214_v58 }
 0x2a3   : > { %3355 = vmatmul.mubr.bf16.vlgmr.msra.gmra.mxu0 %v3222_v50 }
 0x2e7   : > { %v3443_v33 = vpop.f32.mrf.mxu1 }
 0x2e8   : > { %v3444_v8 = vadd.f32 %v3566_v18, %v3443_v33 }
 0x2e9   : > { %v3601_v54 = vpop.f32.mrf.mxu1 }
 0x2ea   : > { %v3460_v39 = vmul.f32 %v3458_v62, %v3444_v8 }
 0x2ec   : > { %v3461_v4 = vsel %vm585_vm0, %v3460_v39, 0.0 }
 0x363   : > { %v3589_v38 = vpop.f32.mrf.mxu0 }
 0x365   : > { %v3590_v41 = vpop.f32.mrf.mxu0 }
 0x366   : > { %v3591_v1 = vadd.f32 %v3590_v41, %v3589_v38 }
 0x367   : > { %v3592_v30 = vpop.f32.mrf.mxu0 }
 0x368   : > { %v3357_v43 = vadd.f32 %v3591_v1, %v3549_v25 }
 0x369   : > { %v3593_v44 = vpop.f32.mrf.mxu0 }
 0x36a   : > { %v3453_v51 = vmul.f32 %v4887_v19, %v3357_v43 }
 0x36c   : > { %v3454_v28 = vsel %vm585_vm0, %v3453_v51, 0.0 }
 0x36d   : > { %3455 = vadd.xlane.f32.xlu1 %v3454_v28 }
 0x371   : > { %3462 = vadd.xlane.f32.xlu1 %v3461_v4 }
 0x3f6   : > { %v3456_v15 = vpop.xlane.xlu1 %3455 }
 0x3fa   : > { %v3463_v59 = vpop.xlane.xlu1 %3462 }
 0x3fb   : > { %v3464_v40 = vadd.f32 %v3463_v59, %v3456_v15 }
 0x3fd   : > { %v3471_v13 = vadd.f32 %v3569_v7, %v3464_v40 }
 0x3ff   : > { %3473 = vst.msk [vmem:[%s327_s18] sm:$0xff] %vm3472_vm11, %v3471_v13 }
 0x400 PF: > { %s20_s29 = sadd.s32 1, %s3635_s29  }
 0x401   : > { %p17_p5 = scmp.ge.s32.totalorder %s20_s29, 4  }
 0x403   :  { %19 = sbr.rel (!%p17_p5) target bundleno = 3 (0x3), region = 85 }

</bundles_post_ra>
